<compile_context>
chip_gen: v7x
topology: tpu7x:2x2x1
jax: 0.10.0
libtpu: 0.0.40
codegen_flags: <defaults>
</compile_context>

<pallas_src>
import functools

import numpy as np
import jax
import jax.numpy as jnp
from jax.experimental import pallas as pl
from jax.experimental.pallas import tpu as pltpu  # noqa: F401  (TPU backend assumed)

# ----------------------- model hyper-parameters (small) -----------------------
NUM_FEATURES = 16     # F
CNN_FILTERS = 8       # conv1 out channels; conv2 out = 2*CNN_FILTERS
HIDDEN = 32           # LSTM hidden size  (8H = 256 gate lanes)
NUM_LAYERS = 2        # kernel specialized for 2 layers (module default)
NUM_CLASSES = 2
VOCAB_SIZE = 100
SEQ_TAG_SIZE = 3
WORD_EMB_DIM = 16
SEQ_EMB_DIM = 4
B = 2                 # real batch
B_PAD = 8             # padded batch (sublane-aligned row blocks; free on MXU/VPU)
T = 16                # time steps (divisible by 4 after two MaxPool2d(2))


# ============================ the fused Pallas kernel ============================

def _fused_forward_kernel(x0_ref, emb_ref, keep_ref, sel_ref,
                          s1_ref, wk1_ref, cb1_ref, s2_ref, wk2_ref, cb2_ref,
                          wx0c_ref, wx0e_ref, b0_ref, whh0_ref,
                          wx1_ref, b1_ref, whh1_ref, dirm_ref,
                          fc1w_ref, fc1b_ref, fc2w_ref, fc2b_ref,
                          out_ref, *, t_out, hidden, batch):
    """Whole CNNLSTMClassifier forward (eval mode) for one padded batch.

    x0_ref  : (Bp*T, F)            acoustic, rows (b, t)
    emb_ref : (t_out*Bp, 20)       grouped word+seq embeddings, rows (t, b)
    keep_ref: (t_out, Bp, 2H)      per merged step: [1 | bwd-step-valid] state mask
    sel_ref : (t_out, Bp, 2H)      per merged step: [fwd t==len-1 | bwd t==len-1] select
    s*_ref  : (3, R, R)            per-kh time-shift matrices (rows pre-permuted for pool)
    wk*_ref : (3, K, N)            per-kh block-banded conv weights (cols pre-permuted)
    cb*_ref : (1, N)               tiled conv biases
    wx0c/wx0e/wx1 : input->gate weights, [fwd|bwd] merged + gate-grouped columns
    whh0/whh1     : (2H, 8H) block-diag recurrent weights, gate-grouped columns
    dirm_ref: (1, 8H)              1.0 on fwd-gate lanes, 0.0 on bwd-gate lanes
    out_ref : (Bp, 128)            logits padded to 128 lanes (unmasked store)
    """
    H = hidden
    Bp = batch
    H2 = 2 * H
    f32 = jnp.float32

    def mm(a, b):
        return jnp.dot(a, b, preferred_element_type=f32)

    # ---------------- CNN: two (conv3x3 + ReLU + maxpool2x2) stages, matmul-only -------
    def conv_pool(x, s_ref, wk_ref, b_ref):
        acc = mm(mm(s_ref[0], x), wk_ref[0])
        acc = acc + mm(mm(s_ref[1], x), wk_ref[1])
        acc = acc + mm(mm(s_ref[2], x), wk_ref[2])
        y = jnp.maximum(acc + b_ref[...], 0.0)
        r, c = y.shape
        y = jnp.maximum(y[:, : c // 2], y[:, c // 2:])      # 2x pool over features (lanes)
        return jnp.maximum(y[: r // 2, :], y[r // 2:, :])   # 2x pool over time (sublanes)

    p1 = conv_pool(x0_ref[...], s1_ref, wk1_ref, cb1_ref)   # (Bp*T/2, (F/2)*C1)
    feat = conv_pool(p1, s2_ref, wk2_ref, cb2_ref)          # (t_out*Bp, f_out*C2), rows (t,b)

    # ---------------- batched layer-0 input projection (one dot per stream) ------------
    g0 = (mm(feat, wx0c_ref[...]) + mm(emb_ref[...], wx0e_ref[...]) + b0_ref[...])
    # g0: (t_out*Bp, 8H), rows ordered (t, b), gate-grouped columns

    dirm = dirm_ref[...]
    ndirm = 1.0 - dirm
    whh0 = whh0_ref[...]
    whh1 = whh1_ref[...]

    def cell(gx, h, c, whh):
        # single MXU op on the recurrent critical path; serves BOTH directions.
        # gate column layout: [i_f,i_b | f_f,f_b | o_f,o_b | g_f,g_b]
        gates = gx + mm(h, whh)                              # (Bp, 8H)
        sg = jax.nn.sigmoid(gates[:, : 6 * H])               # i, f, o
        gg = jnp.tanh(gates[:, 6 * H:])                      # g
        c_new = sg[:, 2 * H: 4 * H] * c + sg[:, : 2 * H] * gg
        h_new = sg[:, 4 * H: 6 * H] * jnp.tanh(c_new)
        return h_new, c_new

    def rows(m, t):                                          # aligned 8-row block for time t
        return m[t * Bp:(t + 1) * Bp, :]

    z = jnp.zeros((Bp, H2), f32)

    # ---- layer 0: fwd processes time s, bwd processes time t_out-1-s in the same step --
    h, c = z, z
    h_steps = []
    for s in range(t_out):
        rs = t_out - 1 - s
        gx = dirm * rows(g0, s) + ndirm * rows(g0, rs)
        h_new, c_new = cell(gx, h, c, whh0)
        keep = keep_ref[s]                                   # masks bwd half (packed-seq)
        h = keep * h_new + (1.0 - keep) * h
        c = keep * c_new + (1.0 - keep) * c
        h_steps.append(h)

    # ---- batched layer-1 input projection: two row-stacked dots over all steps ---------
    hs = jnp.concatenate(h_steps, axis=0)                    # (t_out*Bp, 2H), rows (s, b)
    gf = mm(hs[:, :H], wx1_ref[:H, :])                       # fwd-source contrib, time order
    gb = mm(hs[:, H:], wx1_ref[H:, :])                       # bwd-source contrib, reversed time
    b1 = b1_ref[...]

    # ---- layer 1 + fold the pad_packed/final-step gather into the loop -----------------
    h, c = z, z
    last = z
    for s in range(t_out):
        rs = t_out - 1 - s
        g_s = rows(gf, s) + rows(gb, rs)                     # layer-1 gates for time s
        g_r = rows(gf, rs) + rows(gb, s)                     # layer-1 gates for time rs
        gx = dirm * g_s + ndirm * g_r + b1
        h_new, c_new = cell(gx, h, c, whh1)
        keep = keep_ref[s]
        h = keep * h_new + (1.0 - keep) * h
        c = keep * c_new + (1.0 - keep) * c
        last = last + sel_ref[s] * h                         # -> [h_fwd(len-1) | h_bwd(len-1)]

    # ---- classifier head: fc1 + ReLU (dropout = identity in eval) + fc2 (lane padded) --
    h1 = jnp.maximum(mm(last, fc1w_ref[...]) + fc1b_ref[...], 0.0)
    out_ref[...] = mm(h1, fc2w_ref[...]) + fc2b_ref[...]


# ============================ one-time parameter preparation ============================

def _shift_mat(L, kh):
    """S[out, in] = 1 iff in == out + kh - 1 (zero padding at the boundary)."""
    s = np.zeros((L, L), np.float32)
    for o in range(L):
        i = o + kh - 1
        if 0 <= i < L:
            s[o, i] = 1.0
    return s


def _pool_col_perm(n_blocks, blk):
    """Column permutation putting even spatial blocks first (for the 2x width pool)."""
    half = n_blocks // 2
    idx = np.empty(n_blocks * blk, np.int64)
    for nb in range(n_blocks):
        ob = 2 * nb if nb < half else 2 * (nb - half) + 1
        idx[nb * blk:(nb + 1) * blk] = ob * blk + np.arange(blk)
    return idx


def prepare_params(p):
    """Hoisted, one-time preprocessing of raw weights into kernel-ready constants."""
    H = HIDDEN
    Bp, Tt, F = B_PAD, T, NUM_FEATURES
    C1, C2 = CNN_FILTERS, 2 * CNN_FILTERS
    Hp1, Wp1 = Tt // 2, F // 2          # spatial dims after pool1
    t_out, f_out = Tt // 4, F // 4      # spatial dims after pool2

    # ---- conv stage 1: per-kh time-shift matrices with rows pre-permuted for the pool --
    perm1 = np.empty(Bp * Tt, np.int64)
    half1 = Bp * Hp1
    for b in range(Bp):
        for h2 in range(Hp1):
            perm1[b * Hp1 + h2] = b * Tt + 2 * h2
            perm1[half1 + b * Hp1 + h2] = b * Tt + 2 * h2 + 1
    S1 = np.stack([np.kron(np.eye(Bp, dtype=np.float32), _shift_mat(Tt, kh))[perm1, :]
                   for kh in range(3)])                                     # (3, Bp*T, Bp*T)

    cperm1 = _pool_col_perm(F, C1)
    w1 = p["conv1_w"]                                                        # (C1, 1, 3, 3)
    Wk1 = jnp.stack([
        sum(jnp.kron(jnp.asarray(_shift_mat(F, kw).T), w1[:, 0, kh, kw].reshape(1, C1))
            for kw in range(3))[:, cperm1]
        for kh in range(3)])                                                 # (3, F, F*C1)
    cb1 = jnp.tile(p["conv1_b"], F)[cperm1].reshape(1, -1)

    # ---- conv stage 2: rows (b, h2) -> output rows pre-permuted to (t, b) ---------------
    perm2 = np.empty(Bp * Hp1, np.int64)
    half2 = Bp * t_out
    for t in range(t_out):
        for b in range(Bp):
            perm2[t * Bp + b] = b * Hp1 + 2 * t
            perm2[half2 + t * Bp + b] = b * Hp1 + 2 * t + 1
    S2 = np.stack([np.kron(np.eye(Bp, dtype=np.float32), _shift_mat(Hp1, kh))[perm2, :]
                   for kh in range(3)])                                     # (3, Bp*Hp1, Bp*Hp1)

    cperm2 = _pool_col_perm(Wp1, C2)
    w2 = p["conv2_w"]                                                        # (C2, C1, 3, 3)
    Wk2 = jnp.stack([
        sum(jnp.kron(jnp.asarray(_shift_mat(Wp1, kw).T), w2[:, :, kh, kw].T)
            for kw in range(3))[:, cperm2]
        for kh in range(3)])                                                 # (3, Wp1*C1, Wp1*C2)
    cb2 = jnp.tile(p["conv2_b"], Wp1)[cperm2].reshape(1, -1)

    # ---- LSTM: [fwd|bwd] direction merge + gate-grouped column order -------------------
    # raw blocks: [i_f, f_f, g_f, o_f | i_b, f_b, g_b, o_b]
    # new order : [i_f, i_b, f_f, f_b, o_f, o_b, g_f, g_b]  (sigmoid lanes contiguous)
    blk_order = np.array([0, 4, 1, 5, 3, 7, 2, 6])
    gate_perm = np.concatenate([bo * H + np.arange(H) for bo in blk_order])

    def merge_wx(wf, wb):
        return jnp.concatenate([wf, wb], axis=1)[:, gate_perm]

    def merge_b(bf, bb):
        return jnp.concatenate([bf, bb])[gate_perm].reshape(1, -1)

    def merge_whh(wf, wb):
        z = jnp.zeros_like(wf)
        bd = jnp.concatenate([jnp.concatenate([wf, z], axis=1),
                              jnp.concatenate([z, wb], axis=1)], axis=0)     # (2H, 8H)
        return bd[:, gate_perm]

    wx0 = merge_wx(p["wih_l0"], p["wih_l0_r"])                               # (84, 8H)
    cnn_dim = C2 * f_out
    # kernel CNN features are laid out (f, c); reference combined order is (c, f)
    perm_cnn = np.array([c * f_out + f for f in range(f_out) for c in range(C2)])

    dirmask = ((np.arange(8 * H) // H) % 2 == 0).astype(np.float32).reshape(1, -1)

    return {
        "word_emb": p["word_emb"], "seq_emb": p["seq_emb"],
        "S1": jnp.asarray(S1), "Wk1": Wk1, "cb1": cb1,
        "S2": jnp.asarray(S2), "Wk2": Wk2, "cb2": cb2,
        "wx0_cnn": wx0[perm_cnn, :], "wx0_emb": wx0[cnn_dim:, :],
        "b0": merge_b(p["b_l0"], p["b_l0_r"]),
        "whh0": merge_whh(p["whh_l0"], p["whh_l0_r"]),
        "wx1": merge_wx(p["wih_l1"], p["wih_l1_r"]),
        "b1l": merge_b(p["b_l1"], p["b_l1_r"]),
        "whh1": merge_whh(p["whh_l1"], p["whh_l1_r"]),
        "dirmask": jnp.asarray(dirmask),
        "fc1_w": p["fc1_w"], "fc1_b": p["fc1_b"].reshape(1, -1),
        "fc2_w": jnp.pad(p["fc2_w"], ((0, 0), (0, 128 - NUM_CLASSES))),      # lane-dense store
        "fc2_b": jnp.pad(p["fc2_b"], (0, 128 - NUM_CLASSES)).reshape(1, -1),
    }


# ============================ forward (thin XLA glue + one pallas_call) ============================

def forward(prep, acoustic, word, seq, lengths):
    """acoustic: (B, T, F) f32, word/seq: (B, T) i32, lengths: (B,) i32 -> (B, C) f32."""
    Bb, Tt, F = acoustic.shape
    t_out = Tt // 4
    ds = Tt // t_out
    Bp = B_PAD
    H = HIDDEN

    # pad the tiny batch to 8 rows so every per-timestep row block is sublane-aligned
    pad = Bp - Bb
    acoustic_p = jnp.pad(acoustic, ((0, pad), (0, 0), (0, 0)))
    word_p = jnp.pad(word, ((0, pad), (0, 0)))
    seq_p = jnp.pad(seq, ((0, pad), (0, 0)))
    len_p = jnp.pad(lengths, (0, pad), constant_values=ds)

    x0 = acoustic_p.reshape(Bp * Tt, F)                       # rows (b, t)

    # grouped embeddings: last index of every downsample chunk (gathers stay in XLA glue)
    gw = word_p[:, ds - 1::ds]
    gs = seq_p[:, ds - 1::ds]
    emb = jnp.concatenate([prep["word_emb"][gw], prep["seq_emb"][gs]], axis=-1)
    emb_all = jnp.transpose(emb, (1, 0, 2)).reshape(t_out * Bp, -1)   # rows (t, b)

    # packed-sequence masks from int32 compares (no float equality in the kernel)
    len_down = jnp.clip(len_p // ds, 1, t_out).astype(jnp.int32)      # (Bp,)
    s_idx = jnp.arange(t_out, dtype=jnp.int32)
    bwd_valid = ((t_out - 1 - s_idx)[:, None] < len_down[None, :]).astype(jnp.float32)
    keep = jnp.concatenate(
        [jnp.ones((t_out, Bp, H), jnp.float32),
         jnp.broadcast_to(bwd_valid[:, :, None], (t_out, Bp, H))], axis=-1)
    sel_f = (len_down[None, :] == s_idx[:, None] + 1).astype(jnp.float32)
    sel_b = (len_down[None, :] == t_out - s_idx[:, None]).astype(jnp.float32)
    sel = jnp.concatenate(
        [jnp.broadcast_to(sel_f[:, :, None], (t_out, Bp, H)),
         jnp.broadcast_to(sel_b[:, :, None], (t_out, Bp, H))], axis=-1)

    out = pl.pallas_call(
        functools.partial(_fused_forward_kernel, t_out=t_out, hidden=H, batch=Bp),
        out_shape=jax.ShapeDtypeStruct((Bp, 128), jnp.float32),
    )(x0, emb_all, keep, sel,
      prep["S1"], prep["Wk1"], prep["cb1"], prep["S2"], prep["Wk2"], prep["cb2"],
      prep["wx0_cnn"], prep["wx0_emb"], prep["b0"], prep["whh0"],
      prep["wx1"], prep["b1l"], prep["whh1"], prep["dirmask"],
      prep["fc1_w"], prep["fc1_b"], prep["fc2_w"], prep["fc2_b"])
    return out[:Bb, :NUM_CLASSES]


# ============================ parameter init ============================

def init_params(key):
    c2 = CNN_FILTERS * 2
    f_out = NUM_FEATURES // 4
    lstm_in = c2 * f_out + WORD_EMB_DIM + SEQ_EMB_DIM      # 64 + 16 + 4 = 84
    lstm_out = 2 * HIDDEN

    keys = jax.random.split(key, 32)
    k = iter(keys)

    def rnd(shape, scale=0.1):
        return (scale * jax.random.normal(next(k), shape)).astype(jnp.float32)

    params = {
        "conv1_w": rnd((CNN_FILTERS, 1, 3, 3)),
        "conv1_b": rnd((CNN_FILTERS,)),
        "conv2_w": rnd((c2, CNN_FILTERS, 3, 3)),
        "conv2_b": rnd((c2,)),
        "word_emb": rnd((VOCAB_SIZE, WORD_EMB_DIM), 1.0),
        "seq_emb": rnd((SEQ_TAG_SIZE, SEQ_EMB_DIM), 1.0),
        "fc1_w": rnd((lstm_out, HIDDEN)),
        "fc1_b": rnd((HIDDEN,)),
        "fc2_w": rnd((HIDDEN, NUM_CLASSES)),
        "fc2_b": rnd((NUM_CLASSES,)),
    }
    for layer in range(NUM_LAYERS):
        d_in = lstm_in if layer == 0 else lstm_out
        for suf in ["", "_r"]:
            params[f"wih_l{layer}{suf}"] = rnd((d_in, 4 * HIDDEN))   # gate order [i, f, g, o]
            params[f"whh_l{layer}{suf}"] = rnd((HIDDEN, 4 * HIDDEN))
            params[f"b_l{layer}{suf}"] = rnd((4 * HIDDEN,))          # b_ih + b_hh combined
    return params


# ============================ main ============================

if __name__ == "__main__":
    key = jax.random.PRNGKey(0)
    k_param, k_ac, k_w, k_s = jax.random.split(key, 4)

    raw_params = init_params(k_param)
    prep = prepare_params(raw_params)       # one-time weight preprocessing (hoisted)

    acoustic = jax.random.normal(k_ac, (B, T, NUM_FEATURES), dtype=jnp.float32)
    word = jax.random.randint(k_w, (B, T), 0, VOCAB_SIZE, dtype=jnp.int32)
    seq = jax.random.randint(k_s, (B, T), 0, SEQ_TAG_SIZE, dtype=jnp.int32)
    lengths = jnp.array([T, T - 4], dtype=jnp.int32)

    logits = jax.jit(forward)(prep, acoustic, word, seq, lengths)
    logits = jax.block_until_ready(logits)

    assert logits.shape == (B, NUM_CLASSES)
    assert bool(jnp.all(jnp.isfinite(logits)))
    print("KERNEL_OK")
</pallas_src>

<mosaic_0001>
module attributes {stable_mosaic.version = 11 : i64} {
  func.func @_fused_forward_kernel(%arg0: memref<128x16xf32, #tpu.memory_space<vmem>>, %arg1: memref<32x20xf32, #tpu.memory_space<vmem>>, %arg2: memref<4x8x64xf32, #tpu.memory_space<vmem>>, %arg3: memref<4x8x64xf32, #tpu.memory_space<vmem>>, %arg4: memref<3x128x128xf32, #tpu.memory_space<vmem>>, %arg5: memref<3x16x128xf32, #tpu.memory_space<vmem>>, %arg6: memref<1x128xf32, #tpu.memory_space<vmem>>, %arg7: memref<3x64x64xf32, #tpu.memory_space<vmem>>, %arg8: memref<3x64x128xf32, #tpu.memory_space<vmem>>, %arg9: memref<1x128xf32, #tpu.memory_space<vmem>>, %arg10: memref<64x256xf32, #tpu.memory_space<vmem>>, %arg11: memref<20x256xf32, #tpu.memory_space<vmem>>, %arg12: memref<1x256xf32, #tpu.memory_space<vmem>>, %arg13: memref<64x256xf32, #tpu.memory_space<vmem>>, %arg14: memref<64x256xf32, #tpu.memory_space<vmem>>, %arg15: memref<1x256xf32, #tpu.memory_space<vmem>>, %arg16: memref<64x256xf32, #tpu.memory_space<vmem>>, %arg17: memref<1x256xf32, #tpu.memory_space<vmem>>, %arg18: memref<64x32xf32, #tpu.memory_space<vmem>>, %arg19: memref<1x32xf32, #tpu.memory_space<vmem>>, %arg20: memref<32x128xf32, #tpu.memory_space<vmem>>, %arg21: memref<1x128xf32, #tpu.memory_space<vmem>>, %arg22: memref<8x128xf32, #tpu.memory_space<vmem>>) attributes {dimension_semantics = [], scalar_prefetch = 0 : i64, scratch_operands = 0 : i64, tpu.core_type = #tpu.core_type<tc>} {
    %c0 = arith.constant 0 : index
    %c0_0 = arith.constant 0 : index
    %0 = vector.load %arg0[%c0, %c0_0] : memref<128x16xf32, #tpu.memory_space<vmem>>, vector<128x16xf32>
    %c0_1 = arith.constant 0 : index
    %c0_2 = arith.constant 0 : index
    %c0_3 = arith.constant 0 : index
    %1 = vector.load %arg4[%c0_1, %c0_2, %c0_3] : memref<3x128x128xf32, #tpu.memory_space<vmem>>, vector<1x128x128xf32>
    %2 = vector.shape_cast %1 : vector<1x128x128xf32> to vector<128x128xf32>
    %cst = arith.constant dense<0.000000e+00> : vector<128x16xf32>
    %3 = tpu.matmul %2, %0, %cst {dimension_numbers = #tpu.dot_dimension_numbers<[1], [0], [0], [1], [0, 0, 1, 1], [], []>} : vector<128x128xf32>, vector<128x16xf32>, vector<128x16xf32> -> vector<128x16xf32>
    %c0_4 = arith.constant 0 : index
    %c0_5 = arith.constant 0 : index
    %c0_6 = arith.constant 0 : index
    %4 = vector.load %arg5[%c0_4, %c0_5, %c0_6] : memref<3x16x128xf32, #tpu.memory_space<vmem>>, vector<1x16x128xf32>
    %5 = vector.shape_cast %4 : vector<1x16x128xf32> to vector<16x128xf32>
    %cst_7 = arith.constant dense<0.000000e+00> : vector<128x128xf32>
    %6 = tpu.matmul %3, %5, %cst_7 {dimension_numbers = #tpu.dot_dimension_numbers<[1], [0], [0], [1], [0, 0, 1, 1], [], []>} : vector<128x16xf32>, vector<16x128xf32>, vector<128x128xf32> -> vector<128x128xf32>
    %c1 = arith.constant 1 : index
    %c0_8 = arith.constant 0 : index
    %c0_9 = arith.constant 0 : index
    %7 = vector.load %arg4[%c1, %c0_8, %c0_9] : memref<3x128x128xf32, #tpu.memory_space<vmem>>, vector<1x128x128xf32>
    %8 = vector.shape_cast %7 : vector<1x128x128xf32> to vector<128x128xf32>
    %cst_10 = arith.constant dense<0.000000e+00> : vector<128x16xf32>
    %9 = tpu.matmul %8, %0, %cst_10 {dimension_numbers = #tpu.dot_dimension_numbers<[1], [0], [0], [1], [0, 0, 1, 1], [], []>} : vector<128x128xf32>, vector<128x16xf32>, vector<128x16xf32> -> vector<128x16xf32>
    %c1_11 = arith.constant 1 : index
    %c0_12 = arith.constant 0 : index
    %c0_13 = arith.constant 0 : index
    %10 = vector.load %arg5[%c1_11, %c0_12, %c0_13] : memref<3x16x128xf32, #tpu.memory_space<vmem>>, vector<1x16x128xf32>
    %11 = vector.shape_cast %10 : vector<1x16x128xf32> to vector<16x128xf32>
    %cst_14 = arith.constant dense<0.000000e+00> : vector<128x128xf32>
    %12 = tpu.matmul %9, %11, %cst_14 {dimension_numbers = #tpu.dot_dimension_numbers<[1], [0], [0], [1], [0, 0, 1, 1], [], []>} : vector<128x16xf32>, vector<16x128xf32>, vector<128x128xf32> -> vector<128x128xf32>
    %13 = arith.addf %6, %12 : vector<128x128xf32>
    %c2 = arith.constant 2 : index
    %c0_15 = arith.constant 0 : index
    %c0_16 = arith.constant 0 : index
    %14 = vector.load %arg4[%c2, %c0_15, %c0_16] : memref<3x128x128xf32, #tpu.memory_space<vmem>>, vector<1x128x128xf32>
    %15 = vector.shape_cast %14 : vector<1x128x128xf32> to vector<128x128xf32>
    %cst_17 = arith.constant dense<0.000000e+00> : vector<128x16xf32>
    %16 = tpu.matmul %15, %0, %cst_17 {dimension_numbers = #tpu.dot_dimension_numbers<[1], [0], [0], [1], [0, 0, 1, 1], [], []>} : vector<128x128xf32>, vector<128x16xf32>, vector<128x16xf32> -> vector<128x16xf32>
    %c2_18 = arith.constant 2 : index
    %c0_19 = arith.constant 0 : index
    %c0_20 = arith.constant 0 : index
    %17 = vector.load %arg5[%c2_18, %c0_19, %c0_20] : memref<3x16x128xf32, #tpu.memory_space<vmem>>, vector<1x16x128xf32>
    %18 = vector.shape_cast %17 : vector<1x16x128xf32> to vector<16x128xf32>
    %cst_21 = arith.constant dense<0.000000e+00> : vector<128x128xf32>
    %19 = tpu.matmul %16, %18, %cst_21 {dimension_numbers = #tpu.dot_dimension_numbers<[1], [0], [0], [1], [0, 0, 1, 1], [], []>} : vector<128x16xf32>, vector<16x128xf32>, vector<128x128xf32> -> vector<128x128xf32>
    %20 = arith.addf %13, %19 : vector<128x128xf32>
    %c0_22 = arith.constant 0 : index
    %c0_23 = arith.constant 0 : index
    %21 = vector.load %arg6[%c0_22, %c0_23] : memref<1x128xf32, #tpu.memory_space<vmem>>, vector<1x128xf32>
    %22 = vector.broadcast %21 : vector<1x128xf32> to vector<128x128xf32>
    %23 = arith.addf %20, %22 : vector<128x128xf32>
    %cst_24 = arith.constant 0.000000e+00 : f32
    %24 = vector.broadcast %cst_24 : f32 to vector<128x128xf32>
    %25 = arith.maximumf %23, %24 : vector<128x128xf32>
    %26 = vector.extract_strided_slice %25 {offsets = [0, 0], sizes = [128, 64], strides = [1, 1]} : vector<128x128xf32> to vector<128x64xf32>
    %27 = vector.extract_strided_slice %25 {offsets = [0, 64], sizes = [128, 64], strides = [1, 1]} : vector<128x128xf32> to vector<128x64xf32>
    %28 = arith.maximumf %26, %27 : vector<128x64xf32>
    %29 = vector.extract_strided_slice %28 {offsets = [0, 0], sizes = [64, 64], strides = [1, 1]} : vector<128x64xf32> to vector<64x64xf32>
    %30 = vector.extract_strided_slice %28 {offsets = [64, 0], sizes = [64, 64], strides = [1, 1]} : vector<128x64xf32> to vector<64x64xf32>
    %31 = arith.maximumf %29, %30 : vector<64x64xf32>
    %c0_25 = arith.constant 0 : index
    %c0_26 = arith.constant 0 : index
    %c0_27 = arith.constant 0 : index
    %32 = vector.load %arg7[%c0_25, %c0_26, %c0_27] : memref<3x64x64xf32, #tpu.memory_space<vmem>>, vector<1x64x64xf32>
    %33 = vector.shape_cast %32 : vector<1x64x64xf32> to vector<64x64xf32>
    %cst_28 = arith.constant dense<0.000000e+00> : vector<64x64xf32>
    %34 = tpu.matmul %33, %31, %cst_28 {dimension_numbers = #tpu.dot_dimension_numbers<[1], [0], [0], [1], [0, 0, 1, 1], [], []>} : vector<64x64xf32>, vector<64x64xf32>, vector<64x64xf32> -> vector<64x64xf32>
    %c0_29 = arith.constant 0 : index
    %c0_30 = arith.constant 0 : index
    %c0_31 = arith.constant 0 : index
    %35 = vector.load %arg8[%c0_29, %c0_30, %c0_31] : memref<3x64x128xf32, #tpu.memory_space<vmem>>, vector<1x64x128xf32>
    %36 = vector.shape_cast %35 : vector<1x64x128xf32> to vector<64x128xf32>
    %cst_32 = arith.constant dense<0.000000e+00> : vector<64x128xf32>
    %37 = tpu.matmul %34, %36, %cst_32 {dimension_numbers = #tpu.dot_dimension_numbers<[1], [0], [0], [1], [0, 0, 1, 1], [], []>} : vector<64x64xf32>, vector<64x128xf32>, vector<64x128xf32> -> vector<64x128xf32>
    %c1_33 = arith.constant 1 : index
    %c0_34 = arith.constant 0 : index
    %c0_35 = arith.constant 0 : index
    %38 = vector.load %arg7[%c1_33, %c0_34, %c0_35] : memref<3x64x64xf32, #tpu.memory_space<vmem>>, vector<1x64x64xf32>
    %39 = vector.shape_cast %38 : vector<1x64x64xf32> to vector<64x64xf32>
    %cst_36 = arith.constant dense<0.000000e+00> : vector<64x64xf32>
    %40 = tpu.matmul %39, %31, %cst_36 {dimension_numbers = #tpu.dot_dimension_numbers<[1], [0], [0], [1], [0, 0, 1, 1], [], []>} : vector<64x64xf32>, vector<64x64xf32>, vector<64x64xf32> -> vector<64x64xf32>
    %c1_37 = arith.constant 1 : index
    %c0_38 = arith.constant 0 : index
    %c0_39 = arith.constant 0 : index
    %41 = vector.load %arg8[%c1_37, %c0_38, %c0_39] : memref<3x64x128xf32, #tpu.memory_space<vmem>>, vector<1x64x128xf32>
    %42 = vector.shape_cast %41 : vector<1x64x128xf32> to vector<64x128xf32>
    %cst_40 = arith.constant dense<0.000000e+00> : vector<64x128xf32>
    %43 = tpu.matmul %40, %42, %cst_40 {dimension_numbers = #tpu.dot_dimension_numbers<[1], [0], [0], [1], [0, 0, 1, 1], [], []>} : vector<64x64xf32>, vector<64x128xf32>, vector<64x128xf32> -> vector<64x128xf32>
    %44 = arith.addf %37, %43 : vector<64x128xf32>
    %c2_41 = arith.constant 2 : index
    %c0_42 = arith.constant 0 : index
    %c0_43 = arith.constant 0 : index
    %45 = vector.load %arg7[%c2_41, %c0_42, %c0_43] : memref<3x64x64xf32, #tpu.memory_space<vmem>>, vector<1x64x64xf32>
    %46 = vector.shape_cast %45 : vector<1x64x64xf32> to vector<64x64xf32>
    %cst_44 = arith.constant dense<0.000000e+00> : vector<64x64xf32>
    %47 = tpu.matmul %46, %31, %cst_44 {dimension_numbers = #tpu.dot_dimension_numbers<[1], [0], [0], [1], [0, 0, 1, 1], [], []>} : vector<64x64xf32>, vector<64x64xf32>, vector<64x64xf32> -> vector<64x64xf32>
    %c2_45 = arith.constant 2 : index
    %c0_46 = arith.constant 0 : index
    %c0_47 = arith.constant 0 : index
    %48 = vector.load %arg8[%c2_45, %c0_46, %c0_47] : memref<3x64x128xf32, #tpu.memory_space<vmem>>, vector<1x64x128xf32>
    %49 = vector.shape_cast %48 : vector<1x64x128xf32> to vector<64x128xf32>
    %cst_48 = arith.constant dense<0.000000e+00> : vector<64x128xf32>
    %50 = tpu.matmul %47, %49, %cst_48 {dimension_numbers = #tpu.dot_dimension_numbers<[1], [0], [0], [1], [0, 0, 1, 1], [], []>} : vector<64x64xf32>, vector<64x128xf32>, vector<64x128xf32> -> vector<64x128xf32>
    %51 = arith.addf %44, %50 : vector<64x128xf32>
    %c0_49 = arith.constant 0 : index
    %c0_50 = arith.constant 0 : index
    %52 = vector.load %arg9[%c0_49, %c0_50] : memref<1x128xf32, #tpu.memory_space<vmem>>, vector<1x128xf32>
    %53 = vector.broadcast %52 : vector<1x128xf32> to vector<64x128xf32>
    %54 = arith.addf %51, %53 : vector<64x128xf32>
    %cst_51 = arith.constant 0.000000e+00 : f32
    %55 = vector.broadcast %cst_51 : f32 to vector<64x128xf32>
    %56 = arith.maximumf %54, %55 : vector<64x128xf32>
    %57 = vector.extract_strided_slice %56 {offsets = [0, 0], sizes = [64, 64], strides = [1, 1]} : vector<64x128xf32> to vector<64x64xf32>
    %58 = vector.extract_strided_slice %56 {offsets = [0, 64], sizes = [64, 64], strides = [1, 1]} : vector<64x128xf32> to vector<64x64xf32>
    %59 = arith.maximumf %57, %58 : vector<64x64xf32>
    %60 = vector.extract_strided_slice %59 {offsets = [0, 0], sizes = [32, 64], strides = [1, 1]} : vector<64x64xf32> to vector<32x64xf32>
    %61 = vector.extract_strided_slice %59 {offsets = [32, 0], sizes = [32, 64], strides = [1, 1]} : vector<64x64xf32> to vector<32x64xf32>
    %62 = arith.maximumf %60, %61 : vector<32x64xf32>
    %c0_52 = arith.constant 0 : index
    %c0_53 = arith.constant 0 : index
    %63 = vector.load %arg10[%c0_52, %c0_53] : memref<64x256xf32, #tpu.memory_space<vmem>>, vector<64x256xf32>
    %cst_54 = arith.constant dense<0.000000e+00> : vector<32x256xf32>
    %64 = tpu.matmul %62, %63, %cst_54 {dimension_numbers = #tpu.dot_dimension_numbers<[1], [0], [0], [1], [0, 0, 1, 1], [], []>} : vector<32x64xf32>, vector<64x256xf32>, vector<32x256xf32> -> vector<32x256xf32>
    %c0_55 = arith.constant 0 : index
    %c0_56 = arith.constant 0 : index
    %65 = vector.load %arg1[%c0_55, %c0_56] : memref<32x20xf32, #tpu.memory_space<vmem>>, vector<32x20xf32>
    %c0_57 = arith.constant 0 : index
    %c0_58 = arith.constant 0 : index
    %66 = vector.load %arg11[%c0_57, %c0_58] : memref<20x256xf32, #tpu.memory_space<vmem>>, vector<20x256xf32>
    %cst_59 = arith.constant dense<0.000000e+00> : vector<32x256xf32>
    %67 = tpu.matmul %65, %66, %cst_59 {dimension_numbers = #tpu.dot_dimension_numbers<[1], [0], [0], [1], [0, 0, 1, 1], [], []>} : vector<32x20xf32>, vector<20x256xf32>, vector<32x256xf32> -> vector<32x256xf32>
    %68 = arith.addf %64, %67 : vector<32x256xf32>
    %c0_60 = arith.constant 0 : index
    %c0_61 = arith.constant 0 : index
    %69 = vector.load %arg12[%c0_60, %c0_61] : memref<1x256xf32, #tpu.memory_space<vmem>>, vector<1x256xf32>
    %70 = vector.broadcast %69 : vector<1x256xf32> to vector<32x256xf32>
    %71 = arith.addf %68, %70 : vector<32x256xf32>
    %c0_62 = arith.constant 0 : index
    %c0_63 = arith.constant 0 : index
    %72 = vector.load %arg17[%c0_62, %c0_63] : memref<1x256xf32, #tpu.memory_space<vmem>>, vector<1x256xf32>
    %cst_64 = arith.constant 1.000000e+00 : f32
    %73 = vector.broadcast %cst_64 : f32 to vector<1x256xf32>
    %74 = arith.subf %73, %72 : vector<1x256xf32>
    %c0_65 = arith.constant 0 : index
    %c0_66 = arith.constant 0 : index
    %75 = vector.load %arg13[%c0_65, %c0_66] : memref<64x256xf32, #tpu.memory_space<vmem>>, vector<64x256xf32>
    %c0_67 = arith.constant 0 : index
    %c0_68 = arith.constant 0 : index
    %76 = vector.load %arg16[%c0_67, %c0_68] : memref<64x256xf32, #tpu.memory_space<vmem>>, vector<64x256xf32>
    %cst_69 = arith.constant 0.000000e+00 : f32
    %77 = vector.broadcast %cst_69 : f32 to vector<8x64xf32>
    %78 = vector.extract_strided_slice %71 {offsets = [0, 0], sizes = [8, 256], strides = [1, 1]} : vector<32x256xf32> to vector<8x256xf32>
    %79 = vector.broadcast %72 : vector<1x256xf32> to vector<8x256xf32>
    %80 = arith.mulf %79, %78 : vector<8x256xf32>
    %81 = vector.extract_strided_slice %71 {offsets = [24, 0], sizes = [8, 256], strides = [1, 1]} : vector<32x256xf32> to vector<8x256xf32>
    %82 = vector.broadcast %74 : vector<1x256xf32> to vector<8x256xf32>
    %83 = arith.mulf %82, %81 : vector<8x256xf32>
    %84 = arith.addf %80, %83 : vector<8x256xf32>
    %cst_70 = arith.constant dense<0.000000e+00> : vector<8x256xf32>
    %85 = tpu.matmul %77, %75, %cst_70 {dimension_numbers = #tpu.dot_dimension_numbers<[1], [0], [0], [1], [0, 0, 1, 1], [], []>} : vector<8x64xf32>, vector<64x256xf32>, vector<8x256xf32> -> vector<8x256xf32>
    %86 = arith.addf %84, %85 : vector<8x256xf32>
    %87 = vector.extract_strided_slice %86 {offsets = [0, 0], sizes = [8, 192], strides = [1, 1]} : vector<8x256xf32> to vector<8x192xf32>
    %88 = arith.negf %87 : vector<8x192xf32>
    %89 = math.exp %88 : vector<8x192xf32>
    %cst_71 = arith.constant 1.000000e+00 : f32
    %90 = vector.broadcast %cst_71 : f32 to vector<8x192xf32>
    %91 = arith.addf %90, %89 : vector<8x192xf32>
    %92 = arith.divf %90, %91 : vector<8x192xf32>
    %93 = vector.extract_strided_slice %86 {offsets = [0, 192], sizes = [8, 64], strides = [1, 1]} : vector<8x256xf32> to vector<8x64xf32>
    %94 = math.tanh %93 : vector<8x64xf32>
    %95 = vector.extract_strided_slice %92 {offsets = [0, 64], sizes = [8, 64], strides = [1, 1]} : vector<8x192xf32> to vector<8x64xf32>
    %96 = arith.mulf %95, %77 : vector<8x64xf32>
    %97 = vector.extract_strided_slice %92 {offsets = [0, 0], sizes = [8, 64], strides = [1, 1]} : vector<8x192xf32> to vector<8x64xf32>
    %98 = arith.mulf %97, %94 : vector<8x64xf32>
    %99 = arith.addf %96, %98 : vector<8x64xf32>
    %100 = vector.extract_strided_slice %92 {offsets = [0, 128], sizes = [8, 64], strides = [1, 1]} : vector<8x192xf32> to vector<8x64xf32>
    %101 = math.tanh %99 : vector<8x64xf32>
    %102 = arith.mulf %100, %101 : vector<8x64xf32>
    %c0_72 = arith.constant 0 : index
    %c0_73 = arith.constant 0 : index
    %c0_74 = arith.constant 0 : index
    %103 = vector.load %arg2[%c0_72, %c0_73, %c0_74] : memref<4x8x64xf32, #tpu.memory_space<vmem>>, vector<1x8x64xf32>
    %104 = vector.shape_cast %103 : vector<1x8x64xf32> to vector<8x64xf32>
    %105 = arith.mulf %104, %102 : vector<8x64xf32>
    %cst_75 = arith.constant 1.000000e+00 : f32
    %106 = vector.broadcast %cst_75 : f32 to vector<8x64xf32>
    %107 = arith.subf %106, %104 : vector<8x64xf32>
    %108 = arith.mulf %107, %77 : vector<8x64xf32>
    %109 = arith.addf %105, %108 : vector<8x64xf32>
    %110 = arith.mulf %104, %99 : vector<8x64xf32>
    %cst_76 = arith.constant 1.000000e+00 : f32
    %111 = vector.broadcast %cst_76 : f32 to vector<8x64xf32>
    %112 = arith.subf %111, %104 : vector<8x64xf32>
    %113 = arith.mulf %112, %77 : vector<8x64xf32>
    %114 = arith.addf %110, %113 : vector<8x64xf32>
    %115 = vector.extract_strided_slice %71 {offsets = [8, 0], sizes = [8, 256], strides = [1, 1]} : vector<32x256xf32> to vector<8x256xf32>
    %116 = vector.broadcast %72 : vector<1x256xf32> to vector<8x256xf32>
    %117 = arith.mulf %116, %115 : vector<8x256xf32>
    %118 = vector.extract_strided_slice %71 {offsets = [16, 0], sizes = [8, 256], strides = [1, 1]} : vector<32x256xf32> to vector<8x256xf32>
    %119 = vector.broadcast %74 : vector<1x256xf32> to vector<8x256xf32>
    %120 = arith.mulf %119, %118 : vector<8x256xf32>
    %121 = arith.addf %117, %120 : vector<8x256xf32>
    %cst_77 = arith.constant dense<0.000000e+00> : vector<8x256xf32>
    %122 = tpu.matmul %109, %75, %cst_77 {dimension_numbers = #tpu.dot_dimension_numbers<[1], [0], [0], [1], [0, 0, 1, 1], [], []>} : vector<8x64xf32>, vector<64x256xf32>, vector<8x256xf32> -> vector<8x256xf32>
    %123 = arith.addf %121, %122 : vector<8x256xf32>
    %124 = vector.extract_strided_slice %123 {offsets = [0, 0], sizes = [8, 192], strides = [1, 1]} : vector<8x256xf32> to vector<8x192xf32>
    %125 = arith.negf %124 : vector<8x192xf32>
    %126 = math.exp %125 : vector<8x192xf32>
    %cst_78 = arith.constant 1.000000e+00 : f32
    %127 = vector.broadcast %cst_78 : f32 to vector<8x192xf32>
    %128 = arith.addf %127, %126 : vector<8x192xf32>
    %129 = arith.divf %127, %128 : vector<8x192xf32>
    %130 = vector.extract_strided_slice %123 {offsets = [0, 192], sizes = [8, 64], strides = [1, 1]} : vector<8x256xf32> to vector<8x64xf32>
    %131 = math.tanh %130 : vector<8x64xf32>
    %132 = vector.extract_strided_slice %129 {offsets = [0, 64], sizes = [8, 64], strides = [1, 1]} : vector<8x192xf32> to vector<8x64xf32>
    %133 = arith.mulf %132, %114 : vector<8x64xf32>
    %134 = vector.extract_strided_slice %129 {offsets = [0, 0], sizes = [8, 64], strides = [1, 1]} : vector<8x192xf32> to vector<8x64xf32>
    %135 = arith.mulf %134, %131 : vector<8x64xf32>
    %136 = arith.addf %133, %135 : vector<8x64xf32>
    %137 = vector.extract_strided_slice %129 {offsets = [0, 128], sizes = [8, 64], strides = [1, 1]} : vector<8x192xf32> to vector<8x64xf32>
    %138 = math.tanh %136 : vector<8x64xf32>
    %139 = arith.mulf %137, %138 : vector<8x64xf32>
    %c1_79 = arith.constant 1 : index
    %c0_80 = arith.constant 0 : index
    %c0_81 = arith.constant 0 : index
    %140 = vector.load %arg2[%c1_79, %c0_80, %c0_81] : memref<4x8x64xf32, #tpu.memory_space<vmem>>, vector<1x8x64xf32>
    %141 = vector.shape_cast %140 : vector<1x8x64xf32> to vector<8x64xf32>
    %142 = arith.mulf %141, %139 : vector<8x64xf32>
    %cst_82 = arith.constant 1.000000e+00 : f32
    %143 = vector.broadcast %cst_82 : f32 to vector<8x64xf32>
    %144 = arith.subf %143, %141 : vector<8x64xf32>
    %145 = arith.mulf %144, %109 : vector<8x64xf32>
    %146 = arith.addf %142, %145 : vector<8x64xf32>
    %147 = arith.mulf %141, %136 : vector<8x64xf32>
    %cst_83 = arith.constant 1.000000e+00 : f32
    %148 = vector.broadcast %cst_83 : f32 to vector<8x64xf32>
    %149 = arith.subf %148, %141 : vector<8x64xf32>
    %150 = arith.mulf %149, %114 : vector<8x64xf32>
    %151 = arith.addf %147, %150 : vector<8x64xf32>
    %152 = vector.extract_strided_slice %71 {offsets = [16, 0], sizes = [8, 256], strides = [1, 1]} : vector<32x256xf32> to vector<8x256xf32>
    %153 = vector.broadcast %72 : vector<1x256xf32> to vector<8x256xf32>
    %154 = arith.mulf %153, %152 : vector<8x256xf32>
    %155 = vector.extract_strided_slice %71 {offsets = [8, 0], sizes = [8, 256], strides = [1, 1]} : vector<32x256xf32> to vector<8x256xf32>
    %156 = vector.broadcast %74 : vector<1x256xf32> to vector<8x256xf32>
    %157 = arith.mulf %156, %155 : vector<8x256xf32>
    %158 = arith.addf %154, %157 : vector<8x256xf32>
    %cst_84 = arith.constant dense<0.000000e+00> : vector<8x256xf32>
    %159 = tpu.matmul %146, %75, %cst_84 {dimension_numbers = #tpu.dot_dimension_numbers<[1], [0], [0], [1], [0, 0, 1, 1], [], []>} : vector<8x64xf32>, vector<64x256xf32>, vector<8x256xf32> -> vector<8x256xf32>
    %160 = arith.addf %158, %159 : vector<8x256xf32>
    %161 = vector.extract_strided_slice %160 {offsets = [0, 0], sizes = [8, 192], strides = [1, 1]} : vector<8x256xf32> to vector<8x192xf32>
    %162 = arith.negf %161 : vector<8x192xf32>
    %163 = math.exp %162 : vector<8x192xf32>
    %cst_85 = arith.constant 1.000000e+00 : f32
    %164 = vector.broadcast %cst_85 : f32 to vector<8x192xf32>
    %165 = arith.addf %164, %163 : vector<8x192xf32>
    %166 = arith.divf %164, %165 : vector<8x192xf32>
    %167 = vector.extract_strided_slice %160 {offsets = [0, 192], sizes = [8, 64], strides = [1, 1]} : vector<8x256xf32> to vector<8x64xf32>
    %168 = math.tanh %167 : vector<8x64xf32>
    %169 = vector.extract_strided_slice %166 {offsets = [0, 64], sizes = [8, 64], strides = [1, 1]} : vector<8x192xf32> to vector<8x64xf32>
    %170 = arith.mulf %169, %151 : vector<8x64xf32>
    %171 = vector.extract_strided_slice %166 {offsets = [0, 0], sizes = [8, 64], strides = [1, 1]} : vector<8x192xf32> to vector<8x64xf32>
    %172 = arith.mulf %171, %168 : vector<8x64xf32>
    %173 = arith.addf %170, %172 : vector<8x64xf32>
    %174 = vector.extract_strided_slice %166 {offsets = [0, 128], sizes = [8, 64], strides = [1, 1]} : vector<8x192xf32> to vector<8x64xf32>
    %175 = math.tanh %173 : vector<8x64xf32>
    %176 = arith.mulf %174, %175 : vector<8x64xf32>
    %c2_86 = arith.constant 2 : index
    %c0_87 = arith.constant 0 : index
    %c0_88 = arith.constant 0 : index
    %177 = vector.load %arg2[%c2_86, %c0_87, %c0_88] : memref<4x8x64xf32, #tpu.memory_space<vmem>>, vector<1x8x64xf32>
    %178 = vector.shape_cast %177 : vector<1x8x64xf32> to vector<8x64xf32>
    %179 = arith.mulf %178, %176 : vector<8x64xf32>
    %cst_89 = arith.constant 1.000000e+00 : f32
    %180 = vector.broadcast %cst_89 : f32 to vector<8x64xf32>
    %181 = arith.subf %180, %178 : vector<8x64xf32>
    %182 = arith.mulf %181, %146 : vector<8x64xf32>
    %183 = arith.addf %179, %182 : vector<8x64xf32>
    %184 = arith.mulf %178, %173 : vector<8x64xf32>
    %cst_90 = arith.constant 1.000000e+00 : f32
    %185 = vector.broadcast %cst_90 : f32 to vector<8x64xf32>
    %186 = arith.subf %185, %178 : vector<8x64xf32>
    %187 = arith.mulf %186, %151 : vector<8x64xf32>
    %188 = arith.addf %184, %187 : vector<8x64xf32>
    %189 = vector.extract_strided_slice %71 {offsets = [24, 0], sizes = [8, 256], strides = [1, 1]} : vector<32x256xf32> to vector<8x256xf32>
    %190 = vector.broadcast %72 : vector<1x256xf32> to vector<8x256xf32>
    %191 = arith.mulf %190, %189 : vector<8x256xf32>
    %192 = vector.extract_strided_slice %71 {offsets = [0, 0], sizes = [8, 256], strides = [1, 1]} : vector<32x256xf32> to vector<8x256xf32>
    %193 = vector.broadcast %74 : vector<1x256xf32> to vector<8x256xf32>
    %194 = arith.mulf %193, %192 : vector<8x256xf32>
    %195 = arith.addf %191, %194 : vector<8x256xf32>
    %cst_91 = arith.constant dense<0.000000e+00> : vector<8x256xf32>
    %196 = tpu.matmul %183, %75, %cst_91 {dimension_numbers = #tpu.dot_dimension_numbers<[1], [0], [0], [1], [0, 0, 1, 1], [], []>} : vector<8x64xf32>, vector<64x256xf32>, vector<8x256xf32> -> vector<8x256xf32>
    %197 = arith.addf %195, %196 : vector<8x256xf32>
    %198 = vector.extract_strided_slice %197 {offsets = [0, 0], sizes = [8, 192], strides = [1, 1]} : vector<8x256xf32> to vector<8x192xf32>
    %199 = arith.negf %198 : vector<8x192xf32>
    %200 = math.exp %199 : vector<8x192xf32>
    %cst_92 = arith.constant 1.000000e+00 : f32
    %201 = vector.broadcast %cst_92 : f32 to vector<8x192xf32>
    %202 = arith.addf %201, %200 : vector<8x192xf32>
    %203 = arith.divf %201, %202 : vector<8x192xf32>
    %204 = vector.extract_strided_slice %197 {offsets = [0, 192], sizes = [8, 64], strides = [1, 1]} : vector<8x256xf32> to vector<8x64xf32>
    %205 = math.tanh %204 : vector<8x64xf32>
    %206 = vector.extract_strided_slice %203 {offsets = [0, 64], sizes = [8, 64], strides = [1, 1]} : vector<8x192xf32> to vector<8x64xf32>
    %207 = arith.mulf %206, %188 : vector<8x64xf32>
    %208 = vector.extract_strided_slice %203 {offsets = [0, 0], sizes = [8, 64], strides = [1, 1]} : vector<8x192xf32> to vector<8x64xf32>
    %209 = arith.mulf %208, %205 : vector<8x64xf32>
    %210 = arith.addf %207, %209 : vector<8x64xf32>
    %211 = vector.extract_strided_slice %203 {offsets = [0, 128], sizes = [8, 64], strides = [1, 1]} : vector<8x192xf32> to vector<8x64xf32>
    %212 = math.tanh %210 : vector<8x64xf32>
    %213 = arith.mulf %211, %212 : vector<8x64xf32>
    %c3 = arith.constant 3 : index
    %c0_93 = arith.constant 0 : index
    %c0_94 = arith.constant 0 : index
    %214 = vector.load %arg2[%c3, %c0_93, %c0_94] : memref<4x8x64xf32, #tpu.memory_space<vmem>>, vector<1x8x64xf32>
    %215 = vector.shape_cast %214 : vector<1x8x64xf32> to vector<8x64xf32>
    %216 = arith.mulf %215, %213 : vector<8x64xf32>
    %cst_95 = arith.constant 1.000000e+00 : f32
    %217 = vector.broadcast %cst_95 : f32 to vector<8x64xf32>
    %218 = arith.subf %217, %215 : vector<8x64xf32>
    %219 = arith.mulf %218, %183 : vector<8x64xf32>
    %220 = arith.addf %216, %219 : vector<8x64xf32>
    %221 = tpu.concatenate %109, %146, %183, %220 in 0 : vector<8x64xf32>, vector<8x64xf32>, vector<8x64xf32>, vector<8x64xf32> -> vector<32x64xf32>
    %222 = vector.extract_strided_slice %221 {offsets = [0, 0], sizes = [32, 32], strides = [1, 1]} : vector<32x64xf32> to vector<32x32xf32>
    %c0_96 = arith.constant 0 : index
    %c0_97 = arith.constant 0 : index
    %223 = vector.load %arg14[%c0_96, %c0_97] : memref<64x256xf32, #tpu.memory_space<vmem>>, vector<32x256xf32>
    %cst_98 = arith.constant dense<0.000000e+00> : vector<32x256xf32>
    %224 = tpu.matmul %222, %223, %cst_98 {dimension_numbers = #tpu.dot_dimension_numbers<[1], [0], [0], [1], [0, 0, 1, 1], [], []>} : vector<32x32xf32>, vector<32x256xf32>, vector<32x256xf32> -> vector<32x256xf32>
    %225 = vector.extract_strided_slice %221 {offsets = [0, 32], sizes = [32, 32], strides = [1, 1]} : vector<32x64xf32> to vector<32x32xf32>
    %c32 = arith.constant 32 : index
    %c0_99 = arith.constant 0 : index
    %226 = vector.load %arg14[%c32, %c0_99] : memref<64x256xf32, #tpu.memory_space<vmem>>, vector<32x256xf32>
    %cst_100 = arith.constant dense<0.000000e+00> : vector<32x256xf32>
    %227 = tpu.matmul %225, %226, %cst_100 {dimension_numbers = #tpu.dot_dimension_numbers<[1], [0], [0], [1], [0, 0, 1, 1], [], []>} : vector<32x32xf32>, vector<32x256xf32>, vector<32x256xf32> -> vector<32x256xf32>
    %c0_101 = arith.constant 0 : index
    %c0_102 = arith.constant 0 : index
    %228 = vector.load %arg15[%c0_101, %c0_102] : memref<1x256xf32, #tpu.memory_space<vmem>>, vector<1x256xf32>
    %229 = vector.extract_strided_slice %224 {offsets = [0, 0], sizes = [8, 256], strides = [1, 1]} : vector<32x256xf32> to vector<8x256xf32>
    %230 = vector.extract_strided_slice %227 {offsets = [24, 0], sizes = [8, 256], strides = [1, 1]} : vector<32x256xf32> to vector<8x256xf32>
    %231 = arith.addf %229, %230 : vector<8x256xf32>
    %232 = vector.extract_strided_slice %224 {offsets = [24, 0], sizes = [8, 256], strides = [1, 1]} : vector<32x256xf32> to vector<8x256xf32>
    %233 = vector.extract_strided_slice %227 {offsets = [0, 0], sizes = [8, 256], strides = [1, 1]} : vector<32x256xf32> to vector<8x256xf32>
    %234 = arith.addf %232, %233 : vector<8x256xf32>
    %235 = vector.broadcast %72 : vector<1x256xf32> to vector<8x256xf32>
    %236 = arith.mulf %235, %231 : vector<8x256xf32>
    %237 = vector.broadcast %74 : vector<1x256xf32> to vector<8x256xf32>
    %238 = arith.mulf %237, %234 : vector<8x256xf32>
    %239 = arith.addf %236, %238 : vector<8x256xf32>
    %240 = vector.broadcast %228 : vector<1x256xf32> to vector<8x256xf32>
    %241 = arith.addf %239, %240 : vector<8x256xf32>
    %cst_103 = arith.constant dense<0.000000e+00> : vector<8x256xf32>
    %242 = tpu.matmul %77, %76, %cst_103 {dimension_numbers = #tpu.dot_dimension_numbers<[1], [0], [0], [1], [0, 0, 1, 1], [], []>} : vector<8x64xf32>, vector<64x256xf32>, vector<8x256xf32> -> vector<8x256xf32>
    %243 = arith.addf %241, %242 : vector<8x256xf32>
    %244 = vector.extract_strided_slice %243 {offsets = [0, 0], sizes = [8, 192], strides = [1, 1]} : vector<8x256xf32> to vector<8x192xf32>
    %245 = arith.negf %244 : vector<8x192xf32>
    %246 = math.exp %245 : vector<8x192xf32>
    %cst_104 = arith.constant 1.000000e+00 : f32
    %247 = vector.broadcast %cst_104 : f32 to vector<8x192xf32>
    %248 = arith.addf %247, %246 : vector<8x192xf32>
    %249 = arith.divf %247, %248 : vector<8x192xf32>
    %250 = vector.extract_strided_slice %243 {offsets = [0, 192], sizes = [8, 64], strides = [1, 1]} : vector<8x256xf32> to vector<8x64xf32>
    %251 = math.tanh %250 : vector<8x64xf32>
    %252 = vector.extract_strided_slice %249 {offsets = [0, 64], sizes = [8, 64], strides = [1, 1]} : vector<8x192xf32> to vector<8x64xf32>
    %253 = arith.mulf %252, %77 : vector<8x64xf32>
    %254 = vector.extract_strided_slice %249 {offsets = [0, 0], sizes = [8, 64], strides = [1, 1]} : vector<8x192xf32> to vector<8x64xf32>
    %255 = arith.mulf %254, %251 : vector<8x64xf32>
    %256 = arith.addf %253, %255 : vector<8x64xf32>
    %257 = vector.extract_strided_slice %249 {offsets = [0, 128], sizes = [8, 64], strides = [1, 1]} : vector<8x192xf32> to vector<8x64xf32>
    %258 = math.tanh %256 : vector<8x64xf32>
    %259 = arith.mulf %257, %258 : vector<8x64xf32>
    %c0_105 = arith.constant 0 : index
    %c0_106 = arith.constant 0 : index
    %c0_107 = arith.constant 0 : index
    %260 = vector.load %arg2[%c0_105, %c0_106, %c0_107] : memref<4x8x64xf32, #tpu.memory_space<vmem>>, vector<1x8x64xf32>
    %261 = vector.shape_cast %260 : vector<1x8x64xf32> to vector<8x64xf32>
    %262 = arith.mulf %261, %259 : vector<8x64xf32>
    %cst_108 = arith.constant 1.000000e+00 : f32
    %263 = vector.broadcast %cst_108 : f32 to vector<8x64xf32>
    %264 = arith.subf %263, %261 : vector<8x64xf32>
    %265 = arith.mulf %264, %77 : vector<8x64xf32>
    %266 = arith.addf %262, %265 : vector<8x64xf32>
    %267 = arith.mulf %261, %256 : vector<8x64xf32>
    %cst_109 = arith.constant 1.000000e+00 : f32
    %268 = vector.broadcast %cst_109 : f32 to vector<8x64xf32>
    %269 = arith.subf %268, %261 : vector<8x64xf32>
    %270 = arith.mulf %269, %77 : vector<8x64xf32>
    %271 = arith.addf %267, %270 : vector<8x64xf32>
    %c0_110 = arith.constant 0 : index
    %c0_111 = arith.constant 0 : index
    %c0_112 = arith.constant 0 : index
    %272 = vector.load %arg3[%c0_110, %c0_111, %c0_112] : memref<4x8x64xf32, #tpu.memory_space<vmem>>, vector<1x8x64xf32>
    %273 = vector.shape_cast %272 : vector<1x8x64xf32> to vector<8x64xf32>
    %274 = arith.mulf %273, %266 : vector<8x64xf32>
    %275 = arith.addf %77, %274 : vector<8x64xf32>
    %276 = vector.extract_strided_slice %224 {offsets = [8, 0], sizes = [8, 256], strides = [1, 1]} : vector<32x256xf32> to vector<8x256xf32>
    %277 = vector.extract_strided_slice %227 {offsets = [16, 0], sizes = [8, 256], strides = [1, 1]} : vector<32x256xf32> to vector<8x256xf32>
    %278 = arith.addf %276, %277 : vector<8x256xf32>
    %279 = vector.extract_strided_slice %224 {offsets = [16, 0], sizes = [8, 256], strides = [1, 1]} : vector<32x256xf32> to vector<8x256xf32>
    %280 = vector.extract_strided_slice %227 {offsets = [8, 0], sizes = [8, 256], strides = [1, 1]} : vector<32x256xf32> to vector<8x256xf32>
    %281 = arith.addf %279, %280 : vector<8x256xf32>
    %282 = vector.broadcast %72 : vector<1x256xf32> to vector<8x256xf32>
    %283 = arith.mulf %282, %278 : vector<8x256xf32>
    %284 = vector.broadcast %74 : vector<1x256xf32> to vector<8x256xf32>
    %285 = arith.mulf %284, %281 : vector<8x256xf32>
    %286 = arith.addf %283, %285 : vector<8x256xf32>
    %287 = vector.broadcast %228 : vector<1x256xf32> to vector<8x256xf32>
    %288 = arith.addf %286, %287 : vector<8x256xf32>
    %cst_113 = arith.constant dense<0.000000e+00> : vector<8x256xf32>
    %289 = tpu.matmul %266, %76, %cst_113 {dimension_numbers = #tpu.dot_dimension_numbers<[1], [0], [0], [1], [0, 0, 1, 1], [], []>} : vector<8x64xf32>, vector<64x256xf32>, vector<8x256xf32> -> vector<8x256xf32>
    %290 = arith.addf %288, %289 : vector<8x256xf32>
    %291 = vector.extract_strided_slice %290 {offsets = [0, 0], sizes = [8, 192], strides = [1, 1]} : vector<8x256xf32> to vector<8x192xf32>
    %292 = arith.negf %291 : vector<8x192xf32>
    %293 = math.exp %292 : vector<8x192xf32>
    %cst_114 = arith.constant 1.000000e+00 : f32
    %294 = vector.broadcast %cst_114 : f32 to vector<8x192xf32>
    %295 = arith.addf %294, %293 : vector<8x192xf32>
    %296 = arith.divf %294, %295 : vector<8x192xf32>
    %297 = vector.extract_strided_slice %290 {offsets = [0, 192], sizes = [8, 64], strides = [1, 1]} : vector<8x256xf32> to vector<8x64xf32>
    %298 = math.tanh %297 : vector<8x64xf32>
    %299 = vector.extract_strided_slice %296 {offsets = [0, 64], sizes = [8, 64], strides = [1, 1]} : vector<8x192xf32> to vector<8x64xf32>
    %300 = arith.mulf %299, %271 : vector<8x64xf32>
    %301 = vector.extract_strided_slice %296 {offsets = [0, 0], sizes = [8, 64], strides = [1, 1]} : vector<8x192xf32> to vector<8x64xf32>
    %302 = arith.mulf %301, %298 : vector<8x64xf32>
    %303 = arith.addf %300, %302 : vector<8x64xf32>
    %304 = vector.extract_strided_slice %296 {offsets = [0, 128], sizes = [8, 64], strides = [1, 1]} : vector<8x192xf32> to vector<8x64xf32>
    %305 = math.tanh %303 : vector<8x64xf32>
    %306 = arith.mulf %304, %305 : vector<8x64xf32>
    %c1_115 = arith.constant 1 : index
    %c0_116 = arith.constant 0 : index
    %c0_117 = arith.constant 0 : index
    %307 = vector.load %arg2[%c1_115, %c0_116, %c0_117] : memref<4x8x64xf32, #tpu.memory_space<vmem>>, vector<1x8x64xf32>
    %308 = vector.shape_cast %307 : vector<1x8x64xf32> to vector<8x64xf32>
    %309 = arith.mulf %308, %306 : vector<8x64xf32>
    %cst_118 = arith.constant 1.000000e+00 : f32
    %310 = vector.broadcast %cst_118 : f32 to vector<8x64xf32>
    %311 = arith.subf %310, %308 : vector<8x64xf32>
    %312 = arith.mulf %311, %266 : vector<8x64xf32>
    %313 = arith.addf %309, %312 : vector<8x64xf32>
    %314 = arith.mulf %308, %303 : vector<8x64xf32>
    %cst_119 = arith.constant 1.000000e+00 : f32
    %315 = vector.broadcast %cst_119 : f32 to vector<8x64xf32>
    %316 = arith.subf %315, %308 : vector<8x64xf32>
    %317 = arith.mulf %316, %271 : vector<8x64xf32>
    %318 = arith.addf %314, %317 : vector<8x64xf32>
    %c1_120 = arith.constant 1 : index
    %c0_121 = arith.constant 0 : index
    %c0_122 = arith.constant 0 : index
    %319 = vector.load %arg3[%c1_120, %c0_121, %c0_122] : memref<4x8x64xf32, #tpu.memory_space<vmem>>, vector<1x8x64xf32>
    %320 = vector.shape_cast %319 : vector<1x8x64xf32> to vector<8x64xf32>
    %321 = arith.mulf %320, %313 : vector<8x64xf32>
    %322 = arith.addf %275, %321 : vector<8x64xf32>
    %323 = vector.extract_strided_slice %224 {offsets = [16, 0], sizes = [8, 256], strides = [1, 1]} : vector<32x256xf32> to vector<8x256xf32>
    %324 = vector.extract_strided_slice %227 {offsets = [8, 0], sizes = [8, 256], strides = [1, 1]} : vector<32x256xf32> to vector<8x256xf32>
    %325 = arith.addf %323, %324 : vector<8x256xf32>
    %326 = vector.extract_strided_slice %224 {offsets = [8, 0], sizes = [8, 256], strides = [1, 1]} : vector<32x256xf32> to vector<8x256xf32>
    %327 = vector.extract_strided_slice %227 {offsets = [16, 0], sizes = [8, 256], strides = [1, 1]} : vector<32x256xf32> to vector<8x256xf32>
    %328 = arith.addf %326, %327 : vector<8x256xf32>
    %329 = vector.broadcast %72 : vector<1x256xf32> to vector<8x256xf32>
    %330 = arith.mulf %329, %325 : vector<8x256xf32>
    %331 = vector.broadcast %74 : vector<1x256xf32> to vector<8x256xf32>
    %332 = arith.mulf %331, %328 : vector<8x256xf32>
    %333 = arith.addf %330, %332 : vector<8x256xf32>
    %334 = vector.broadcast %228 : vector<1x256xf32> to vector<8x256xf32>
    %335 = arith.addf %333, %334 : vector<8x256xf32>
    %cst_123 = arith.constant dense<0.000000e+00> : vector<8x256xf32>
    %336 = tpu.matmul %313, %76, %cst_123 {dimension_numbers = #tpu.dot_dimension_numbers<[1], [0], [0], [1], [0, 0, 1, 1], [], []>} : vector<8x64xf32>, vector<64x256xf32>, vector<8x256xf32> -> vector<8x256xf32>
    %337 = arith.addf %335, %336 : vector<8x256xf32>
    %338 = vector.extract_strided_slice %337 {offsets = [0, 0], sizes = [8, 192], strides = [1, 1]} : vector<8x256xf32> to vector<8x192xf32>
    %339 = arith.negf %338 : vector<8x192xf32>
    %340 = math.exp %339 : vector<8x192xf32>
    %cst_124 = arith.constant 1.000000e+00 : f32
    %341 = vector.broadcast %cst_124 : f32 to vector<8x192xf32>
    %342 = arith.addf %341, %340 : vector<8x192xf32>
    %343 = arith.divf %341, %342 : vector<8x192xf32>
    %344 = vector.extract_strided_slice %337 {offsets = [0, 192], sizes = [8, 64], strides = [1, 1]} : vector<8x256xf32> to vector<8x64xf32>
    %345 = math.tanh %344 : vector<8x64xf32>
    %346 = vector.extract_strided_slice %343 {offsets = [0, 64], sizes = [8, 64], strides = [1, 1]} : vector<8x192xf32> to vector<8x64xf32>
    %347 = arith.mulf %346, %318 : vector<8x64xf32>
    %348 = vector.extract_strided_slice %343 {offsets = [0, 0], sizes = [8, 64], strides = [1, 1]} : vector<8x192xf32> to vector<8x64xf32>
    %349 = arith.mulf %348, %345 : vector<8x64xf32>
    %350 = arith.addf %347, %349 : vector<8x64xf32>
    %351 = vector.extract_strided_slice %343 {offsets = [0, 128], sizes = [8, 64], strides = [1, 1]} : vector<8x192xf32> to vector<8x64xf32>
    %352 = math.tanh %350 : vector<8x64xf32>
    %353 = arith.mulf %351, %352 : vector<8x64xf32>
    %c2_125 = arith.constant 2 : index
    %c0_126 = arith.constant 0 : index
    %c0_127 = arith.constant 0 : index
    %354 = vector.load %arg2[%c2_125, %c0_126, %c0_127] : memref<4x8x64xf32, #tpu.memory_space<vmem>>, vector<1x8x64xf32>
    %355 = vector.shape_cast %354 : vector<1x8x64xf32> to vector<8x64xf32>
    %356 = arith.mulf %355, %353 : vector<8x64xf32>
    %cst_128 = arith.constant 1.000000e+00 : f32
    %357 = vector.broadcast %cst_128 : f32 to vector<8x64xf32>
    %358 = arith.subf %357, %355 : vector<8x64xf32>
    %359 = arith.mulf %358, %313 : vector<8x64xf32>
    %360 = arith.addf %356, %359 : vector<8x64xf32>
    %361 = arith.mulf %355, %350 : vector<8x64xf32>
    %cst_129 = arith.constant 1.000000e+00 : f32
    %362 = vector.broadcast %cst_129 : f32 to vector<8x64xf32>
    %363 = arith.subf %362, %355 : vector<8x64xf32>
    %364 = arith.mulf %363, %318 : vector<8x64xf32>
    %365 = arith.addf %361, %364 : vector<8x64xf32>
    %c2_130 = arith.constant 2 : index
    %c0_131 = arith.constant 0 : index
    %c0_132 = arith.constant 0 : index
    %366 = vector.load %arg3[%c2_130, %c0_131, %c0_132] : memref<4x8x64xf32, #tpu.memory_space<vmem>>, vector<1x8x64xf32>
    %367 = vector.shape_cast %366 : vector<1x8x64xf32> to vector<8x64xf32>
    %368 = arith.mulf %367, %360 : vector<8x64xf32>
    %369 = arith.addf %322, %368 : vector<8x64xf32>
    %370 = vector.extract_strided_slice %224 {offsets = [24, 0], sizes = [8, 256], strides = [1, 1]} : vector<32x256xf32> to vector<8x256xf32>
    %371 = vector.extract_strided_slice %227 {offsets = [0, 0], sizes = [8, 256], strides = [1, 1]} : vector<32x256xf32> to vector<8x256xf32>
    %372 = arith.addf %370, %371 : vector<8x256xf32>
    %373 = vector.extract_strided_slice %224 {offsets = [0, 0], sizes = [8, 256], strides = [1, 1]} : vector<32x256xf32> to vector<8x256xf32>
    %374 = vector.extract_strided_slice %227 {offsets = [24, 0], sizes = [8, 256], strides = [1, 1]} : vector<32x256xf32> to vector<8x256xf32>
    %375 = arith.addf %373, %374 : vector<8x256xf32>
    %376 = vector.broadcast %72 : vector<1x256xf32> to vector<8x256xf32>
    %377 = arith.mulf %376, %372 : vector<8x256xf32>
    %378 = vector.broadcast %74 : vector<1x256xf32> to vector<8x256xf32>
    %379 = arith.mulf %378, %375 : vector<8x256xf32>
    %380 = arith.addf %377, %379 : vector<8x256xf32>
    %381 = vector.broadcast %228 : vector<1x256xf32> to vector<8x256xf32>
    %382 = arith.addf %380, %381 : vector<8x256xf32>
    %cst_133 = arith.constant dense<0.000000e+00> : vector<8x256xf32>
    %383 = tpu.matmul %360, %76, %cst_133 {dimension_numbers = #tpu.dot_dimension_numbers<[1], [0], [0], [1], [0, 0, 1, 1], [], []>} : vector<8x64xf32>, vector<64x256xf32>, vector<8x256xf32> -> vector<8x256xf32>
    %384 = arith.addf %382, %383 : vector<8x256xf32>
    %385 = vector.extract_strided_slice %384 {offsets = [0, 0], sizes = [8, 192], strides = [1, 1]} : vector<8x256xf32> to vector<8x192xf32>
    %386 = arith.negf %385 : vector<8x192xf32>
    %387 = math.exp %386 : vector<8x192xf32>
    %cst_134 = arith.constant 1.000000e+00 : f32
    %388 = vector.broadcast %cst_134 : f32 to vector<8x192xf32>
    %389 = arith.addf %388, %387 : vector<8x192xf32>
    %390 = arith.divf %388, %389 : vector<8x192xf32>
    %391 = vector.extract_strided_slice %384 {offsets = [0, 192], sizes = [8, 64], strides = [1, 1]} : vector<8x256xf32> to vector<8x64xf32>
    %392 = math.tanh %391 : vector<8x64xf32>
    %393 = vector.extract_strided_slice %390 {offsets = [0, 64], sizes = [8, 64], strides = [1, 1]} : vector<8x192xf32> to vector<8x64xf32>
    %394 = arith.mulf %393, %365 : vector<8x64xf32>
    %395 = vector.extract_strided_slice %390 {offsets = [0, 0], sizes = [8, 64], strides = [1, 1]} : vector<8x192xf32> to vector<8x64xf32>
    %396 = arith.mulf %395, %392 : vector<8x64xf32>
    %397 = arith.addf %394, %396 : vector<8x64xf32>
    %398 = vector.extract_strided_slice %390 {offsets = [0, 128], sizes = [8, 64], strides = [1, 1]} : vector<8x192xf32> to vector<8x64xf32>
    %399 = math.tanh %397 : vector<8x64xf32>
    %400 = arith.mulf %398, %399 : vector<8x64xf32>
    %c3_135 = arith.constant 3 : index
    %c0_136 = arith.constant 0 : index
    %c0_137 = arith.constant 0 : index
    %401 = vector.load %arg2[%c3_135, %c0_136, %c0_137] : memref<4x8x64xf32, #tpu.memory_space<vmem>>, vector<1x8x64xf32>
    %402 = vector.shape_cast %401 : vector<1x8x64xf32> to vector<8x64xf32>
    %403 = arith.mulf %402, %400 : vector<8x64xf32>
    %cst_138 = arith.constant 1.000000e+00 : f32
    %404 = vector.broadcast %cst_138 : f32 to vector<8x64xf32>
    %405 = arith.subf %404, %402 : vector<8x64xf32>
    %406 = arith.mulf %405, %360 : vector<8x64xf32>
    %407 = arith.addf %403, %406 : vector<8x64xf32>
    %c3_139 = arith.constant 3 : index
    %c0_140 = arith.constant 0 : index
    %c0_141 = arith.constant 0 : index
    %408 = vector.load %arg3[%c3_139, %c0_140, %c0_141] : memref<4x8x64xf32, #tpu.memory_space<vmem>>, vector<1x8x64xf32>
    %409 = vector.shape_cast %408 : vector<1x8x64xf32> to vector<8x64xf32>
    %410 = arith.mulf %409, %407 : vector<8x64xf32>
    %411 = arith.addf %369, %410 : vector<8x64xf32>
    %c0_142 = arith.constant 0 : index
    %c0_143 = arith.constant 0 : index
    %412 = vector.load %arg18[%c0_142, %c0_143] : memref<64x32xf32, #tpu.memory_space<vmem>>, vector<64x32xf32>
    %cst_144 = arith.constant dense<0.000000e+00> : vector<8x32xf32>
    %413 = tpu.matmul %411, %412, %cst_144 {dimension_numbers = #tpu.dot_dimension_numbers<[1], [0], [0], [1], [0, 0, 1, 1], [], []>} : vector<8x64xf32>, vector<64x32xf32>, vector<8x32xf32> -> vector<8x32xf32>
    %c0_145 = arith.constant 0 : index
    %c0_146 = arith.constant 0 : index
    %414 = vector.load %arg19[%c0_145, %c0_146] : memref<1x32xf32, #tpu.memory_space<vmem>>, vector<1x32xf32>
    %415 = vector.broadcast %414 : vector<1x32xf32> to vector<8x32xf32>
    %416 = arith.addf %413, %415 : vector<8x32xf32>
    %cst_147 = arith.constant 0.000000e+00 : f32
    %417 = vector.broadcast %cst_147 : f32 to vector<8x32xf32>
    %418 = arith.maximumf %416, %417 : vector<8x32xf32>
    %c0_148 = arith.constant 0 : index
    %c0_149 = arith.constant 0 : index
    %419 = vector.load %arg20[%c0_148, %c0_149] : memref<32x128xf32, #tpu.memory_space<vmem>>, vector<32x128xf32>
    %cst_150 = arith.constant dense<0.000000e+00> : vector<8x128xf32>
    %420 = tpu.matmul %418, %419, %cst_150 {dimension_numbers = #tpu.dot_dimension_numbers<[1], [0], [0], [1], [0, 0, 1, 1], [], []>} : vector<8x32xf32>, vector<32x128xf32>, vector<8x128xf32> -> vector<8x128xf32>
    %c0_151 = arith.constant 0 : index
    %c0_152 = arith.constant 0 : index
    %421 = vector.load %arg21[%c0_151, %c0_152] : memref<1x128xf32, #tpu.memory_space<vmem>>, vector<1x128xf32>
    %422 = vector.broadcast %421 : vector<1x128xf32> to vector<8x128xf32>
    %423 = arith.addf %420, %422 : vector<8x128xf32>
    %c0_153 = arith.constant 0 : index
    %c0_154 = arith.constant 0 : index
    %424 = vector.load %arg22[%c0_153, %c0_154] : memref<8x128xf32, #tpu.memory_space<vmem>>, vector<8x128xf32>
    tpu.vector_store %arg22[%c0_153, %c0_154], %423 {strides = array<i32>} : memref<8x128xf32, #tpu.memory_space<vmem>>, vector<8x128xf32>,
    return
  }
}

</mosaic_0001>

<bundles_post_ra>
// kernel: forward.1
= control target key start
LH: loop header
LB: loop body
LE: loop exit
PB: predicated region body
PF: predicated region fallthrough
CT: control target
= control target key end

     0   :  { %vm415_vm0 = vcmask 130048   ;;  %s5466_s26 = smov 64   ;;  %vm1311_vm1 = vcmask 523264   ;;  %vm2244_vm2 = vcmask 1043456   ;;  %vm2231_vm3 = vcmask 162816   ;;  %s6915_s0 = inlined_call_operand.vmem [shape: f32[128,16], index: 0, kind: input, shape index: {}]   ;;  %s6916_s4 = inlined_call_operand.vmem [shape: f32[3,128,128], index: 4, kind: input, shape index: {}]   ;;  %s6917_s5 = inlined_call_operand.vmem [shape: f32[3,16,128], index: 5, kind: input, shape index: {}]   ;;  %s6918_s6 = inlined_call_operand.vmem [shape: f32[1,128], index: 6, kind: input, shape index: {}]   ;;  %s6919_s7 = inlined_call_operand.vmem [shape: f32[3,64,64], index: 7, kind: input, shape index: {}]   ;;  %s6920_s8 = inlined_call_operand.vmem [shape: f32[3,64,128], index: 8, kind: input, shape index: {}]   ;;  %s6921_s11 = inlined_call_operand.vmem [shape: f32[20,256], index: 11, kind: input, shape index: {}]   ;;  %s6922_s10 = inlined_call_operand.vmem [shape: f32[64,256], index: 10, kind: input, shape index: {}]   ;;  %s6923_s1 = inlined_call_operand.vmem [shape: f32[32,20], index: 1, kind: input, shape index: {}]   ;;  %s6924_s9 = inlined_call_operand.vmem [shape: f32[1,128], index: 9, kind: input, shape index: {}]   ;;  %s6925_s13 = inlined_call_operand.vmem [shape: f32[64,256], index: 13, kind: input, shape index: {}]   ;;  %s6926_s12 = inlined_call_operand.vmem [shape: f32[1,256], index: 12, kind: input, shape index: {}]   ;;  %s6927_s17 = inlined_call_operand.vmem [shape: f32[1,256], index: 17, kind: input, shape index: {}]   ;;  %s6928_s2 = inlined_call_operand.vmem [shape: f32[4,8,64], index: 2, kind: input, shape index: {}]   ;;  %s6929_s14 = inlined_call_operand.vmem [shape: f32[64,256], index: 14, kind: input, shape index: {}]   ;;  %s6930_s16 = inlined_call_operand.vmem [shape: f32[64,256], index: 16, kind: input, shape index: {}]   ;;  %s6931_s15 = inlined_call_operand.vmem [shape: f32[1,256], index: 15, kind: input, shape index: {}]   ;;  %s6932_s3 = inlined_call_operand.vmem [shape: f32[4,8,64], index: 3, kind: input, shape index: {}]   ;;  %s6933_s18 = inlined_call_operand.vmem [shape: f32[64,32], index: 18, kind: input, shape index: {}]   ;;  %s6934_s20 = inlined_call_operand.vmem [shape: f32[32,128], index: 20, kind: input, shape index: {}]   ;;  %s6935_s19 = inlined_call_operand.vmem [shape: f32[1,32], index: 19, kind: input, shape index: {}]   ;;  %s6936_s21 = inlined_call_operand.vmem [shape: f32[1,128], index: 21, kind: input, shape index: {}]   ;;  %s6937_s22 = inlined_call_operand.vmem [shape: f32[8,128], index: 22, kind: output, shape index: {}]  }
   0x1   :  { %6944 = sst [smem:[#allocation2_spill]] %s6915_s0  ;;  %vm3028_vm4 = vcmask 261120   ;;  %vm5470_vm5 = vmmov 0  }
   0x2   :  { %6945 = sst [smem:[#allocation3_spill]] %s6916_s4  ;;  %s6951_s29 = sld [smem:[#allocation2_spill]] }
   0x3   :  { %6946 = sst [smem:[#allocation4_spill]] %s6917_s5 }
   0x4   :  { %6947 = sst [smem:[#allocation5_spill]] %s6918_s6  ;;  %s6952_s6 = sld [smem:[#allocation3_spill]] }
   0x5   :  { %6948 = sst [smem:[#allocation6_spill]] %s6919_s7  ;;  %s6953_s5 = sld [smem:[#allocation4_spill]] }
   0x6   :  { %6949 = sst [smem:[#allocation7_spill]] %s6920_s8  ;;  %s6954_s25 = sld [smem:[#allocation5_spill]] }
   0x7   :  { %6950 = sst [smem:[#allocation8_spill]] %s6921_s11  ;;  %s6956_s0 = sld [smem:[#allocation7_spill]] }
   0x8   :  { %v71_v0 = vld [vmem:[%s6951_s29] sm:$0xff]  ;;  %v72_v1 = vld [vmem:[%s6951_s29 + $0x8] sm:$0xff]  ;;  %v73_v2 = vld [vmem:[%s6951_s29 + $0x10] sm:$0xff]  ;;  %s6957_s11 = sld [smem:[#allocation8_spill]]  ;;  %s5468_s8 = smov 96  }
   0x9   :  { %v5595_v3 = vpack.c.bf16 %v72_v1, %v71_v0  ;;  %v74_v4 = vld [vmem:[%s6951_s29 + $0x18] sm:$0xff]  ;;  %v75_v6 = vld [vmem:[%s6951_s29 + $0x20] sm:$0xff]  ;;  %v76_v7 = vld [vmem:[%s6951_s29 + $0x28] sm:$0xff] }
   0xa   :  { %v5600_v5 = vpack.c.bf16 %v74_v4, %v73_v2  ;;  %v5613_v8 = vpack.c.bf16 %v76_v7, %v75_v6  ;;  %v3949_v9 = vld [vmem:[%s6952_s6 + $0x80] sm:$0xff]  ;;  %v77_v10 = vld [vmem:[%s6951_s29 + $0x30] sm:$0xff]  ;;  %v78_v11 = vld [vmem:[%s6951_s29 + $0x38] sm:$0xff] }
   0xb   :  { %4908 = vmatprep.subr.bf16.mxu1 %v5595_v3  ;;  %4876 = vmatprep.subr.bf16.mxu0 %v5595_v3  ;;  %v5628_v12 = vpack.c.bf16 %v78_v11, %v77_v10  ;;  %v79_v13 = vld [vmem:[%s6951_s29 + $0x40] sm:$0xff]  ;;  %v80_v14 = vld [vmem:[%s6951_s29 + $0x48] sm:$0xff]  ;;  %v81_v17 = vld [vmem:[%s6951_s29 + $0x50] sm:$0xff] }
   0xc   :  { %4910 = vmatpush3.bf16.msra.mxu1 %v5595_v3  ;;  %4878 = vmatpush3.bf16.msra.mxu0 %v5595_v3  ;;  %v87_v15 = vld [vmem:[%s6952_s6] sm:$0xff]  ;;  %v5643_v16 = vpack.c.bf16 %v80_v14, %v79_v13  ;;  %v82_v18 = vld [vmem:[%s6951_s29 + $0x58] sm:$0xff]  ;;  %v84_v21 = vld [vmem:[%s6951_s29 + $0x68] sm:$0xff] }
   0xd   :  { %4912 = vmatprep.subr.bf16.mxu1 %v5600_v5  ;;  %4880 = vmatprep.subr.bf16.mxu0 %v5600_v5  ;;  %v5655_v19 = vpack.c.bf16 %v82_v18, %v81_v17  ;;  %v83_v20 = vld [vmem:[%s6951_s29 + $0x60] sm:$0xff]  ;;  %v85_v23 = vld [vmem:[%s6951_s29 + $0x70] sm:$0xff]  ;;  %v86_v24 = vld [vmem:[%s6951_s29 + $0x78] sm:$0xff]  ;;  %s6955_s29 = sld [smem:[#allocation6_spill]] }
   0xe   :  { %4513 = vmatprep.mubr.f32.mxu1 %v3949_v9  ;;  %4457 = vmatprep.mubr.f32.mxu0 %v87_v15  ;;  %v5667_v22 = vpack.c.bf16 %v84_v21, %v83_v20  ;;  %v5679_v25 = vpack.c.bf16 %v86_v24, %v85_v23  ;;  %v3965_v26 = vld [vmem:[%s6953_s5 + $0x10] sm:$0xff]  ;;  %v3966_v27 = vld [vmem:[%s6953_s5 + $0x18] sm:$0xff]  ;;  %v3950_v29 = vld [vmem:[%s6952_s6 + $0x88] sm:$0xff] }
   0xf   :  { %v4939_v28 = vpack.c.bf16 %v3966_v27, %v3965_v26  ;;  %v88_v30 = vld [vmem:[%s6952_s6 + $0x8] sm:$0xff]  ;;  %v3951_v31 = vld [vmem:[%s6952_s6 + $0x90] sm:$0xff]  ;;  %v3952_v33 = vld [vmem:[%s6952_s6 + $0x98] sm:$0xff] }
  0x10   :  { %4914 = vmatpush3.bf16.msra.mxu1 %v5600_v5  ;;  %4882 = vmatpush3.bf16.msra.mxu0 %v5600_v5  ;;  %v89_v32 = vld [vmem:[%s6952_s6 + $0x10] sm:$0xff]  ;;  %v90_v34 = vld [vmem:[%s6952_s6 + $0x18] sm:$0xff]  ;;  %v3953_v35 = vld [vmem:[%s6952_s6 + $0xa0] sm:$0xff] }
  0x11   :  { %4916 = vmatprep.subr.bf16.mxu1 %v5613_v8  ;;  %4884 = vmatprep.subr.bf16.mxu0 %v5613_v8  ;;  %v91_v36 = vld [vmem:[%s6952_s6 + $0x20] sm:$0xff]  ;;  %v3954_v37 = vld [vmem:[%s6952_s6 + $0xa8] sm:$0xff]  ;;  %v3955_v39 = vld [vmem:[%s6952_s6 + $0xb0] sm:$0xff] }
  0x12   :  { %v92_v38 = vld [vmem:[%s6952_s6 + $0x28] sm:$0xff]  ;;  %v93_v40 = vld [vmem:[%s6952_s6 + $0x30] sm:$0xff]  ;;  %v3956_v41 = vld [vmem:[%s6952_s6 + $0xb8] sm:$0xff] }
  0x13   :  { %v94_v42 = vld [vmem:[%s6952_s6 + $0x38] sm:$0xff]  ;;  %v3957_v43 = vld [vmem:[%s6952_s6 + $0xc0] sm:$0xff]  ;;  %v3958_v45 = vld [vmem:[%s6952_s6 + $0xc8] sm:$0xff] }
  0x14   :  { %4918 = vmatpush3.bf16.msra.mxu1 %v5613_v8  ;;  %4886 = vmatpush3.bf16.msra.mxu0 %v5613_v8  ;;  %v95_v44 = vld [vmem:[%s6952_s6 + $0x40] sm:$0xff]  ;;  %v96_v46 = vld [vmem:[%s6952_s6 + $0x48] sm:$0xff]  ;;  %v3959_v47 = vld [vmem:[%s6952_s6 + $0xd0] sm:$0xff] }
  0x15   :  { %4920 = vmatprep.subr.bf16.mxu1 %v5628_v12  ;;  %4888 = vmatprep.subr.bf16.mxu0 %v5628_v12  ;;  %v97_v48 = vld [vmem:[%s6952_s6 + $0x50] sm:$0xff]  ;;  %v3960_v49 = vld [vmem:[%s6952_s6 + $0xd8] sm:$0xff]  ;;  %v3961_v51 = vld [vmem:[%s6952_s6 + $0xe0] sm:$0xff] }
  0x16   :  { %v98_v50 = vld [vmem:[%s6952_s6 + $0x58] sm:$0xff]  ;;  %v99_v52 = vld [vmem:[%s6952_s6 + $0x60] sm:$0xff]  ;;  %v3962_v53 = vld [vmem:[%s6952_s6 + $0xe8] sm:$0xff] }
  0x17   :  { %v100_v54 = vld [vmem:[%s6952_s6 + $0x68] sm:$0xff]  ;;  %v3963_v55 = vld [vmem:[%s6952_s6 + $0xf0] sm:$0xff]  ;;  %v3964_v57 = vld [vmem:[%s6952_s6 + $0xf8] sm:$0xff] }
  0x18   :  { %4922 = vmatpush3.bf16.msra.mxu1 %v5628_v12  ;;  %4890 = vmatpush3.bf16.msra.mxu0 %v5628_v12  ;;  %v101_v56 = vld [vmem:[%s6952_s6 + $0x70] sm:$0xff]  ;;  %v102_v58 = vld [vmem:[%s6952_s6 + $0x78] sm:$0xff]  ;;  %v3999_v59 = vld [vmem:[%s6952_s6 + $0x100] sm:$0xff] }
  0x19   :  { %4924 = vmatprep.subr.bf16.mxu1 %v5643_v16  ;;  %4892 = vmatprep.subr.bf16.mxu0 %v5643_v16  ;;  %v4000_v60 = vld [vmem:[%s6952_s6 + $0x108] sm:$0xff]  ;;  %v4001_v61 = vld [vmem:[%s6952_s6 + $0x110] sm:$0xff]  ;;  %v4002_v62 = vld [vmem:[%s6952_s6 + $0x118] sm:$0xff] }
  0x1a   :  { %v4003_v63 = vld [vmem:[%s6952_s6 + $0x120] sm:$0xff]  ;;  %v4004_v0 = vld [vmem:[%s6952_s6 + $0x128] sm:$0xff]  ;;  %v4005_v1 = vld [vmem:[%s6952_s6 + $0x130] sm:$0xff] }
  0x1b   :  { %v4006_v2 = vld [vmem:[%s6952_s6 + $0x138] sm:$0xff]  ;;  %v4008_v4 = vld [vmem:[%s6952_s6 + $0x148] sm:$0xff]  ;;  %v4011_v7 = vld [vmem:[%s6952_s6 + $0x160] sm:$0xff] }
  0x1c   :  { %4926 = vmatpush3.bf16.msra.mxu1 %v5643_v16  ;;  %4894 = vmatpush3.bf16.msra.mxu0 %v5643_v16  ;;  %v4010_v6 = vld [vmem:[%s6952_s6 + $0x158] sm:$0xff]  ;;  %v4013_v9 = vld [vmem:[%s6952_s6 + $0x170] sm:$0xff]  ;;  %v248_v11 = vld [vmem:[%s6953_s5] sm:$0xff] }
  0x1d   :  { %4928 = vmatprep.subr.bf16.mxu1 %v5655_v19  ;;  %4896 = vmatprep.subr.bf16.mxu0 %v5655_v19  ;;  %v4014_v10 = vld [vmem:[%s6952_s6 + $0x178] sm:$0xff]  ;;  %v4015_v14 = vld [vmem:[%s6953_s5 + $0x20] sm:$0xff]  ;;  %v4016_v15 = vld [vmem:[%s6953_s5 + $0x28] sm:$0xff] }
  0x1e   :  { %v4979_v20 = vpack.c.bf16 %v4016_v15, %v4015_v14 }
  0x20   :  { %4930 = vmatpush3.bf16.msra.mxu1 %v5655_v19  ;;  %4898 = vmatpush3.bf16.msra.mxu0 %v5655_v19 }
  0x21   :  { %4932 = vmatprep.subr.bf16.mxu1 %v5667_v22  ;;  %4900 = vmatprep.subr.bf16.mxu0 %v5667_v22 }
  0x24   :  { %4934 = vmatpush3.bf16.msra.mxu1 %v5667_v22  ;;  %4902 = vmatpush3.bf16.msra.mxu0 %v5667_v22 }
  0x25   :  { %4936 = vmatprep.subr.bf16.mxu1 %v5679_v25  ;;  %4904 = vmatprep.subr.bf16.mxu0 %v5679_v25 }
  0x28   :  { %4938 = vmatpush3.bf16.msra.mxu1 %v5679_v25  ;;  %4906 = vmatpush3.bf16.msra.mxu0 %v5679_v25 }
  0x29   :  { %4948 = vmatprep.subr.bf16.mxu1 %v5595_v3  ;;  %4940 = vmatprep.subr.bf16.mxu0 %v4939_v28 }
  0x2b   :  { %4514 = vmatmul.mubr.f32.vlgmr.msra.gmra.mrb[0].mxu1 %v3950_v29  ;;  %4458 = vmatmul.mubr.f32.vlgmr.msra.gmra.mrb[0].mxu0 %v88_v30 }
  0x2c   :  { %4516 = vmatprep.mubr.f32.mxu1 %v3951_v31  ;;  %4950 = vmatpush3.bf16.msra.mxu1 %v5595_v3  ;;  %v4007_v3 = vld [vmem:[%s6952_s6 + $0x140] sm:$0xff] }
  0x2d   :  { %4460 = vmatprep.mubr.f32.mxu0 %v89_v32  ;;  %4952 = vmatprep.subr.bf16.mxu1 %v5600_v5 }
  0x2e   :  { %4942 = vmatpush3.bf16.msra.mxu0 %v4939_v28 }
  0x2f   :  { %4517 = vmatmul.mubr.f32.gmra.mrb[2].mxu1 %v3952_v33  ;;  %4461 = vmatmul.mubr.f32.gmra.mrb[2].mxu0 %v90_v34 }
  0x30   :  { %4519 = vmatprep.mubr.f32.mxu1 %v3953_v35  ;;  %4954 = vmatpush3.bf16.msra.mxu1 %v5600_v5  ;;  %v4009_v5 = vld [vmem:[%s6952_s6 + $0x150] sm:$0xff] }
  0x31   :  { %4463 = vmatprep.mubr.f32.mxu0 %v91_v36  ;;  %4956 = vmatprep.subr.bf16.mxu1 %v5613_v8 }
  0x33   :  { %4520 = vmatmul.mubr.f32.gmra.mrb[4].mxu1 %v3954_v37  ;;  %4464 = vmatmul.mubr.f32.gmra.mrb[4].mxu0 %v92_v38 }
  0x34   :  { %4522 = vmatprep.mubr.f32.mxu1 %v3955_v39  ;;  %4958 = vmatpush3.bf16.msra.mxu1 %v5613_v8  ;;  %v4012_v8 = vld [vmem:[%s6952_s6 + $0x168] sm:$0xff] }
  0x35   :  { %4466 = vmatprep.mubr.f32.mxu0 %v93_v40  ;;  %4960 = vmatprep.subr.bf16.mxu1 %v5628_v12 }
  0x37   :  { %4523 = vmatmul.mubr.f32.gmra.mrb[6].mxu1 %v3956_v41  ;;  %4467 = vmatmul.mubr.f32.gmra.mrb[6].mxu0 %v94_v42 }
  0x38   :  { %4525 = vmatprep.mubr.f32.mxu1 %v3957_v43  ;;  %4962 = vmatpush3.bf16.msra.mxu1 %v5628_v12  ;;  %v249_v12 = vld [vmem:[%s6953_s5 + $0x8] sm:$0xff] }
  0x39   :  { %4469 = vmatprep.mubr.f32.mxu0 %v95_v44  ;;  %4964 = vmatprep.subr.bf16.mxu1 %v5643_v16  ;;  %v4943_v13 = vpack.c.bf16 %v249_v12, %v248_v11 }
  0x3b   :  { %4526 = vmatmul.mubr.f32.gmra.mrb[8].mxu1 %v3958_v45  ;;  %4470 = vmatmul.mubr.f32.gmra.mrb[8].mxu0 %v96_v46 }
  0x3c   :  { %4528 = vmatprep.mubr.f32.mxu1 %v3959_v47  ;;  %4966 = vmatpush3.bf16.msra.mxu1 %v5643_v16 }
  0x3d   :  { %4472 = vmatprep.mubr.f32.mxu0 %v97_v48  ;;  %4968 = vmatprep.subr.bf16.mxu1 %v5655_v19 }
  0x3e   :  { %4944 = vmatprep.subr.bf16.mxu0 %v4943_v13 }
  0x3f   :  { %4529 = vmatmul.mubr.f32.gmra.mrb[10].mxu1 %v3960_v49  ;;  %4473 = vmatmul.mubr.f32.gmra.mrb[10].mxu0 %v98_v50 }
  0x40   :  { %4531 = vmatprep.mubr.f32.mxu1 %v3961_v51  ;;  %4970 = vmatpush3.bf16.msra.mxu1 %v5655_v19 }
  0x41   :  { %4475 = vmatprep.mubr.f32.mxu0 %v99_v52  ;;  %4972 = vmatprep.subr.bf16.mxu1 %v5667_v22 }
  0x43   :  { %4532 = vmatmul.mubr.f32.gmra.mrb[12].mxu1 %v3962_v53  ;;  %4476 = vmatmul.mubr.f32.gmra.mrb[12].mxu0 %v100_v54 }
  0x44   :  { %4534 = vmatprep.mubr.f32.mxu1 %v3963_v55  ;;  %4974 = vmatpush3.bf16.msra.mxu1 %v5667_v22 }
  0x45   :  { %4478 = vmatprep.mubr.f32.mxu0 %v101_v56  ;;  %4976 = vmatprep.subr.bf16.mxu1 %v5679_v25 }
  0x47   :  { %4535 = vmatmul.mubr.f32.gmra.mrb[14].mxu1 %v3964_v57  ;;  %4479 = vmatmul.mubr.f32.gmra.mrb[14].mxu0 %v102_v58 }
  0x48   :  { %4978 = vmatpush3.bf16.msra.mxu1 %v5679_v25  ;;  %4625 = vmatprep.mubr.f32.mxu1 %v3999_v59 }
  0x4b   :  { %4626 = vmatmul.mubr.f32.vlgmr.msra.gmra.mrb[16].mxu1 %v4000_v60 }
  0x4c   :  { %4628 = vmatprep.mubr.f32.mxu1 %v4001_v61 }
  0x4f   :  { %4629 = vmatmul.mubr.f32.gmra.mrb[18].mxu1 %v4002_v62 }
  0x50   :  { %4631 = vmatprep.mubr.f32.mxu1 %v4003_v63 }
  0x53   :  { %4632 = vmatmul.mubr.f32.gmra.mrb[20].mxu1 %v4004_v0 }
  0x54   :  { %4634 = vmatprep.mubr.f32.mxu1 %v4005_v1  ;;  %v4033_v1 = vld [vmem:[%s6954_s25] ss:$0 sm:$0xff] }
  0x57   :  { %4635 = vmatmul.mubr.f32.gmra.mrb[22].mxu1 %v4006_v2 }
  0x58   :  { %4637 = vmatprep.mubr.f32.mxu1 %v4007_v3 }
  0x5b   :  { %4638 = vmatmul.mubr.f32.gmra.mrb[24].mxu1 %v4008_v4 }
  0x5c   :  { %4640 = vmatprep.mubr.f32.mxu1 %v4009_v5 }
  0x5f   :  { %4641 = vmatmul.mubr.f32.gmra.mrb[26].mxu1 %v4010_v6 }
  0x60   :  { %4643 = vmatprep.mubr.f32.mxu1 %v4011_v7 }
  0x63   :  { %4644 = vmatmul.mubr.f32.gmra.mrb[28].mxu1 %v4012_v8 }
  0x64   :  { %4646 = vmatprep.mubr.f32.mxu1 %v4013_v9 }
  0x67   :  { %4647 = vmatmul.mubr.f32.gmra.mrb[30].mxu1 %v4014_v10 }
  0xfe   :  { %v4515_v16 = vpop.f32.mrb[0].mxu1  ;;  %v4459_v17 = vpop.f32.mrb[0].mxu0 }
  0xff   :  { %v333_v18 = vpop.f32.mrb[1].mxu1  ;;  %v169_v19 = vpop.f32.mrb[1].mxu0 }
 0x100   :  { %4541 = vmatprep.mubr.msk.f32.mxu0 %vm415_vm0, %v333_v18 }
 0x101   :  { %4542 = vmatmul.mubr.msk.f32.vlgmr.msra.gmra.mrb[16].mxu0 %vm415_vm0, %v4515_v16 }
 0x102   :  { %v4518_v21 = vpop.f32.mrb[2].mxu1  ;;  %4946 = vmatpush3.bf16.msra.mxu0 %v4943_v13  ;;  %v4462_v22 = vpop.f32.mrb[2].mxu0 }
 0x103   :  { %v343_v23 = vpop.f32.mrb[3].mxu1  ;;  %v179_v24 = vpop.f32.mrb[3].mxu0  ;;  %4980 = vmatprep.subr.bf16.mxu0 %v4979_v20 }
 0x104   :  { %4544 = vmatprep.mubr.msk.f32.mxu0 %vm415_vm0, %v343_v23 }
 0x105   :  { %4545 = vmatmul.mubr.msk.f32.gmra.mrb[18].mxu0 %vm415_vm0, %v4518_v21 }
 0x106   :  { %v4521_v25 = vpop.f32.mrb[4].mxu1  ;;  %v4465_v26 = vpop.f32.mrb[4].mxu0 }
 0x107   :  { %v353_v27 = vpop.f32.mrb[5].mxu1  ;;  %v189_v28 = vpop.f32.mrb[5].mxu0 }
 0x108   :  { %4547 = vmatprep.mubr.msk.f32.mxu0 %vm415_vm0, %v353_v27 }
 0x109   :  { %4548 = vmatmul.mubr.msk.f32.gmra.mrb[20].mxu0 %vm415_vm0, %v4521_v25 }
 0x10a   :  { %v4524_v29 = vpop.f32.mrb[6].mxu1  ;;  %v4468_v30 = vpop.f32.mrb[6].mxu0 }
 0x10b   :  { %v363_v31 = vpop.f32.mrb[7].mxu1  ;;  %v199_v32 = vpop.f32.mrb[7].mxu0 }
 0x10c   :  { %4550 = vmatprep.mubr.msk.f32.mxu0 %vm415_vm0, %v363_v31 }
 0x10d   :  { %4551 = vmatmul.mubr.msk.f32.gmra.mrb[22].mxu0 %vm415_vm0, %v4524_v29 }
 0x10e   :  { %v4527_v33 = vpop.f32.mrb[8].mxu1  ;;  %v4471_v34 = vpop.f32.mrb[8].mxu0 }
 0x10f   :  { %v373_v35 = vpop.f32.mrb[9].mxu1  ;;  %v209_v36 = vpop.f32.mrb[9].mxu0 }
 0x110   :  { %4553 = vmatprep.mubr.msk.f32.mxu0 %vm415_vm0, %v373_v35 }
 0x111   :  { %4554 = vmatmul.mubr.msk.f32.gmra.mrb[24].mxu0 %vm415_vm0, %v4527_v33 }
 0x112   :  { %v4530_v37 = vpop.f32.mrb[10].mxu1  ;;  %v4474_v38 = vpop.f32.mrb[10].mxu0 }
 0x113   :  { %v383_v39 = vpop.f32.mrb[11].mxu1  ;;  %v219_v40 = vpop.f32.mrb[11].mxu0 }
 0x114   :  { %4556 = vmatprep.mubr.msk.f32.mxu0 %vm415_vm0, %v383_v39 }
 0x115   :  { %4557 = vmatmul.mubr.msk.f32.gmra.mrb[26].mxu0 %vm415_vm0, %v4530_v37 }
 0x116   :  { %v4533_v41 = vpop.f32.mrb[12].mxu1  ;;  %v4477_v42 = vpop.f32.mrb[12].mxu0 }
 0x117   :  { %v393_v43 = vpop.f32.mrb[13].mxu1  ;;  %v229_v44 = vpop.f32.mrb[13].mxu0 }
 0x118   :  { %4559 = vmatprep.mubr.msk.f32.mxu0 %vm415_vm0, %v393_v43 }
 0x119   :  { %4560 = vmatmul.mubr.msk.f32.gmra.mrb[28].mxu0 %vm415_vm0, %v4533_v41 }
 0x11a   :  { %v4536_v45 = vpop.f32.mrb[14].mxu1  ;;  %v4480_v46 = vpop.f32.mrb[14].mxu0 }
 0x11b   :  { %v403_v47 = vpop.f32.mrb[15].mxu1  ;;  %v239_v48 = vpop.f32.mrb[15].mxu0 }
 0x11c   :  { %4562 = vmatprep.mubr.msk.f32.mxu0 %vm415_vm0, %v403_v47 }
 0x11d   :  { %4563 = vmatmul.mubr.msk.f32.gmra.mrb[30].mxu0 %vm415_vm0, %v4536_v45 }
 0x11e   :  { %4569 = vmatprep.mubr.msk.f32.mxu0 %vm415_vm0, %v169_v19  ;;  %v4627_v49 = vpop.f32.mrb[16].mxu1 }
 0x11f   :  { %v885_v50 = vpop.f32.mrb[17].mxu1 }
 0x121   :  { %4570 = vmatmul.mubr.msk.f32.vlgmr.msra.gmra.mrb[16].mxu0 %vm415_vm0, %v4459_v17 }
 0x122   :  { %4572 = vmatprep.mubr.msk.f32.mxu0 %vm415_vm0, %v179_v24  ;;  %4982 = vmatpush3.bf16.msra.mxu0 %v4979_v20  ;;  %v4630_v51 = vpop.f32.mrb[18].mxu1 }
 0x123   :  { %v895_v52 = vpop.f32.mrb[19].mxu1 }
 0x125   :  { %4573 = vmatmul.mubr.msk.f32.gmra.mrb[18].mxu0 %vm415_vm0, %v4462_v22 }
 0x126   :  { %4575 = vmatprep.mubr.msk.f32.mxu0 %vm415_vm0, %v189_v28  ;;  %v4633_v53 = vpop.f32.mrb[20].mxu1 }
 0x127   :  { %v905_v54 = vpop.f32.mrb[21].mxu1 }
 0x129   :  { %4576 = vmatmul.mubr.msk.f32.gmra.mrb[20].mxu0 %vm415_vm0, %v4465_v26 }
 0x12a   :  { %4578 = vmatprep.mubr.msk.f32.mxu0 %vm415_vm0, %v199_v32  ;;  %v4636_v55 = vpop.f32.mrb[22].mxu1 }
 0x12b   :  { %v915_v56 = vpop.f32.mrb[23].mxu1 }
 0x12d   :  { %4579 = vmatmul.mubr.msk.f32.gmra.mrb[22].mxu0 %vm415_vm0, %v4468_v30 }
 0x12e   :  { %4581 = vmatprep.mubr.msk.f32.mxu0 %vm415_vm0, %v209_v36  ;;  %v4639_v57 = vpop.f32.mrb[24].mxu1 }
 0x12f   :  { %v925_v58 = vpop.f32.mrb[25].mxu1 }
 0x131   :  { %4582 = vmatmul.mubr.msk.f32.gmra.mrb[24].mxu0 %vm415_vm0, %v4471_v34 }
 0x132   :  { %4584 = vmatprep.mubr.msk.f32.mxu0 %vm415_vm0, %v219_v40  ;;  %v4642_v59 = vpop.f32.mrb[26].mxu1 }
 0x133   :  { %v935_v60 = vpop.f32.mrb[27].mxu1 }
 0x135   :  { %4585 = vmatmul.mubr.msk.f32.gmra.mrb[26].mxu0 %vm415_vm0, %v4474_v38 }
 0x136   :  { %4587 = vmatprep.mubr.msk.f32.mxu0 %vm415_vm0, %v229_v44  ;;  %v4645_v61 = vpop.f32.mrb[28].mxu1 }
 0x137   :  { %v945_v62 = vpop.f32.mrb[29].mxu1 }
 0x139   :  { %4588 = vmatmul.mubr.msk.f32.gmra.mrb[28].mxu0 %vm415_vm0, %v4477_v42 }
 0x13a   :  { %4590 = vmatprep.mubr.msk.f32.mxu0 %vm415_vm0, %v239_v48  ;;  %v4648_v63 = vpop.f32.mrb[30].mxu1 }
 0x13b   :  { %v955_v0 = vpop.f32.mrb[31].mxu1 }
 0x13d   :  { %4591 = vmatmul.mubr.msk.f32.gmra.mrb[30].mxu0 %vm415_vm0, %v4480_v46 }
 0x13e   :  { %4653 = vmatprep.mubr.msk.f32.mxu0 %vm415_vm0, %v885_v50 }
 0x141   :  { %4654 = vmatmul.mubr.msk.f32.vlgmr.msra.gmra.mrb[16].mxu0 %vm415_vm0, %v4627_v49 }
 0x142   :  { %4656 = vmatprep.mubr.msk.f32.mxu0 %vm415_vm0, %v895_v52 }
 0x145   :  { %4657 = vmatmul.mubr.msk.f32.gmra.mrb[18].mxu0 %vm415_vm0, %v4630_v51 }
 0x146   :  { %4659 = vmatprep.mubr.msk.f32.mxu0 %vm415_vm0, %v905_v54 }
 0x149   :  { %4660 = vmatmul.mubr.msk.f32.gmra.mrb[20].mxu0 %vm415_vm0, %v4633_v53 }
 0x14a   :  { %4662 = vmatprep.mubr.msk.f32.mxu0 %vm415_vm0, %v915_v56 }
 0x14d   :  { %4663 = vmatmul.mubr.msk.f32.gmra.mrb[22].mxu0 %vm415_vm0, %v4636_v55 }
 0x14e   :  { %4665 = vmatprep.mubr.msk.f32.mxu0 %vm415_vm0, %v925_v58  ;;  %v1303_v58 = vld [vmem:[%s6955_s29] sm:$0xff] }
 0x14f   :  { %4693 = vmatprep.mubr.msk.f32.mxu1 %vm1311_vm1, %v1303_v58  ;;  %v1309_v58 = vld [vmem:[%s6955_s29 + $0x30] sm:$0xff] }
 0x151   :  { %4666 = vmatmul.mubr.msk.f32.gmra.mrb[24].mxu0 %vm415_vm0, %v4639_v57 }
 0x152   :  { %4668 = vmatprep.mubr.msk.f32.mxu0 %vm415_vm0, %v935_v60 }
 0x155   :  { %4669 = vmatmul.mubr.msk.f32.gmra.mrb[26].mxu0 %vm415_vm0, %v4642_v59  ;;  %v4082_v59 = vld [vmem:[%s6955_s29 + $0x80] sm:$0xff] }
 0x156   :  { %4671 = vmatprep.mubr.msk.f32.mxu0 %vm415_vm0, %v945_v62 }
 0x159   :  { %4672 = vmatmul.mubr.msk.f32.gmra.mrb[28].mxu0 %vm415_vm0, %v4645_v61 }
 0x15a   :  { %4674 = vmatprep.mubr.msk.f32.mxu0 %vm415_vm0, %v955_v0 }
 0x15d   :  { %4675 = vmatmul.mubr.msk.f32.gmra.mrb[30].mxu0 %vm415_vm0, %v4648_v63 }
 0x15e   :  { %4805 = vmatprep.mubr.msk.f32.mxu0 %vm1311_vm1, %v4082_v59  ;;  %v4088_v59 = vld [vmem:[%s6955_s29 + $0xb0] sm:$0xff] }
 0x214   :  { %v4655_v2 = vpop.f32.mrb[16].mxu0 }
 0x215   :  { %v5911_v3 = vadd.f32 %v4655_v2, %v4033_v1  ;;  %v1081_v4 = vpop.f32.mrb[17].mxu0 }
 0x216   :  { %v5913_v5 = vadd.f32 %v4033_v1, %v1081_v4 }
 0x217   :  { %v1200_v6 = vmax.f32 %v5911_v3, 0.0 }
 0x218   :  { %v1199_v7 = vmax.f32 %v5913_v5, 0.0  ;;  %v4658_v8 = vpop.f32.mrb[18].mxu0 }
 0x219   :  { %v5917_v9 = vadd.f32 %v4658_v8, %v4033_v1  ;;  %v1091_v10 = vpop.f32.mrb[19].mxu0 }
 0x21a   :  { %v5919_v11 = vadd.f32 %v4033_v1, %v1091_v10  ;;  %v5330_v12 = vpack.i.bf16 %v1200_v6, %v1199_v7 }
 0x21b   :  { %v1202_v13 = vmax.f32 %v5917_v9, 0.0 }
 0x21c   :  { %v1201_v14 = vmax.f32 %v5919_v11, 0.0  ;;  %5331 = vrot.lane.b32.xlu0 %v5330_v12, %s5466_s26  ;;  %v4661_v15 = vpop.f32.mrb[20].mxu0 }
 0x21d   :  { %v1101_v16 = vpop.f32.mrb[21].mxu0  ;;  %v5933_v21 = vadd.f32 %v4661_v15, %v4033_v1 }
 0x21e   :  { %v5340_v17 = vpack.i.bf16 %v1202_v13, %v1201_v14  ;;  %v5935_v22 = vadd.f32 %v4033_v1, %v1101_v16 }
 0x21f   :  { %v1204_v29 = vmax.f32 %v5933_v21, 0.0 }
 0x220   :  { %5341 = vrot.lane.b32.xlu1 %v5340_v17, %s5466_s26  ;;  %v4664_v18 = vpop.f32.mrb[22].mxu0  ;;  %v1203_v30 = vmax.f32 %v5935_v22, 0.0 }
 0x221   :  { %v1111_v19 = vpop.f32.mrb[23].mxu0  ;;  %v5941_v33 = vadd.f32 %v4664_v18, %v4033_v1 }
 0x222   :  { %v5943_v34 = vadd.f32 %v4033_v1, %v1111_v19  ;;  %v5345_v40 = vpack.i.bf16 %v1204_v29, %v1203_v30 }
 0x223   :  { %v1206_v43 = vmax.f32 %v5941_v33, 0.0 }
 0x224   :  { %v4667_v20 = vpop.f32.mrb[24].mxu0  ;;  %v1205_v44 = vmax.f32 %v5943_v34, 0.0  ;;  %v1304_v34 = vld [vmem:[%s6955_s29 + $0x8] sm:$0xff] }
 0x225   :  { %v1192_v23 = vadd.f32 %v4667_v20, %v4033_v1  ;;  %v1121_v24 = vpop.f32.mrb[25].mxu0 }
 0x226   :  { %v1191_v25 = vadd.f32 %v4033_v1, %v1121_v24  ;;  %v5350_v52 = vpack.i.bf16 %v1206_v43, %v1205_v44 }
 0x227   :  { %v1208_v26 = vmax.f32 %v1192_v23, 0.0 }
 0x228   :  { %v1207_v27 = vmax.f32 %v1191_v25, 0.0  ;;  %v4670_v28 = vpop.f32.mrb[26].mxu0 }
 0x229   :  { %v5939_v31 = vadd.f32 %v4670_v28, %v4033_v1  ;;  %v1131_v32 = vpop.f32.mrb[27].mxu0 }
 0x22a   :  { %v5335_v35 = vpack.i.bf16 %v1208_v26, %v1207_v27  ;;  %v1193_v36 = vadd.f32 %v4033_v1, %v1131_v32 }
 0x22b   :  { %v1210_v37 = vmax.f32 %v5939_v31, 0.0 }
 0x22c   :  { %v1209_v38 = vmax.f32 %v1193_v36, 0.0  ;;  %5336 = vrot.lane.b32.xlu0 %v5335_v35, %s5466_s26  ;;  %v4673_v39 = vpop.f32.mrb[28].mxu0 }
 0x22d   :  { %v5951_v41 = vadd.f32 %v4673_v39, %v4033_v1  ;;  %v1141_v42 = vpop.f32.mrb[29].mxu0 }
 0x22e   :  { %v5355_v45 = vpack.i.bf16 %v1210_v37, %v1209_v38  ;;  %v5955_v46 = vadd.f32 %v4033_v1, %v1141_v42 }
 0x22f   :  { %v1212_v47 = vmax.f32 %v5951_v41, 0.0 }
 0x230   :  { %v1211_v48 = vmax.f32 %v5955_v46, 0.0  ;;  %5346 = vrot.lane.b32.xlu0 %v5345_v40, %s5466_s26  ;;  %5356 = vrot.lane.b32.xlu1 %v5355_v45, %s5466_s26  ;;  %v4676_v49 = vpop.f32.mrb[30].mxu0 }
 0x231   :  { %v5961_v50 = vadd.f32 %v4676_v49, %v4033_v1  ;;  %v1151_v51 = vpop.f32.mrb[31].mxu0 }
 0x232   :  { %v5360_v53 = vpack.i.bf16 %v1212_v47, %v1211_v48  ;;  %v5967_v54 = vadd.f32 %v4033_v1, %v1151_v51 }
 0x233   :  { %v1214_v55 = vmax.f32 %v5961_v50, 0.0  ;;  %v1306_v50 = vld [vmem:[%s6955_s29 + $0x18] sm:$0xff] }
 0x234   :  { %v1213_v56 = vmax.f32 %v5967_v54, 0.0  ;;  %5351 = vrot.lane.b32.xlu0 %v5350_v52, %s5466_s26  ;;  %5361 = vrot.lane.b32.xlu1 %v5360_v53, %s5466_s26  ;;  %v4085_v53 = vld [vmem:[%s6955_s29 + $0x98] sm:$0xff]  ;;  %v1307_v54 = vld [vmem:[%s6955_s29 + $0x20] sm:$0xff] }
 0x236   :  { %v5365_v57 = vpack.i.bf16 %v1214_v55, %v1213_v56 }
 0x238   :  { %5366 = vrot.lane.b32.xlu1 %v5365_v57, %s5466_s26  ;;  %v4087_v57 = vld [vmem:[%s6955_s29 + $0xa8] sm:$0xff] }
 0x28e   :  { %v5332_v60 = vpop.permute.xlu0 %5331 }
 0x28f   :  { %v5334_v61 = vunpack.i.h.bf16 %v5332_v60  ;;  %v5333_v62 = vunpack.i.l.bf16 %v5332_v60  ;;  %v4058_v60 = vld [vmem:[%s6956_s0 + $0x40] sm:$0xff] }
 0x291   :  { %v1280_v4 = vmax.f32 %v1200_v6, %v5334_v61  ;;  %v1279_v8 = vmax.f32 %v1199_v7, %v5333_v62  ;;  %v4059_v61 = vld [vmem:[%s6956_s0 + $0x48] sm:$0xff]  ;;  %v1310_v62 = vld [vmem:[%s6955_s29 + $0x38] sm:$0xff] }
 0x292   :  { %v5342_v63 = vpop.permute.xlu1 %5341 }
 0x293   :  { %v5344_v15 = vunpack.i.h.bf16 %v5342_v63  ;;  %v5343_v16 = vunpack.i.l.bf16 %v5342_v63  ;;  %v4089_v63 = vld [vmem:[%s6955_s29 + $0xb8] sm:$0xff] }
 0x295   :  { %v1282_v3 = vmax.f32 %v1202_v13, %v5344_v15  ;;  %v1281_v5 = vmax.f32 %v1201_v14, %v5343_v16  ;;  %v4045_v15 = vld [vmem:[%s6955_s29 + $0x58] sm:$0xff]  ;;  %v4046_v16 = vld [vmem:[%s6955_s29 + $0x60] sm:$0xff] }
 0x29e   :  { %v5337_v0 = vpop.permute.xlu0 %5336 }
 0x29f   :  { %v5339_v1 = vunpack.i.h.bf16 %v5337_v0  ;;  %v5338_v2 = vunpack.i.l.bf16 %v5337_v0  ;;  %v4042_v0 = vld [vmem:[%s6955_s29 + $0x40] sm:$0xff] }
 0x2a1   :  { %v1288_v10 = vmax.f32 %v1208_v26, %v5339_v1  ;;  %v1287_v12 = vmax.f32 %v1207_v27, %v5338_v2  ;;  %v5015_v1 = vpack.c.bf16 %v4059_v61, %v4058_v60  ;;  %v4060_v2 = vld [vmem:[%s6956_s0 + $0x50] sm:$0xff]  ;;  %v4102_v60 = vld [vmem:[%s6956_s0 + $0xa0] sm:$0xff]  ;;  %v4103_v61 = vld [vmem:[%s6956_s0 + $0xa8] sm:$0xff] }
 0x2a2   :  { %v5347_v17 = vpop.permute.xlu0 %5346  ;;  %v5357_v18 = vpop.permute.xlu1 %5356 }
 0x2a3   :  { %v1296_v19 = vmax.f32 %v1280_v4, %v1288_v10  ;;  %v1295_v20 = vmax.f32 %v1279_v8, %v1287_v12  ;;  %v5359_v23 = vunpack.i.h.bf16 %v5357_v18  ;;  %v5358_v24 = vunpack.i.l.bf16 %v5357_v18  ;;  %v4061_v4 = vld [vmem:[%s6956_s0 + $0x58] sm:$0xff]  ;;  %v4043_v8 = vld [vmem:[%s6955_s29 + $0x48] sm:$0xff]  ;;  %v4044_v10 = vld [vmem:[%s6955_s29 + $0x50] sm:$0xff] }
 0x2a4   :  { %v5349_v28 = vunpack.i.h.bf16 %v5347_v17  ;;  %v5348_v31 = vunpack.i.l.bf16 %v5347_v17  ;;  %v5019_v12 = vpack.c.bf16 %v4061_v4, %v4060_v2  ;;  %v4047_v17 = vld [vmem:[%s6955_s29 + $0x68] sm:$0xff]  ;;  %v4048_v18 = vld [vmem:[%s6955_s29 + $0x70] sm:$0xff]  ;;  %v2228_v4 = vld [vmem:[%s6957_s11 + $0x18] sm:$0xff] }
 0x2a5   :  { %v4983_v25 = vpack.c.bf16 %v1296_v19, %v1295_v20  ;;  %v1290_v6 = vmax.f32 %v1210_v37, %v5359_v23  ;;  %v1289_v7 = vmax.f32 %v1209_v38, %v5358_v24  ;;  %v4049_v19 = vld [vmem:[%s6955_s29 + $0x78] sm:$0xff]  ;;  %v4062_v20 = vld [vmem:[%s6956_s0 + $0x60] sm:$0xff]  ;;  %v4063_v23 = vld [vmem:[%s6956_s0 + $0x68] sm:$0xff] }
 0x2a6   :  { %v5352_v26 = vpop.permute.xlu0 %5351  ;;  %v5362_v27 = vpop.permute.xlu1 %5361  ;;  %v1284_v9 = vmax.f32 %v1204_v29, %v5349_v28  ;;  %v1283_v11 = vmax.f32 %v1203_v30, %v5348_v31  ;;  %v5023_v24 = vpack.c.bf16 %v4063_v23, %v4062_v20  ;;  %v4065_v28 = vld [vmem:[%s6956_s0 + $0x78] sm:$0xff]  ;;  %v2226_v2 = vld [vmem:[%s6957_s11 + $0x8] sm:$0xff]  ;;  %v2205_v20 = vld [vmem:[%s6922_s10] sm:$0xff] }
 0x2a7   :  { %v5364_v32 = vunpack.i.h.bf16 %v5362_v27  ;;  %v5363_v35 = vunpack.i.l.bf16 %v5362_v27  ;;  %4984 = vmatprep.subr.bf16.mxu1 %v4983_v25  ;;  %5048 = vmatprep.subr.bf16.mxu0 %v4983_v25  ;;  %v1298_v36 = vmax.f32 %v1282_v3, %v1290_v6  ;;  %v1297_v39 = vmax.f32 %v1281_v5, %v1289_v7  ;;  %v1441_v3 = vld [vmem:[%s6956_s0] sm:$0xff]  ;;  %v1442_v5 = vld [vmem:[%s6956_s0 + $0x8] sm:$0xff]  ;;  %v2207_v23 = vld [vmem:[%s6922_s10 + $0x10] sm:$0xff] }
 0x2a8   :  { %v5354_v40 = vunpack.i.h.bf16 %v5352_v26  ;;  %v5353_v41 = vunpack.i.l.bf16 %v5352_v26  ;;  %4986 = vmatpush3.bf16.msra.mxu1 %v4983_v25  ;;  %5050 = vmatpush3.bf16.msra.mxu0 %v4983_v25  ;;  %v5031_v6 = vpack.c.bf16 %v1442_v5, %v1441_v3  ;;  %v2210_v3 = vld [vmem:[%s6922_s10 + $0x28] sm:$0xff]  ;;  %v2212_v5 = vld [vmem:[%s6922_s10 + $0x38] sm:$0xff] }
 0x2a9   :  { %v1292_v13 = vmax.f32 %v1212_v47, %v5364_v32  ;;  %v1291_v14 = vmax.f32 %v1211_v48, %v5363_v35  ;;  %v4987_v37 = vpack.c.bf16 %v1298_v36, %v1297_v39  ;;  %v4084_v48 = vld [vmem:[%s6955_s29 + $0x90] sm:$0xff] }
 0x2aa   :  { %v5367_v38 = vpop.permute.xlu1 %5366  ;;  %v1286_v51 = vmax.f32 %v1206_v43, %v5354_v40  ;;  %v1285_v52 = vmax.f32 %v1205_v44, %v5353_v41  ;;  %v4083_v43 = vld [vmem:[%s6955_s29 + $0x88] sm:$0xff]  ;;  %v1305_v44 = vld [vmem:[%s6955_s29 + $0x10] sm:$0xff] }
 0x2ab   :  { %v1300_v42 = vmax.f32 %v1284_v9, %v1292_v13  ;;  %v1299_v45 = vmax.f32 %v1283_v11, %v1291_v14  ;;  %v5369_v46 = vunpack.i.h.bf16 %v5367_v38  ;;  %v5368_v49 = vunpack.i.l.bf16 %v5367_v38  ;;  %4988 = vmatprep.subr.bf16.mxu1 %v4987_v37  ;;  %5052 = vmatprep.subr.bf16.mxu0 %v4987_v37 }
 0x2ac   :  { %4990 = vmatpush3.bf16.msra.mxu1 %v4987_v37  ;;  %5054 = vmatpush3.bf16.msra.mxu0 %v4987_v37 }
 0x2ad   :  { %v4991_v21 = vpack.c.bf16 %v1300_v42, %v1299_v45  ;;  %v1294_v22 = vmax.f32 %v1214_v55, %v5369_v46  ;;  %v1293_v29 = vmax.f32 %v1213_v56, %v5368_v49  ;;  %v4086_v55 = vld [vmem:[%s6955_s29 + $0xa0] sm:$0xff]  ;;  %v1308_v56 = vld [vmem:[%s6955_s29 + $0x28] sm:$0xff]  ;;  %v1443_v45 = vld [vmem:[%s6956_s0 + $0x10] sm:$0xff] }
 0x2ae   :  { %v1444_v46 = vld [vmem:[%s6956_s0 + $0x18] sm:$0xff] }
 0x2af   :  { %v1302_v30 = vmax.f32 %v1286_v51, %v1294_v22  ;;  %v1301_v47 = vmax.f32 %v1285_v52, %v1293_v29  ;;  %4992 = vmatprep.subr.bf16.mxu1 %v4991_v21  ;;  %5056 = vmatprep.subr.bf16.mxu0 %v4991_v21  ;;  %v5035_v52 = vpack.c.bf16 %v1444_v46, %v1443_v45  ;;  %v1446_v22 = vld [vmem:[%s6956_s0 + $0x28] sm:$0xff]  ;;  %v2219_v45 = vld [vmem:[%s6922_s10 + $0x70] sm:$0xff] }
 0x2b0   :  { %4994 = vmatpush3.bf16.msra.mxu1 %v4991_v21  ;;  %5058 = vmatpush3.bf16.msra.mxu0 %v4991_v21 }
 0x2b1   :  { %v4995_v33 = vpack.c.bf16 %v1302_v30, %v1301_v47 }
 0x2b3   :  { %4996 = vmatprep.subr.bf16.mxu1 %v4995_v33  ;;  %5060 = vmatprep.subr.bf16.mxu0 %v4995_v33 }
 0x2b4   :  { %4998 = vmatpush3.bf16.msra.mxu1 %v4995_v33  ;;  %5062 = vmatpush3.bf16.msra.mxu0 %v4995_v33 }
 0x2b5   :  { %5000 = vmatprep.subr.bf16.mxu1 %v4983_v25 }
 0x2b7   :  { %4694 = vmatmul.mubr.msk.f32.vlgmr.msra.gmra.mrb[32].mxu1 %vm1311_vm1, %v1304_v34  ;;  %4806 = vmatmul.mubr.msk.f32.vlgmr.msra.gmra.mrb[32].mxu0 %vm1311_vm1, %v4083_v43  ;;  %v1448_v34 = vld [vmem:[%s6956_s0 + $0x38] sm:$0xff] }
 0x2b8   :  { %5002 = vmatpush3.bf16.msra.mxu1 %v4983_v25  ;;  %4696 = vmatprep.mubr.msk.f32.mxu1 %vm1311_vm1, %v1305_v44  ;;  %v4064_v25 = vld [vmem:[%s6956_s0 + $0x70] sm:$0xff] }
 0x2b9   :  { %5004 = vmatprep.subr.bf16.mxu1 %v4987_v37  ;;  %4808 = vmatprep.mubr.msk.f32.mxu0 %vm1311_vm1, %v4084_v48  ;;  %v5027_v31 = vpack.c.bf16 %v4065_v28, %v4064_v25  ;;  %v2221_v28 = vld [vmem:[%s6923_s1] sm:$0xff] }
 0x2bb   :  { %4697 = vmatmul.mubr.msk.f32.gmra.mrb[34].mxu1 %vm1311_vm1, %v1306_v50  ;;  %4809 = vmatmul.mubr.msk.f32.gmra.mrb[34].mxu0 %vm1311_vm1, %v4085_v53  ;;  %v4098_v50 = vld [vmem:[%s6956_s0 + $0x80] sm:$0xff]  ;;  %v4099_v53 = vld [vmem:[%s6956_s0 + $0x88] sm:$0xff] }
 0x2bc   :  { %5006 = vmatpush3.bf16.msra.mxu1 %v4987_v37  ;;  %4699 = vmatprep.mubr.msk.f32.mxu1 %vm1311_vm1, %v1307_v54 }
 0x2bd   :  { %5008 = vmatprep.subr.bf16.mxu1 %v4991_v21  ;;  %4811 = vmatprep.mubr.msk.f32.mxu0 %vm1311_vm1, %v4086_v55 }
 0x2bf   :  { %4700 = vmatmul.mubr.msk.f32.gmra.mrb[36].mxu1 %vm1311_vm1, %v1308_v56  ;;  %4812 = vmatmul.mubr.msk.f32.gmra.mrb[36].mxu0 %vm1311_vm1, %v4087_v57  ;;  %v5063_v56 = vpack.c.bf16 %v4099_v53, %v4098_v50  ;;  %v4100_v57 = vld [vmem:[%s6956_s0 + $0x90] sm:$0xff]  ;;  %v2468_v53 = vld [vmem:[%s6925_s13 + $0x28] sm:$0xff] }
 0x2c0   :  { %5010 = vmatpush3.bf16.msra.mxu1 %v4991_v21  ;;  %4702 = vmatprep.mubr.msk.f32.mxu1 %vm1311_vm1, %v1309_v58  ;;  %v1445_v21 = vld [vmem:[%s6956_s0 + $0x20] sm:$0xff]  ;;  %v4101_v58 = vld [vmem:[%s6956_s0 + $0x98] sm:$0xff] }
 0x2c1   :  { %5012 = vmatprep.subr.bf16.mxu1 %v4995_v33  ;;  %4814 = vmatprep.mubr.msk.f32.mxu0 %vm1311_vm1, %v4088_v59  ;;  %v5039_v47 = vpack.c.bf16 %v1446_v22, %v1445_v21  ;;  %v5067_v59 = vpack.c.bf16 %v4101_v58, %v4100_v57  ;;  %v2464_v22 = vld [vmem:[%s6925_s13 + $0x8] sm:$0xff] }
 0x2c3   :  { %4703 = vmatmul.mubr.msk.f32.gmra.mrb[38].mxu1 %vm1311_vm1, %v1310_v62  ;;  %4815 = vmatmul.mubr.msk.f32.gmra.mrb[38].mxu0 %vm1311_vm1, %v4089_v63  ;;  %v5071_v62 = vpack.c.bf16 %v4103_v61, %v4102_v60  ;;  %v4104_v63 = vld [vmem:[%s6956_s0 + $0xb0] sm:$0xff] }
 0x2c4   :  { %5014 = vmatpush3.bf16.msra.mxu1 %v4995_v33  ;;  %4721 = vmatprep.mubr.msk.f32.mxu1 %vm1311_vm1, %v4042_v0  ;;  %v1447_v33 = vld [vmem:[%s6956_s0 + $0x30] sm:$0xff]  ;;  %v4105_v0 = vld [vmem:[%s6956_s0 + $0xb8] sm:$0xff] }
 0x2c5   :  { %5016 = vmatprep.subr.bf16.mxu1 %v5015_v1  ;;  %v5043_v48 = vpack.c.bf16 %v1448_v34, %v1447_v33  ;;  %v2469_v60 = vld [vmem:[%s6925_s13 + $0x30] sm:$0xff] }
 0x2c7   :  { %4722 = vmatmul.mubr.msk.f32.vlgmr.msra.gmra.mrb[40].mxu1 %vm1311_vm1, %v4043_v8  ;;  %v2225_v8 = vld [vmem:[%s6957_s11] sm:$0xff] }
 0x2c8   :  { %4724 = vmatprep.mubr.msk.f32.mxu1 %vm1311_vm1, %v4044_v10  ;;  %5018 = vmatpush3.bf16.msra.mxu1 %v5015_v1  ;;  %v5075_v1 = vpack.c.bf16 %v4105_v0, %v4104_v63  ;;  %v5467_v10 = vmov 0.0  }
 0x2c9   :  { %5020 = vmatprep.subr.bf16.mxu1 %v5019_v12  ;;  %2315 = vmatprep.mubr.f32.mxu0 %v5467_v10 }
 0x2cb   :  { %4725 = vmatmul.mubr.msk.f32.gmra.mrb[42].mxu1 %vm1311_vm1, %v4045_v15  ;;  %v2227_v15 = vld [vmem:[%s6957_s11 + $0x10] sm:$0xff] }
 0x2cc   :  { %4727 = vmatprep.mubr.msk.f32.mxu1 %vm1311_vm1, %v4046_v16  ;;  %5022 = vmatpush3.bf16.msra.mxu1 %v5019_v12  ;;  %v5079_v12 = vpack.c.bf16 %v2228_v4, %v2226_v2  ;;  %v5081_v16 = vpack.c.bf16 %v2227_v15, %v2225_v8  ;;  %v2474_v2 = vld [vmem:[%s6925_s13 + $0x58] sm:$0xff] }
 0x2cd   :  { %5024 = vmatprep.subr.bf16.mxu1 %v5023_v24 }
 0x2ce   :  { %5080 = vmatprep.subr.bf16.mxu0 %v5079_v12 }
 0x2cf   :  { %4728 = vmatmul.mubr.msk.f32.gmra.mrb[44].mxu1 %vm1311_vm1, %v4047_v17  ;;  %v2230_v17 = vld [vmem:[%s6957_s11 + $0x28] sm:$0xf]  ;;  %5082 = vmatpush1.bf16.msra.mxu0 %v5081_v16 }
 0x2d0   :  { %4730 = vmatprep.mubr.msk.f32.mxu1 %vm1311_vm1, %v4048_v18  ;;  %5026 = vmatpush3.bf16.msra.mxu1 %v5023_v24  ;;  %v2206_v18 = vld [vmem:[%s6922_s10 + $0x8] sm:$0xff]  ;;  %v2229_v24 = vld [vmem:[%s6957_s11 + $0x20] sm:$0xf] }
 0x2d1   :  { %5028 = vmatprep.subr.bf16.mxu1 %v5027_v31  ;;  %4115 = vmatprep.subr.msk.mxu0 %vm2244_vm2, %v2230_v17  ;;  %v2471_v17 = vld [vmem:[%s6925_s13 + $0x40] sm:$0xff] }
 0x2d3   :  { %4731 = vmatmul.mubr.msk.f32.gmra.mrb[46].mxu1 %vm1311_vm1, %v4049_v19  ;;  %v2208_v19 = vld [vmem:[%s6922_s10 + $0x18] sm:$0xff]  ;;  %4116 = vmatpush1.msk.msra.mxu0 %vm2244_vm2, %v2229_v24 }
 0x2d4   :  { %5030 = vmatpush3.bf16.msra.mxu1 %v5027_v31  ;;  %v5083_v25 = vpack.c.bf16 %v2208_v19, %v2206_v18  ;;  %v5085_v31 = vpack.c.bf16 %v2207_v23, %v2205_v20  ;;  %4117 = vmatmul.mubr.msk.f32.vlgmr.msra.gmra.mrb[40].mxu0 %vm2231_vm3, %v2221_v28  ;;  %v2473_v18 = vld [vmem:[%s6925_s13 + $0x50] sm:$0xff]  ;;  %v2476_v23 = vld [vmem:[%s6925_s13 + $0x68] sm:$0xff]  ;;  %v2478_v24 = vld [vmem:[%s6925_s13 + $0x78] sm:$0xff] }
 0x2d5   :  { %5032 = vmatprep.subr.bf16.mxu1 %v5031_v6  ;;  %2321 = vmatprep.mubr.f32.mxu0 %v5467_v10  ;;  %v6381_v20 = vpack.c.bf16 %v2473_v18, %v2471_v17 }
 0x2d6   :  { %5084 = vmatprep.subr.bf16.mxu0 %v5083_v25 }
 0x2d7   :  { %5086 = vmatpush1.bf16.msra.mxu0 %v5085_v31 }
 0x38a   :  { %v4695_v7 = vpop.f32.mrb[32].mxu1  ;;  %v6124_v26 = vpop.f32.mrb[32].mxu0 }
 0x38b   :  { %v1402_v27 = vpop.f32.mrb[33].mxu1  ;;  %v6126_v32 = vpop.f32.mrb[33].mxu0 }
 0x38e   :  { %v4698_v35 = vpop.f32.mrb[34].mxu1  ;;  %v6128_v36 = vpop.f32.mrb[34].mxu0 }
 0x38f   :  { %v1412_v39 = vpop.f32.mrb[35].mxu1  ;;  %v6130_v40 = vpop.f32.mrb[35].mxu0 }
 0x392   :  { %v4701_v41 = vpop.f32.mrb[36].mxu1  ;;  %v6132_v9 = vpop.f32.mrb[36].mxu0 }
 0x393   :  { %v1422_v11 = vpop.f32.mrb[37].mxu1  ;;  %v6134_v13 = vpop.f32.mrb[37].mxu0 }
 0x396   :  { %v4704_v14 = vpop.f32.mrb[38].mxu1  ;;  %v6136_v37 = vpop.f32.mrb[38].mxu0 }
 0x397   :  { %v1432_v38 = vpop.f32.mrb[39].mxu1  ;;  %v6138_v42 = vpop.f32.mrb[39].mxu0 }
 0x39a   :  { %v4723_v49 = vpop.f32.mrb[40].mxu1 }
 0x39b   :  { %v1548_v51 = vpop.f32.mrb[41].mxu1 }
 0x39c   :  { %4749 = vmatprep.mubr.msk.f32.mxu1 %vm1311_vm1, %v1548_v51 }
 0x39d   :  { %4750 = vmatmul.mubr.msk.f32.vlgmr.msra.gmra.mrb[48].mxu1 %vm1311_vm1, %v4723_v49  ;;  %v2224_v49 = vld [vmem:[%s6923_s1 + $0x18] sm:$0xff] }
 0x39e   :  { %v4726_v29 = vpop.f32.mrb[42].mxu1  ;;  %5034 = vmatpush3.bf16.msra.mxu1 %v5031_v6  ;;  %v5087_v6 = vpack.c.bf16 %v2212_v5, %v2210_v3  ;;  %v6395_v3 = vpack.c.bf16 %v2478_v24, %v2476_v23  ;;  %v2475_v5 = vld [vmem:[%s6925_s13 + $0x60] sm:$0xff] }
 0x39f   :  { %v1558_v30 = vpop.f32.mrb[43].mxu1  ;;  %5036 = vmatprep.subr.bf16.mxu1 %v5035_v52 }
 0x3a0   :  { %4752 = vmatprep.mubr.msk.f32.mxu1 %vm1311_vm1, %v1558_v30  ;;  %5088 = vmatprep.subr.bf16.mxu0 %v5087_v6  ;;  %v2477_v6 = vld [vmem:[%s6925_s13 + $0x70] sm:$0xff] }
 0x3a1   :  { %4753 = vmatmul.mubr.msk.f32.gmra.mrb[50].mxu1 %vm1311_vm1, %v4726_v29  ;;  %v2466_v29 = vld [vmem:[%s6925_s13 + $0x18] sm:$0xff] }
 0x3a2   :  { %v4729_v43 = vpop.f32.mrb[44].mxu1  ;;  %5038 = vmatpush3.bf16.msra.mxu1 %v5035_v52  ;;  %v6320_v34 = vpack.c.bf16 %v2466_v29, %v2464_v22 }
 0x3a3   :  { %v1568_v44 = vpop.f32.mrb[45].mxu1  ;;  %5040 = vmatprep.subr.bf16.mxu1 %v5039_v47 }
 0x3a4   :  { %4755 = vmatprep.mubr.msk.f32.mxu1 %vm1311_vm1, %v1568_v44  ;;  %v2465_v44 = vld [vmem:[%s6925_s13 + $0x10] sm:$0xff] }
 0x3a5   :  { %4756 = vmatmul.mubr.msk.f32.gmra.mrb[52].mxu1 %vm1311_vm1, %v4729_v43  ;;  %v2463_v43 = vld [vmem:[%s6925_s13] sm:$0xff] }
 0x3a6   :  { %v4732_v54 = vpop.f32.mrb[46].mxu1  ;;  %5042 = vmatpush3.bf16.msra.mxu1 %v5039_v47  ;;  %v6328_v50 = vpack.c.bf16 %v2465_v44, %v2463_v43  ;;  %v2441_v44 = vld [vmem:[%s6926_s12] sm:$0x3] }
 0x3a7   :  { %v1578_v55 = vpop.f32.mrb[47].mxu1  ;;  %5044 = vmatprep.subr.bf16.mxu1 %v5043_v48 }
 0x3a8   :  { %4758 = vmatprep.mubr.msk.f32.mxu1 %vm1311_vm1, %v1578_v55 }
 0x3a9   :  { %4759 = vmatmul.mubr.msk.f32.gmra.mrb[54].mxu1 %vm1311_vm1, %v4732_v54  ;;  %v2470_v54 = vld [vmem:[%s6925_s13 + $0x38] sm:$0xff] }
 0x3aa   :  { %5046 = vmatpush3.bf16.msra.mxu1 %v5043_v48  ;;  %4777 = vmatprep.mubr.msk.f32.mxu1 %vm1311_vm1, %v1402_v27  ;;  %v2222_v27 = vld [vmem:[%s6923_s1 + $0x8] sm:$0xff]  ;;  %v6346_v58 = vpack.c.bf16 %v2470_v54, %v2468_v53 }
 0x3ab   :  { %5064 = vmatprep.subr.bf16.mxu1 %v5063_v56  ;;  %4118 = vmatmul.mubr.msk.f32.gmra.mrb[42].mxu0 %vm2231_vm3, %v2222_v27 }
 0x3ac   :  { %2327 = vmatprep.mubr.f32.mxu0 %v5467_v10 }
 0x3ad   :  { %4778 = vmatmul.mubr.msk.f32.vlgmr.msra.gmra.mrb[48].mxu1 %vm1311_vm1, %v4695_v7  ;;  %v2209_v7 = vld [vmem:[%s6922_s10 + $0x20] sm:$0xff] }
 0x3ae   :  { %4780 = vmatprep.mubr.msk.f32.mxu1 %vm1311_vm1, %v1412_v39  ;;  %5066 = vmatpush3.bf16.msra.mxu1 %v5063_v56 }
 0x3af   :  { %5068 = vmatprep.subr.bf16.mxu1 %v5067_v59 }
 0x3b1   :  { %4781 = vmatmul.mubr.msk.f32.gmra.mrb[50].mxu1 %vm1311_vm1, %v4698_v35  ;;  %v2214_v35 = vld [vmem:[%s6922_s10 + $0x48] sm:$0xff] }
 0x3b2   :  { %4783 = vmatprep.mubr.msk.f32.mxu1 %vm1311_vm1, %v1422_v11  ;;  %5070 = vmatpush3.bf16.msra.mxu1 %v5067_v59  ;;  %v2467_v59 = vld [vmem:[%s6925_s13 + $0x20] sm:$0xff] }
 0x3b3   :  { %5072 = vmatprep.subr.bf16.mxu1 %v5071_v62 }
 0x3b5   :  { %4784 = vmatmul.mubr.msk.f32.gmra.mrb[52].mxu1 %vm1311_vm1, %v4701_v41  ;;  %v2215_v41 = vld [vmem:[%s6922_s10 + $0x50] sm:$0xff] }
 0x3b6   :  { %4786 = vmatprep.mubr.msk.f32.mxu1 %vm1311_vm1, %v1432_v38  ;;  %5074 = vmatpush3.bf16.msra.mxu1 %v5071_v62  ;;  %v6354_v62 = vpack.c.bf16 %v2469_v60, %v2467_v59 }
 0x3b7   :  { %5076 = vmatprep.subr.bf16.mxu1 %v5075_v1 }
 0x3b9   :  { %4787 = vmatmul.mubr.msk.f32.gmra.mrb[54].mxu1 %vm1311_vm1, %v4704_v14  ;;  %v2220_v14 = vld [vmem:[%s6922_s10 + $0x78] sm:$0xff] }
 0x3ba   :  { %5078 = vmatpush3.bf16.msra.mxu1 %v5075_v1  ;;  %4833 = vmatprep.mubr.msk.f32.mxu1 %vm1311_vm1, %v6126_v32  ;;  %v2472_v1 = vld [vmem:[%s6925_s13 + $0x48] sm:$0xff] }
 0x3bb   :  { %5100 = vmatprep.subr.bf16.mxu1 %v6320_v34  ;;  %v6373_v16 = vpack.c.bf16 %v2474_v2, %v2472_v1 }
 0x3bd   :  { %4834 = vmatmul.mubr.msk.f32.vlgmr.msra.gmra.mrb[48].mxu1 %vm1311_vm1, %v6124_v26  ;;  %v2211_v26 = vld [vmem:[%s6922_s10 + $0x30] sm:$0xff] }
 0x3be   :  { %4836 = vmatprep.mubr.msk.f32.mxu1 %vm1311_vm1, %v6130_v40  ;;  %v5089_v32 = vpack.c.bf16 %v2211_v26, %v2209_v7  ;;  %v2213_v40 = vld [vmem:[%s6922_s10 + $0x40] sm:$0xff]  ;;  %5102 = vmatpush1.bf16.msra.mxu1 %v6328_v50  ;;  %v6403_v7 = vpack.c.bf16 %v2477_v6, %v2475_v5 }
 0x3bf   :  { %v5093_v11 = vpack.c.bf16 %v2215_v41, %v2213_v40  ;;  %5104 = vmatprep.subr.bf16.mxu1 %v6346_v58 }
 0x3c0   :  { %5090 = vmatpush1.bf16.msra.mxu0 %v5089_v32 }
 0x3c1   :  { %4837 = vmatmul.mubr.msk.f32.gmra.mrb[50].mxu1 %vm1311_vm1, %v6128_v36  ;;  %v2216_v36 = vld [vmem:[%s6922_s10 + $0x58] sm:$0xff] }
 0x3c2   :  { %4839 = vmatprep.mubr.msk.f32.mxu1 %vm1311_vm1, %v6134_v13  ;;  %v5091_v39 = vpack.c.bf16 %v2216_v36, %v2214_v35  ;;  %v2218_v13 = vld [vmem:[%s6922_s10 + $0x68] sm:$0xff]  ;;  %5106 = vmatpush1.bf16.msra.mxu1 %v6354_v62 }
 0x3c3   :  { %v5095_v38 = vpack.c.bf16 %v2220_v14, %v2218_v13  ;;  %5108 = vmatprep.subr.bf16.mxu1 %v6373_v16 }
 0x3c4   :  { %5092 = vmatprep.subr.bf16.mxu0 %v5091_v39 }
 0x3c5   :  { %4840 = vmatmul.mubr.msk.f32.gmra.mrb[52].mxu1 %vm1311_vm1, %v6132_v9  ;;  %v2223_v9 = vld [vmem:[%s6923_s1 + $0x10] sm:$0xff]  ;;  %5094 = vmatpush1.bf16.msra.mxu0 %v5093_v11 }
 0x3c6   :  { %4842 = vmatprep.mubr.msk.f32.mxu1 %vm1311_vm1, %v6138_v42  ;;  %4119 = vmatmul.mubr.msk.f32.gmra.mrb[44].mxu0 %vm2231_vm3, %v2223_v9  ;;  %v2217_v42 = vld [vmem:[%s6922_s10 + $0x60] sm:$0xff] }
 0x3c7   :  { %2333 = vmatprep.mubr.f32.mxu0 %v5467_v10  ;;  %v5097_v51 = vpack.c.bf16 %v2219_v45, %v2217_v42  ;;  %5096 = vmatprep.subr.bf16.mxu0 %v5095_v38 }
 0x3c8   :  { %5110 = vmatpush1.bf16.msra.mxu1 %v6381_v20 }
 0x3c9   :  { %4843 = vmatmul.mubr.msk.f32.gmra.mrb[54].mxu1 %vm1311_vm1, %v6136_v37  ;;  %v6294_v37 = vld [vmem:[%s6924_s9] ss:$0 sm:$0xff]  ;;  %5098 = vmatpush1.bf16.msra.mxu0 %v5097_v51 }
 0x3ca   :  { %2590 = vmatprep.mubr.f32.mxu1 %v5467_v10  ;;  %4120 = vmatmul.mubr.msk.f32.gmra.mrb[46].mxu0 %vm2231_vm3, %v2224_v49 }
 0x3cb   :  { %2416 = vmatprep.mubr.f32.mxu0 %v5467_v10  ;;  %5132 = vmatprep.subr.bf16.mxu0 %v6320_v34 }
 0x3cc   :  { %5112 = vmatprep.subr.bf16.mxu1 %v6395_v3 }
 0x3cd   :  { %5114 = vmatpush1.bf16.msra.mxu1 %v6403_v7 }
 0x3ce   :  { %5116 = vmatprep.subr.bf16.mxu1 %v6320_v34 }
 0x3d0   :  { %2591 = vmatmul.mubr.f32.vlgmr.msra.gmra.mrb[56].mxu1 %v5467_v10 }
 0x3d1   :  { %5118 = vmatpush1.bf16.msra.mxu1 %v6328_v50  ;;  %2713 = vmatprep.mubr.f32.mxu1 %v5467_v10 }
 0x3d2   :  { %5120 = vmatprep.subr.bf16.mxu1 %v6346_v58 }
 0x3d5   :  { %5122 = vmatpush1.bf16.msra.mxu1 %v6354_v62 }
 0x3d6   :  { %5124 = vmatprep.subr.bf16.mxu1 %v6373_v16 }
 0x3d9   :  { %5126 = vmatpush1.bf16.msra.mxu1 %v6381_v20 }
 0x3da   :  { %5128 = vmatprep.subr.bf16.mxu1 %v6395_v3 }
 0x3dd   :  { %5130 = vmatpush1.bf16.msra.mxu1 %v6403_v7 }
 0x3de   :  { %5148 = vmatprep.subr.bf16.mxu1 %v6320_v34 }
 0x490   :  { %v4835_v46 = vpop.f32.mrb[48].mxu1 }
 0x491   :  { %v2091_v52 = vpop.f32.mrb[49].mxu1  ;;  %v6317_v30 = vadd.f32 %v4835_v46, %v6294_v37 }
 0x492   :  { %v6307_v21 = vadd.f32 %v6294_v37, %v2091_v52 }
 0x493   :  { %v2154_v55 = vmax.f32 %v6317_v30, 0.0 }
 0x494   :  { %v2153_v47 = vmax.f32 %v6307_v21, 0.0  ;;  %v4838_v33 = vpop.f32.mrb[50].mxu1 }
 0x495   :  { %v2101_v48 = vpop.f32.mrb[51].mxu1  ;;  %v6362_v0 = vadd.f32 %v4838_v33, %v6294_v37  ;;  %v2443_v33 = vlaneseq }
 0x496   :  { %2169 = vrot.lane.b32.xlu0 %v2153_v47, %s5466_s26  ;;  %v6344_v56 = vadd.f32 %v6294_v37, %v2101_v48 }
 0x497   :  { %v2156_v25 = vmax.f32 %v6362_v0, 0.0  ;;  %v2444_v34 = vshrl.u32 %v2443_v33, 7 }
 0x498   :  { %v4841_v57 = vpop.f32.mrb[52].mxu1  ;;  %v2155_v4 = vmax.f32 %v6344_v56, 0.0 }
 0x499   :  { %v2111_v61 = vpop.f32.mrb[53].mxu1  ;;  %v2150_v8 = vadd.f32 %v4841_v57, %v6294_v37  ;;  %v6442_v43 = vsub.s32 0, %v2444_v34  ;;  %v6448_v54 = vsub.s32 1, %v2444_v34  ;;  %v2461_v57 = vld [vmem:[%s6927_s17] sm:$0x3] }
 0x49a   :  { %v2149_v63 = vadd.f32 %v6294_v37, %v2111_v61  ;;  %2171 = vrot.lane.b32.xlu0 %v2154_v55, %s5466_s26  ;;  %v2462_v61 = vsub.f32 1.0, %v2461_v57 }
 0x49b   :  { %v2158_v28 = vmax.f32 %v2150_v8, 0.0  ;;  %v2446_v48 = vrot.slane %v2441_v44, %v6442_v43  ;;  %v2450_v59 = vrot.slane %v2441_v44, %v6448_v54  ;;  %v6461_v18 = vrot.slane %v2461_v57, %v6448_v54 }
 0x49c   :  { %v2157_v12 = vmax.f32 %v2149_v63, 0.0  ;;  %v4844_v15 = vpop.f32.mrb[54].mxu1  ;;  %v6458_v8 = vrot.slane %v2462_v61, %v6442_v43 }
 0x49d   :  { %v2121_v19 = vpop.f32.mrb[55].mxu1  ;;  %v2152_v26 = vadd.f32 %v4844_v15, %v6294_v37 }
 0x49e   :  { %2173 = vrot.lane.b32.xlu0 %v2155_v4, %s5466_s26  ;;  %2177 = vrot.lane.b32.xlu1 %v2157_v12, %s5466_s26  ;;  %v2151_v31 = vadd.f32 %v6294_v37, %v2121_v19  ;;  %v6464_v19 = vrot.slane %v2462_v61, %v6448_v54 }
 0x49f   :  { %v2160_v32 = vmax.f32 %v2152_v26, 0.0 }
 0x4a0   :  { %v2159_v27 = vmax.f32 %v2151_v31, 0.0 }
 0x4a2   :  { %2175 = vrot.lane.b32.xlu0 %v2156_v25, %s5466_s26  ;;  %2179 = vrot.lane.b32.xlu1 %v2158_v28, %s5466_s26 }
 0x4a3   :  { %v2592_v30 = vpop.f32.mrb[56].mxu1 }
 0x4a6   :  { %2181 = vrot.lane.b32.xlu1 %v2159_v27, %s5466_s26 }
 0x4aa   :  { %2183 = vrot.lane.b32.xlu1 %v2160_v32, %s5466_s26 }
 0x508   :  { %v2170_v35 = vpop.permute.xlu0 %2169 }
 0x509   :  { %v2193_v40 = vmax.f32 %v2153_v47, %v2170_v35  ;;  %v2594_v47 = vpop.f32.mrb[57].mxu1 }
 0x50c   :  { %v2172_v36 = vpop.permute.xlu0 %2171 }
 0x50d   :  { %v2194_v14 = vmax.f32 %v2154_v55, %v2172_v36 }
 0x510   :  { %v2178_v39 = vpop.permute.xlu1 %2177  ;;  %v2174_v11 = vpop.permute.xlu0 %2173 }
 0x511   :  { %v2197_v41 = vmax.f32 %v2157_v12, %v2178_v39  ;;  %v2195_v45 = vmax.f32 %v2155_v4, %v2174_v11  ;;  %v6455_v4 = vrot.slane %v2461_v57, %v6442_v43 }
 0x513   :  { %v2201_v9 = vmax.f32 %v2193_v40, %v2197_v41 }
 0x514   :  { %v2180_v13 = vpop.permute.xlu1 %2179  ;;  %v2176_v49 = vpop.permute.xlu0 %2175 }
 0x515   :  { %v2198_v37 = vmax.f32 %v2158_v28, %v2180_v13  ;;  %4121 = vmatmul.mubr.msk.f32.vlgmr.msra.gmra.mrb[40].mxu0 %vm1311_vm1, %v2201_v9  ;;  %v2196_v21 = vmax.f32 %v2156_v25, %v2176_v49 }
 0x516   :  { %2422 = vmatprep.mubr.f32.mxu0 %v5467_v10  ;;  %5134 = vmatpush1.bf16.msra.mxu0 %v6328_v50 }
 0x517   :  { %v2202_v38 = vmax.f32 %v2194_v14, %v2198_v37  ;;  %5136 = vmatprep.subr.bf16.mxu0 %v6346_v58 }
 0x518   :  { %v2182_v42 = vpop.permute.xlu1 %2181 }
 0x519   :  { %v2199_v46 = vmax.f32 %v2159_v27, %v2182_v42  ;;  %4122 = vmatmul.mubr.msk.f32.gmra.mrb[42].mxu0 %vm1311_vm1, %v2202_v38 }
 0x51a   :  { %2428 = vmatprep.mubr.f32.mxu0 %v5467_v10  ;;  %5138 = vmatpush1.bf16.msra.mxu0 %v6354_v62 }
 0x51b   :  { %v2203_v51 = vmax.f32 %v2195_v45, %v2199_v46  ;;  %5140 = vmatprep.subr.bf16.mxu0 %v6373_v16 }
 0x51c   :  { %v2184_v52 = vpop.permute.xlu1 %2183 }
 0x51d   :  { %v2200_v22 = vmax.f32 %v2160_v32, %v2184_v52  ;;  %4123 = vmatmul.mubr.msk.f32.gmra.mrb[44].mxu0 %vm1311_vm1, %v2203_v51 }
 0x51e   :  { %2434 = vmatprep.mubr.f32.mxu0 %v5467_v10  ;;  %5142 = vmatpush1.bf16.msra.mxu0 %v6381_v20 }
 0x51f   :  { %v2204_v29 = vmax.f32 %v2196_v21, %v2200_v22  ;;  %5144 = vmatprep.subr.bf16.mxu0 %v6395_v3 }
 0x521   :  { %4124 = vmatmul.mubr.msk.f32.gmra.mrb[46].mxu0 %vm1311_vm1, %v2204_v29 }
 0x522   :  { %5146 = vmatpush1.bf16.msra.mxu0 %v6403_v7  ;;  %2842 = vmatprep.mubr.f32.mxu0 %v5467_v10 }
 0x5e8   :  { %v2418_v53 = vpop.f32.mrb[40].mxu0 }
 0x5e9   :  { %v2453_v55 = vadd.f32 %v2446_v48, %v2418_v53  ;;  %v2420_v56 = vpop.f32.mrb[41].mxu0 }
 0x5ea   :  { %v2454_v17 = vadd.f32 %v2450_v59, %v2420_v56 }
 0x5eb   :  { %v2506_v13 = vmul.f32 %v6455_v4, %v2453_v55  ;;  %v2900_v14 = vmul.f32 %v6458_v8, %v2453_v55 }
 0x5ec   :  { %v2424_v60 = vpop.f32.mrb[42].mxu0  ;;  %v2507_v42 = vmul.f32 %v6461_v18, %v2454_v17  ;;  %v2901_v45 = vmul.f32 %v6464_v19, %v2454_v17 }
 0x5ed   :  { %v2455_v63 = vadd.f32 %v2446_v48, %v2424_v60  ;;  %v2426_v0 = vpop.f32.mrb[43].mxu0 }
 0x5ee   :  { %v2456_v1 = vadd.f32 %v2450_v59, %v2426_v0 }
 0x5ef   :  { %v2640_v24 = vmul.f32 %v6455_v4, %v2455_v63  ;;  %v2771_v25 = vmul.f32 %v6458_v8, %v2455_v63  ;;  %v6501_v63 = vld [vmem:[%s6928_s2] sm:$0xff] }
 0x5f0   :  { %v2430_v2 = vpop.f32.mrb[44].mxu0  ;;  %v2641_v5 = vmul.f32 %v6461_v18, %v2456_v1  ;;  %v2772_v6 = vmul.f32 %v6464_v19, %v2456_v1  ;;  %v2631_v1 = vsub.f32 1.0, %v6501_v63 }
 0x5f1   :  { %v2457_v12 = vadd.f32 %v2446_v48, %v2430_v2  ;;  %v2432_v15 = vpop.f32.mrb[45].mxu0 }
 0x5f2   :  { %v2458_v23 = vadd.f32 %v2450_v59, %v2432_v15 }
 0x5f3   :  { %v2642_v28 = vmul.f32 %v6458_v8, %v2457_v12  ;;  %v2769_v31 = vmul.f32 %v6455_v4, %v2457_v12  ;;  %v6504_v12 = vmul.f32 0.0, %v2631_v1  ;;  %v3026_v1 = vld [vmem:[%s6929_s14 + $0x30] sm:$0xff] }
 0x5f4   :  { %v2643_v26 = vmul.f32 %v6464_v19, %v2458_v23  ;;  %v2770_v27 = vmul.f32 %v6461_v18, %v2458_v23  ;;  %v2436_v32 = vpop.f32.mrb[46].mxu0 }
 0x5f5   :  { %v2459_v35 = vadd.f32 %v2446_v48, %v2436_v32  ;;  %v2438_v36 = vpop.f32.mrb[47].mxu0  ;;  %v6474_v39 = vadd.f32 %v2642_v28, %v2640_v24  ;;  %v6476_v40 = vadd.f32 %v2771_v25, %v2769_v31 }
 0x5f6   :  { %v2460_v41 = vadd.f32 %v2450_v59, %v2438_v36  ;;  %v6478_v9 = vadd.f32 %v2643_v26, %v2641_v5  ;;  %v6480_v11 = vadd.f32 %v2772_v6, %v2770_v27 }
 0x5f7   :  { %v2519_v37 = vmul.f32 %v6458_v8, %v2459_v35  ;;  %v2898_v38 = vmul.f32 %v6455_v4, %v2459_v35 }
 0x5f8   :  { %v2520_v46 = vmul.f32 %v6464_v19, %v2460_v41  ;;  %v2899_v49 = vmul.f32 %v6461_v18, %v2460_v41 }
 0x5f9   :  { %v2521_v51 = vadd.f32 %v2519_v37, %v2506_v13  ;;  %v6490_v52 = vadd.f32 %v2900_v14, %v2898_v38  ;;  %v3023_v13 = vld [vmem:[%s6929_s14 + $0x18] sm:$0xff] }
 0x5fa   :  { %v2522_v21 = vadd.f32 %v2520_v46, %v2507_v42  ;;  %v6492_v22 = vadd.f32 %v2901_v45, %v2899_v49  ;;  %v6538_v45 = vld [vmem:[%s6928_s2 + $0x8] sm:$0xff] }
 0x5fb   :  { %v2597_v29 = vadd.f32 %v2592_v30, %v2521_v51  ;;  %v6541_v49 = vsub.f32 1.0, %v6538_v45 }
 0x5fc   :  { %v2598_v33 = vadd.f32 %v2594_v47, %v2522_v21 }
 0x5fd   :  { %v4125_v44 = vmul.f32 -1.442695, %v2597_v29 }
 0x5fe   :  { %5370 = vtanh.f32 %v2598_v33  ;;  %v4126_v47 = vmul.f32 -1.442695, %v2598_v33 }
 0x5ff   :  { %5372 = vpow2.f32 %v4125_v44 }
 0x608   :  { %v5371_v34 = vpop.eup %5370 }
 0x609   :  { %2614 = vrot.lane.b32.xlu0 %v5371_v34, %s5466_s26  ;;  %v5373_v48 = vpop.eup %5372 }
 0x60a   :  { %v2605_v53 = vadd.f32 1.0, %v5373_v48 }
 0x60c   :  { %5374 = vrcp.f32 %v2605_v53  ;;  %v3020_v53 = vld [vmem:[%s6929_s14] sm:$0xff] }
 0x616   :  { %v5375_v55 = vpop.eup %5374 }
 0x617   :  { %v2612_v59 = vmul.f32 0.0, %v5375_v55 }
 0x67b   :  { %v2615_v56 = vpop.permute.xlu0 %2614 }
 0x67c   :  { %v2617_v57 = vmul.f32 %v5375_v55, %v2615_v56  ;;  %v3022_v55 = vld [vmem:[%s6929_s14 + $0x10] sm:$0xff]  ;;  %v3025_v56 = vld [vmem:[%s6929_s14 + $0x28] sm:$0xff] }
 0x67e   :  { %2619 = vrot.lane.b32.xlu1 %v2617_v57, %s5466_s26  ;;  %v3027_v57 = vld [vmem:[%s6929_s14 + $0x38] sm:$0xff] }
 0x6f0   :  { %v2620_v60 = vpop.permute.xlu1 %2619 }
 0x6f1   :  { %v2622_v61 = vadd.f32 %v2620_v60, %v2612_v59 }
 0x6f3   :  { %5376 = vtanh.f32 %v2622_v61  ;;  %2635 = vrot.lane.b32.xlu1 %v2622_v61, %s5466_s26  ;;  %v5165_v61 = vpack.c.bf16 %v3022_v55, %v3020_v53 }
 0x6f4   :  { %5378 = vpow2.f32 %v4126_v47  ;;  %v5167_v47 = vpack.c.bf16 %v3027_v57, %v3025_v56 }
 0x6fd   :  { %v5377_v30 = vpop.eup %5376 }
 0x6fe   :  { %2625 = vrot.lane.b32.xlu0 %v5377_v30, %s5466_s26  ;;  %v5379_v0 = vpop.eup %5378 }
 0x6ff   :  { %v2606_v2 = vadd.f32 1.0, %v5379_v0  ;;  %v3024_v0 = vld [vmem:[%s6929_s14 + $0x20] sm:$0xff] }
 0x701   :  { %5380 = vrcp.f32 %v2606_v2  ;;  %v5169_v2 = vpack.c.bf16 %v3026_v1, %v3024_v0  ;;  %v3129_v1 = vld [vmem:[%s6929_s14 + $0x50] sm:$0xff] }
 0x70b   :  { %v5381_v24 = vpop.eup %5380 }
 0x765   :  { %v2636_v15 = vpop.permute.xlu1 %2635 }
 0x766   :  { %v2638_v17 = vmul.f32 %v2636_v15, %v6501_v63 }
 0x768   :  { %v2639_v23 = vadd.f32 %v2638_v17, %v6504_v12 }
 0x76a   :  { %2736 = vrot.lane.b32.xlu1 %v2639_v23, %s5466_s26  ;;  %v2767_v21 = vmul.f32 %v6541_v49, %v2639_v23 }
 0x770   :  { %v2626_v25 = vpop.permute.xlu0 %2625 }
 0x771   :  { %v2628_v28 = vmul.f32 %v5381_v24, %v2626_v25 }
 0x773   :  { %v2630_v31 = vmul.f32 %v6501_v63, %v2628_v28 }
 0x775   :  { %v6511_v5 = vadd.f32 %v6504_v12, %v2630_v31 }
 0x777   :  { %4127 = vmatmul.mubr.msk.f32.vlgmr.msra.gmra.mrb[58].mxu1 %vm1311_vm1, %v6511_v5  ;;  %v2760_v59 = vmul.f32 %v6541_v49, %v6511_v5 }
 0x778   :  { %5150 = vmatpush1.bf16.msra.mxu1 %v6328_v50  ;;  %2971 = vmatprep.mubr.f32.mxu1 %v5467_v10 }
 0x779   :  { %5152 = vmatprep.subr.bf16.mxu1 %v6346_v58 }
 0x77c   :  { %5154 = vmatpush1.bf16.msra.mxu1 %v6354_v62 }
 0x77d   :  { %5156 = vmatprep.subr.bf16.mxu1 %v6373_v16 }
 0x780   :  { %5158 = vmatpush1.bf16.msra.mxu1 %v6381_v20 }
 0x781   :  { %5160 = vmatprep.subr.bf16.mxu1 %v6395_v3 }
 0x784   :  { %5162 = vmatpush1.bf16.msra.mxu1 %v6403_v7 }
 0x7dc   :  { %v2737_v7 = vpop.permute.xlu1 %2736 }
 0x84a   :  { %v2715_v6 = vpop.f32.mrb[58].mxu1 }
 0x84b   :  { %v2720_v26 = vadd.f32 %v2715_v6, %v6474_v39  ;;  %v2717_v27 = vpop.f32.mrb[59].mxu1 }
 0x84c   :  { %v2721_v50 = vadd.f32 %v2717_v27, %v6478_v9  ;;  %v3021_v9 = vld [vmem:[%s6929_s14 + $0x8] sm:$0xff] }
 0x84d   :  { %v4128_v58 = vmul.f32 -1.442695, %v2720_v26  ;;  %v5163_v14 = vpack.c.bf16 %v3023_v13, %v3021_v9 }
 0x84e   :  { %5382 = vtanh.f32 %v2721_v50  ;;  %v4129_v38 = vmul.f32 -1.442695, %v2721_v50 }
 0x84f   :  { %5384 = vpow2.f32 %v4128_v58  ;;  %5164 = vmatprep.subr.bf16.mxu0 %v5163_v14 }
 0x858   :  { %v5383_v32 = vpop.eup %5382 }
 0x859   :  { %2741 = vrot.lane.b32.xlu0 %v5383_v32, %s5466_s26  ;;  %v5385_v62 = vpop.eup %5384 }
 0x85a   :  { %v2728_v16 = vadd.f32 1.0, %v5385_v62 }
 0x85c   :  { %5386 = vrcp.f32 %v2728_v16 }
 0x866   :  { %v5387_v20 = vpop.eup %5386 }
 0x867   :  { %v2739_v36 = vmul.f32 %v5387_v20, %v2737_v7 }
 0x8cb   :  { %v2742_v35 = vpop.permute.xlu0 %2741 }
 0x8cc   :  { %v2744_v3 = vmul.f32 %v5387_v20, %v2742_v35  ;;  %v6587_v35 = vld [vmem:[%s6928_s2 + $0x10] sm:$0xff] }
 0x8cd   :  { %v6590_v7 = vsub.f32 1.0, %v6587_v35 }
 0x8ce   :  { %2746 = vrot.lane.b32.xlu0 %v2744_v3, %s5466_s26 }
 0x940   :  { %v2747_v39 = vpop.permute.xlu0 %2746 }
 0x941   :  { %v2749_v41 = vadd.f32 %v2747_v39, %v2739_v36 }
 0x943   :  { %5388 = vtanh.f32 %v2749_v41  ;;  %2763 = vrot.lane.b32.xlu0 %v2749_v41, %s5466_s26 }
 0x944   :  { %5390 = vpow2.f32 %v4129_v38 }
 0x94d   :  { %v5389_v37 = vpop.eup %5388 }
 0x94e   :  { %2752 = vrot.lane.b32.xlu1 %v5389_v37, %s5466_s26  ;;  %v5391_v42 = vpop.eup %5390 }
 0x94f   :  { %v2729_v46 = vadd.f32 1.0, %v5391_v42 }
 0x951   :  { %5392 = vrcp.f32 %v2729_v46 }
 0x95b   :  { %v5393_v34 = vpop.eup %5392 }
 0x9b5   :  { %v2764_v51 = vpop.permute.xlu0 %2763 }
 0x9b6   :  { %v2766_v29 = vmul.f32 %v6538_v45, %v2764_v51 }
 0x9b8   :  { %v2768_v33 = vadd.f32 %v2767_v21, %v2766_v29 }
 0x9ba   :  { %2865 = vrot.lane.b32.xlu0 %v2768_v33, %s5466_s26  ;;  %v2896_v39 = vmul.f32 %v6590_v7, %v2768_v33 }
 0x9c0   :  { %v2753_v44 = vpop.permute.xlu1 %2752 }
 0x9c1   :  { %v2755_v48 = vmul.f32 %v5393_v34, %v2753_v44 }
 0x9c3   :  { %v2758_v60 = vmul.f32 %v6538_v45, %v2755_v48 }
 0x9c5   :  { %v6561_v30 = vadd.f32 %v2760_v59, %v2758_v60 }
 0x9c7   :  { %4131 = vmatmul.mubr.msk.f32.vlgmr.msra.gmra.mrb[48].mxu0 %vm1311_vm1, %v6561_v30  ;;  %v2889_v38 = vmul.f32 %v6590_v7, %v6561_v30 }
 0x9c8   :  { %5166 = vmatpush1.bf16.msra.mxu0 %v5165_v61  ;;  %3102 = vmatprep.mubr.f32.mxu0 %v5467_v10  ;;  %v3128_v61 = vld [vmem:[%s6929_s14 + $0x48] sm:$0xff] }
 0x9c9   :  { %5168 = vmatprep.subr.bf16.mxu0 %v5167_v47  ;;  %v3130_v47 = vld [vmem:[%s6929_s14 + $0x58] sm:$0xff] }
 0x9ca   :  { %v5171_v0 = vpack.c.bf16 %v3130_v47, %v3128_v61 }
 0x9cc   :  { %5170 = vmatpush1.bf16.msra.mxu0 %v5169_v2 }
 0x9cd   :  { %5172 = vmatprep.subr.bf16.mxu0 %v5171_v0 }
 0x9cf   :  { %4139 = vmatmul.mubr.msk.f32.vlgmr.msra.gmra.mrb[50].mxu0 %vm3028_vm4, %v6511_v5 }
 0x9d0   :  { %3108 = vmatprep.mubr.f32.mxu0 %v5467_v10 }
 0x9d3   :  { %4140 = vmatmul.mubr.msk.f32.gmra.mrb[52].mxu0 %vm3028_vm4, %v6561_v30 }
 0x9d4   :  { %3114 = vmatprep.mubr.f32.mxu0 %v5467_v10 }
 0xa2c   :  { %v2866_v32 = vpop.permute.xlu0 %2865 }
 0xa9a   :  { %v2844_v15 = vpop.f32.mrb[48].mxu0 }
 0xa9b   :  { %v2849_v17 = vadd.f32 %v2844_v15, %v6476_v40  ;;  %v2846_v23 = vpop.f32.mrb[49].mxu0  ;;  %v3132_v15 = vld [vmem:[%s6929_s14 + $0x68] sm:$0xff] }
 0xa9c   :  { %v2850_v24 = vadd.f32 %v2846_v23, %v6480_v11  ;;  %v3131_v23 = vld [vmem:[%s6929_s14 + $0x60] sm:$0xff] }
 0xa9d   :  { %v4132_v28 = vmul.f32 -1.442695, %v2849_v17  ;;  %v3134_v17 = vld [vmem:[%s6929_s14 + $0x78] sm:$0xff] }
 0xa9e   :  { %5394 = vtanh.f32 %v2850_v24  ;;  %v4133_v16 = vmul.f32 -1.442695, %v2850_v24  ;;  %v5175_v24 = vpack.c.bf16 %v3134_v17, %v3132_v15 }
 0xa9f   :  { %5396 = vpow2.f32 %v4132_v28 }
 0xaa8   :  { %v5395_v25 = vpop.eup %5394 }
 0xaa9   :  { %2870 = vrot.lane.b32.xlu1 %v5395_v25, %s5466_s26  ;;  %v5397_v31 = vpop.eup %5396  ;;  %v3133_v25 = vld [vmem:[%s6929_s14 + $0x70] sm:$0xff] }
 0xaaa   :  { %v2857_v6 = vadd.f32 1.0, %v5397_v31  ;;  %v5177_v28 = vpack.c.bf16 %v3133_v25, %v3131_v23 }
 0xaac   :  { %5398 = vrcp.f32 %v2857_v6  ;;  %v2480_v6 = vld [vmem:[%s6930_s16 + $0x8] sm:$0xff] }
 0xab6   :  { %v5399_v26 = vpop.eup %5398 }
 0xab7   :  { %v2868_v58 = vmul.f32 %v5399_v26, %v2866_v32  ;;  %v2481_v32 = vld [vmem:[%s6930_s16 + $0x10] sm:$0xff] }
 0xb1b   :  { %v2871_v27 = vpop.permute.xlu1 %2870 }
 0xb1c   :  { %v2873_v50 = vmul.f32 %v5399_v26, %v2871_v27  ;;  %v2482_v26 = vld [vmem:[%s6930_s16 + $0x18] sm:$0xff]  ;;  %v2479_v27 = vld [vmem:[%s6930_s16] sm:$0xff] }
 0xb1e   :  { %2875 = vrot.lane.b32.xlu1 %v2873_v50, %s5466_s26  ;;  %v5179_v50 = vpack.c.bf16 %v2482_v26, %v2480_v6 }
 0xb20   :  { %5180 = vmatprep.subr.bf16.mxu1 %v5179_v50 }
 0xb90   :  { %v2876_v40 = vpop.permute.xlu1 %2875 }
 0xb91   :  { %v2878_v62 = vadd.f32 %v2876_v40, %v2868_v58  ;;  %v2486_v58 = vld [vmem:[%s6930_s16 + $0x38] sm:$0xff]  ;;  %v6662_v40 = vpack.c.bf16 %v2481_v32, %v2479_v27 }
 0xb93   :  { %5400 = vtanh.f32 %v2878_v62  ;;  %2892 = vrot.lane.b32.xlu1 %v2878_v62, %s5466_s26 }
 0xb94   :  { %5402 = vpow2.f32 %v4133_v16  ;;  %v2485_v16 = vld [vmem:[%s6930_s16 + $0x30] sm:$0xff] }
 0xb9d   :  { %v5401_v11 = vpop.eup %5400 }
 0xb9e   :  { %2881 = vrot.lane.b32.xlu0 %v5401_v11, %s5466_s26  ;;  %v5403_v20 = vpop.eup %5402  ;;  %v2483_v11 = vld [vmem:[%s6930_s16 + $0x20] sm:$0xff] }
 0xb9f   :  { %v2858_v3 = vadd.f32 1.0, %v5403_v20  ;;  %v2488_v20 = vld [vmem:[%s6930_s16 + $0x48] sm:$0xff] }
 0xba1   :  { %5404 = vrcp.f32 %v2858_v3  ;;  %v2490_v3 = vld [vmem:[%s6930_s16 + $0x58] sm:$0xff] }
 0xbab   :  { %v5405_v13 = vpop.eup %5404 }
 0xc05   :  { %v2893_v36 = vpop.permute.xlu1 %2892 }
 0xc06   :  { %v2895_v41 = vmul.f32 %v6587_v35, %v2893_v36  ;;  %v6679_v36 = vpack.c.bf16 %v2485_v16, %v2483_v11 }
 0xc08   :  { %v2897_v9 = vadd.f32 %v2896_v39, %v2895_v41  ;;  %v6682_v39 = vpack.c.bf16 %v2490_v3, %v2488_v20  ;;  %v2487_v41 = vld [vmem:[%s6930_s16 + $0x40] sm:$0xff] }
 0xc09   :  { %v3240_v20 = vld [vmem:[%s6931_s15] sm:$0x3] }
 0xc0a   :  { %2994 = vrot.lane.b32.xlu1 %v2897_v9, %s5466_s26  ;;  %v2489_v9 = vld [vmem:[%s6930_s16 + $0x50] sm:$0xff] }
 0xc10   :  { %v2882_v14 = vpop.permute.xlu0 %2881 }
 0xc11   :  { %v2884_v37 = vmul.f32 %v5405_v13, %v2882_v14  ;;  %v6691_v13 = vpack.c.bf16 %v2489_v9, %v2487_v41 }
 0xc13   :  { %v2887_v42 = vmul.f32 %v6587_v35, %v2884_v37 }
 0xc15   :  { %v6598_v46 = vadd.f32 %v2889_v38, %v2887_v42  ;;  %v2492_v42 = vld [vmem:[%s6930_s16 + $0x68] sm:$0xff] }
 0xc17   :  { %4135 = vmatmul.mubr.msk.f32.vlgmr.msra.gmra.mrb[60].mxu1 %vm1311_vm1, %v6598_v46  ;;  %4141 = vmatmul.mubr.msk.f32.gmra.mrb[54].mxu0 %vm3028_vm4, %v6598_v46 }
 0xc18   :  { %3120 = vmatprep.mubr.f32.mxu0 %v5467_v10  ;;  %3328 = vmatprep.mubr.f32.mxu1 %v5467_v10 }
 0xc19   :  { %5182 = vmatpush1.bf16.msra.mxu1 %v6662_v40 }
 0xcea   :  { %v2973_v51 = vpop.f32.mrb[60].mxu1 }
 0xceb   :  { %v2978_v21 = vadd.f32 %v2973_v51, %v6490_v52  ;;  %v2975_v29 = vpop.f32.mrb[61].mxu1  ;;  %v2995_v52 = vpop.permute.xlu1 %2994  ;;  %v2494_v51 = vld [vmem:[%s6930_s16 + $0x78] sm:$0xff] }
 0xcec   :  { %v6608_v33 = vadd.f32 %v2975_v29, %v6492_v22  ;;  %v2491_v29 = vld [vmem:[%s6930_s16 + $0x60] sm:$0xff] }
 0xced   :  { %v4136_v44 = vmul.f32 -1.442695, %v2978_v21  ;;  %v6702_v21 = vpack.c.bf16 %v2494_v51, %v2492_v42 }
 0xcee   :  { %5406 = vtanh.f32 %v6608_v33  ;;  %v4137_v14 = vmul.f32 -1.442695, %v6608_v33  ;;  %v2493_v33 = vld [vmem:[%s6930_s16 + $0x70] sm:$0xff] }
 0xcef   :  { %5408 = vpow2.f32 %v4136_v44  ;;  %v6715_v44 = vld [vmem:[%s6928_s2 + $0x18] sm:$0xff] }
 0xcf8   :  { %v5407_v34 = vpop.eup %5406 }
 0xcf9   :  { %2999 = vrot.lane.b32.xlu0 %v5407_v34, %s5466_s26  ;;  %v5409_v48 = vpop.eup %5408  ;;  %v6710_v34 = vpack.c.bf16 %v2493_v33, %v2491_v29 }
 0xcfa   :  { %v2986_v53 = vadd.f32 1.0, %v5409_v48  ;;  %v3017_v48 = vsub.f32 1.0, %v6715_v44 }
 0xcfc   :  { %5410 = vrcp.f32 %v2986_v53 }
 0xd06   :  { %v5411_v55 = vpop.eup %5410 }
 0xd07   :  { %v2997_v22 = vmul.f32 %v5411_v55, %v2995_v52  ;;  %v3018_v52 = vmul.f32 %v3017_v48, %v6598_v46 }
 0xd6b   :  { %v3000_v56 = vpop.permute.xlu0 %2999 }
 0xd6c   :  { %v3002_v57 = vmul.f32 %v5411_v55, %v3000_v56 }
 0xd6e   :  { %3004 = vrot.lane.b32.xlu0 %v3002_v57, %s5466_s26 }
 0xd72   :  { %3135 = vrot.lane.b32.xlu0 %v6511_v5, %s5468_s8  ;;  %v3127_v5 = vld [vmem:[%s6929_s14 + $0x40] sm:$0xff] }
 0xd73   :  { %v5173_v2 = vpack.c.bf16 %v3129_v1, %v3127_v5 }
 0xd75   :  { %5174 = vmatpush1.bf16.msra.mxu0 %v5173_v2 }
 0xd76   :  { %3139 = vrot.lane.b32.xlu0 %v6598_v46, %s5468_s8  ;;  %5176 = vmatprep.subr.bf16.mxu0 %v5175_v24 }
 0xd79   :  { %5178 = vmatpush1.bf16.msra.mxu0 %v5177_v28 }
 0xd7a   :  { %5212 = vmatprep.subr.bf16.mxu0 %v5179_v50 }
 0xde0   :  { %v3005_v59 = vpop.permute.xlu0 %3004 }
 0xde1   :  { %v3007_v60 = vadd.f32 %v3005_v59, %v2997_v22 }
 0xde3   :  { %5412 = vtanh.f32 %v3007_v60 }
 0xde4   :  { %5414 = vpow2.f32 %v4137_v14  ;;  %v3136_v59 = vpop.permute.xlu0 %3135 }
 0xde8   :  { %v3140_v60 = vpop.permute.xlu0 %3139 }
 0xded   :  { %v5413_v31 = vpop.eup %5412 }
 0xdee   :  { %3010 = vrot.lane.b32.xlu1 %v5413_v31, %s5466_s26  ;;  %v5415_v37 = vpop.eup %5414 }
 0xdef   :  { %v2987_v38 = vadd.f32 1.0, %v5415_v37 }
 0xdf1   :  { %5416 = vrcp.f32 %v2987_v38 }
 0xdf2   :  { %3137 = vrot.lane.b32.xlu1 %v6561_v30, %s5468_s8  ;;  %v2484_v30 = vld [vmem:[%s6930_s16 + $0x28] sm:$0xff] }
 0xdf3   :  { %v6664_v62 = vpack.c.bf16 %v2486_v58, %v2484_v30 }
 0xdf5   :  { %5184 = vmatprep.subr.bf16.mxu1 %v6664_v62 }
 0xdf6   :  { %5186 = vmatpush1.bf16.msra.mxu1 %v6679_v36 }
 0xdf7   :  { %5188 = vmatprep.subr.bf16.mxu1 %v6682_v39 }
 0xdfa   :  { %5190 = vmatpush1.bf16.msra.mxu1 %v6691_v13 }
 0xdfb   :  { %5192 = vmatprep.subr.bf16.mxu1 %v6702_v21  ;;  %v5417_v53 = vpop.eup %5416 }
 0xdfe   :  { %5194 = vmatpush1.bf16.msra.mxu1 %v6710_v34 }
 0xdff   :  { %5196 = vmatprep.subr.bf16.mxu1 %v5179_v50 }
 0xe01   :  { %3329 = vmatmul.mubr.f32.vlgmr.msra.gmra.mrb[62].mxu1 %v5467_v10 }
 0xe02   :  { %5198 = vmatpush1.bf16.msra.mxu1 %v6662_v40  ;;  %3457 = vmatprep.mubr.f32.mxu1 %v5467_v10 }
 0xe03   :  { %5200 = vmatprep.subr.bf16.mxu1 %v6664_v62 }
 0xe06   :  { %5202 = vmatpush1.bf16.msra.mxu1 %v6679_v36 }
 0xe07   :  { %5204 = vmatprep.subr.bf16.mxu1 %v6682_v39 }
 0xe0a   :  { %5206 = vmatpush1.bf16.msra.mxu1 %v6691_v13 }
 0xe0b   :  { %5208 = vmatprep.subr.bf16.mxu1 %v6702_v21 }
 0xe0e   :  { %5210 = vmatpush1.bf16.msra.mxu1 %v6710_v34 }
 0xe0f   :  { %5228 = vmatprep.subr.bf16.mxu1 %v5179_v50 }
 0xe60   :  { %v3011_v55 = vpop.permute.xlu1 %3010 }
 0xe61   :  { %v3013_v56 = vmul.f32 %v5417_v53, %v3011_v55  ;;  %v6781_v55 = vrot.slane %v3240_v20, %v6442_v43 }
 0xe63   :  { %v3016_v57 = vmul.f32 %v6715_v44, %v3013_v56 }
 0xe64   :  { %v3138_v46 = vpop.permute.xlu1 %3137 }
 0xe65   :  { %v3019_v22 = vadd.f32 %v3018_v52, %v3016_v57 }
 0xe67   :  { %3141 = vrot.lane.b32.xlu1 %v3019_v22, %s5468_s8  ;;  %4142 = vmatmul.mubr.msk.f32.gmra.mrb[56].mxu0 %vm3028_vm4, %v3019_v22 }
 0xe68   :  { %3215 = vmatprep.mubr.f32.mxu0 %v5467_v10 }
 0xe6f   :  { %4143 = vmatmul.mubr.msk.f32.vlgmr.msra.gmra.mrb[56].mxu0 %vm3028_vm4, %v3136_v59 }
 0xe70   :  { %3221 = vmatprep.mubr.f32.mxu0 %v5467_v10  ;;  %5214 = vmatpush1.bf16.msra.mxu0 %v6662_v40 }
 0xe71   :  { %5216 = vmatprep.subr.bf16.mxu0 %v6664_v62 }
 0xe73   :  { %4144 = vmatmul.mubr.msk.f32.gmra.mrb[54].mxu0 %vm3028_vm4, %v3138_v46 }
 0xe74   :  { %3227 = vmatprep.mubr.f32.mxu0 %v5467_v10  ;;  %5218 = vmatpush1.bf16.msra.mxu0 %v6679_v36 }
 0xe75   :  { %5220 = vmatprep.subr.bf16.mxu0 %v6682_v39 }
 0xe77   :  { %4145 = vmatmul.mubr.msk.f32.gmra.mrb[52].mxu0 %vm3028_vm4, %v3140_v60 }
 0xe78   :  { %3233 = vmatprep.mubr.f32.mxu0 %v5467_v10  ;;  %5222 = vmatpush1.bf16.msra.mxu0 %v6691_v13 }
 0xe79   :  { %5224 = vmatprep.subr.bf16.mxu0 %v6702_v21 }
 0xe7c   :  { %5226 = vmatpush1.bf16.msra.mxu0 %v6710_v34 }
 0xed4   :  { %v3330_v47 = vpop.f32.mrb[62].mxu1 }
 0xed5   :  { %v3332_v0 = vpop.f32.mrb[63].mxu1 }
 0xed9   :  { %v3142_v61 = vpop.permute.xlu1 %3141 }
 0xeda   :  { %4146 = vmatmul.mubr.msk.f32.gmra.mrb[50].mxu0 %vm3028_vm4, %v3142_v61 }
 0xedb   :  { %3589 = vmatprep.mubr.f32.mxu0 %v5467_v10 }
 0xf42   :  { %v3217_v5 = vpop.f32.mrb[56].mxu0 }
 0xf43   :  { %v3219_v1 = vpop.f32.mrb[57].mxu0  ;;  %v3247_v3 = vmul.f32 %v3217_v5, %v6458_v8  ;;  %v3646_v41 = vmul.f32 %v3217_v5, %v6455_v4 }
 0xf44   :  { %v3248_v38 = vmul.f32 %v3219_v1, %v6464_v19  ;;  %v3647_v42 = vmul.f32 %v3219_v1, %v6461_v18 }
 0xf46   :  { %v3223_v2 = vpop.f32.mrb[54].mxu0 }
 0xf47   :  { %v3225_v15 = vpop.f32.mrb[55].mxu0  ;;  %v3384_v23 = vmul.f32 %v3223_v2, %v6458_v8  ;;  %v3514_v24 = vmul.f32 %v3223_v2, %v6455_v4 }
 0xf48   :  { %v3385_v6 = vmul.f32 %v3225_v15, %v6464_v19  ;;  %v3515_v26 = vmul.f32 %v3225_v15, %v6461_v18 }
 0xf4a   :  { %v3229_v17 = vpop.f32.mrb[52].mxu0 }
 0xf4b   :  { %v3382_v25 = vmul.f32 %v3229_v17, %v6455_v4  ;;  %v3516_v28 = vmul.f32 %v3229_v17, %v6458_v8  ;;  %v3231_v31 = vpop.f32.mrb[53].mxu0 }
 0xf4c   :  { %v3383_v27 = vmul.f32 %v3231_v31, %v6461_v18  ;;  %v3517_v50 = vmul.f32 %v3231_v31, %v6464_v19 }
 0xf4d   :  { %v6759_v32 = vadd.f32 %v3384_v23, %v3382_v25  ;;  %v6761_v30 = vadd.f32 %v3516_v28, %v3514_v24 }
 0xf4e   :  { %v6763_v58 = vadd.f32 %v3385_v6, %v3383_v27  ;;  %v6765_v11 = vadd.f32 %v3517_v50, %v3515_v26 }
 0xfad   :  { %v3235_v16 = vpop.f32.mrb[50].mxu0 }
 0xfae   :  { %v3245_v9 = vmul.f32 %v3235_v16, %v6455_v4  ;;  %v3648_v14 = vmul.f32 %v3235_v16, %v6458_v8  ;;  %v3237_v37 = vpop.f32.mrb[51].mxu0  ;;  %v6786_v4 = vrot.slane %v3240_v20, %v6448_v54 }
 0xfaf   :  { %v3246_v51 = vmul.f32 %v3237_v37, %v6461_v18  ;;  %v3649_v29 = vmul.f32 %v3237_v37, %v6464_v19 }
 0xfb0   :  { %v3249_v33 = vadd.f32 %v3247_v3, %v3245_v9  ;;  %v6778_v53 = vadd.f32 %v3648_v14, %v3646_v41 }
 0xfb1   :  { %v3250_v56 = vadd.f32 %v3248_v38, %v3246_v51  ;;  %v6783_v57 = vadd.f32 %v3649_v29, %v3647_v42 }
 0xfb2   :  { %v3262_v8 = vadd.f32 %v6781_v55, %v3249_v33 }
 0xfb3   :  { %v3263_v52 = vadd.f32 %v6786_v4, %v3250_v56 }
 0xfb4   :  { %v3335_v22 = vadd.f32 %v3330_v47, %v3262_v8 }
 0xfb5   :  { %v3336_v18 = vadd.f32 %v3332_v0, %v3263_v52 }
 0xfb6   :  { %v4147_v59 = vmul.f32 -1.442695, %v3335_v22 }
 0xfb7   :  { %5418 = vtanh.f32 %v3336_v18  ;;  %v4148_v0 = vmul.f32 -1.442695, %v3336_v18 }
 0xfb8   :  { %5420 = vpow2.f32 %v4147_v59  ;;  %v3375_v59 = vld [vmem:[%s6932_s3] sm:$0xff] }
 0xfc1   :  { %v5419_v19 = vpop.eup %5418 }
 0xfc2   :  { %3352 = vrot.lane.b32.xlu0 %v5419_v19, %s5466_s26  ;;  %v5421_v43 = vpop.eup %5420 }
 0xfc3   :  { %v3343_v46 = vadd.f32 1.0, %v5421_v43  ;;  %v4152_v43 = vld [vmem:[%s6932_s3 + $0x8] sm:$0xff] }
 0xfc5   :  { %5422 = vrcp.f32 %v3343_v46 }
 0xfcf   :  { %v5423_v60 = vpop.eup %5422 }
 0xfd0   :  { %v3350_v54 = vmul.f32 0.0, %v5423_v60 }
0x1034   :  { %v3353_v61 = vpop.permute.xlu0 %3352 }
0x1035   :  { %v3355_v5 = vmul.f32 %v5423_v60, %v3353_v61 }
0x1037   :  { %3357 = vrot.lane.b32.xlu1 %v3355_v5, %s5466_s26 }
0x10a9   :  { %v3358_v1 = vpop.permute.xlu1 %3357 }
0x10aa   :  { %v3360_v2 = vadd.f32 %v3358_v1, %v3350_v54  ;;  %v3520_v54 = vadd.f32 %v6761_v30, %v6781_v55 }
0x10ac   :  { %5424 = vtanh.f32 %v3360_v2  ;;  %3370 = vrot.lane.b32.xlu1 %v3360_v2, %s5466_s26 }
0x10ad   :  { %5426 = vpow2.f32 %v4148_v0 }
0x10b6   :  { %v5425_v47 = vpop.eup %5424 }
0x10b7   :  { %3363 = vrot.lane.b32.xlu0 %v5425_v47, %s5466_s26  ;;  %v5427_v15 = vpop.eup %5426 }
0x10b8   :  { %v3344_v17 = vadd.f32 1.0, %v5427_v15 }
0x10ba   :  { %5428 = vrcp.f32 %v3344_v17 }
0x10c4   :  { %v5429_v28 = vpop.eup %5428 }
0x111e   :  { %v3371_v23 = vpop.permute.xlu1 %3370 }
0x111f   :  { %v3373_v24 = vmul.f32 %v3371_v23, %v6501_v63 }
0x1121   :  { %v3374_v25 = vadd.f32 %v3373_v24, %v6504_v12 }
0x1123   :  { %3480 = vrot.lane.b32.xlu1 %v3374_v25, %s5466_s26  ;;  %v3508_v29 = vmul.f32 %v3374_v25, %v6541_v49 }
0x1129   :  { %v3364_v31 = vpop.permute.xlu0 %3363 }
0x112a   :  { %v3366_v6 = vmul.f32 %v5429_v28, %v3364_v31 }
0x112c   :  { %v3367_v26 = vmul.f32 %v3366_v6, %v6501_v63  ;;  %v3388_v63 = vadd.f32 %v6759_v32, %v6781_v55 }
0x112e   :  { %v3368_v27 = vadd.f32 %v3367_v26, %v6504_v12 }
0x1130   :  { %4149 = vmatmul.mubr.msk.f32.vlgmr.msra.gmra.mrb[64].mxu1 %vm1311_vm1, %v3368_v27  ;;  %v3501_v18 = vmul.f32 %v3368_v27, %v6541_v49  ;;  %v3376_v60 = vmul.f32 %v3375_v59, %v3368_v27 }
0x1131   :  { %5230 = vmatpush1.bf16.msra.mxu1 %v6662_v40  ;;  %3721 = vmatprep.mubr.f32.mxu1 %v5467_v10  ;;  %v3389_v40 = vadd.f32 %v6763_v58, %v6786_v4 }
0x1132   :  { %5232 = vmatprep.subr.bf16.mxu1 %v6664_v62 }
0x1135   :  { %5234 = vmatpush1.bf16.msra.mxu1 %v6679_v36 }
0x1136   :  { %5236 = vmatprep.subr.bf16.mxu1 %v6682_v39 }
0x1139   :  { %5238 = vmatpush1.bf16.msra.mxu1 %v6691_v13 }
0x113a   :  { %5240 = vmatprep.subr.bf16.mxu1 %v6702_v21 }
0x113d   :  { %5242 = vmatpush1.bf16.msra.mxu1 %v6710_v34 }
0x1195   :  { %v3481_v32 = vpop.permute.xlu1 %3480 }
0x1203   :  { %v3459_v12 = vpop.f32.mrb[64].mxu1 }
0x1204   :  { %v3464_v50 = vadd.f32 %v3459_v12, %v3388_v63  ;;  %v3461_v16 = vpop.f32.mrb[65].mxu1 }
0x1205   :  { %v3465_v62 = vadd.f32 %v3461_v16, %v3389_v40 }
0x1206   :  { %v4150_v39 = vmul.f32 -1.442695, %v3464_v50 }
0x1207   :  { %5430 = vtanh.f32 %v3465_v62  ;;  %v4151_v37 = vmul.f32 -1.442695, %v3465_v62 }
0x1208   :  { %5432 = vpow2.f32 %v4150_v39 }
0x1211   :  { %v5431_v36 = vpop.eup %5430 }
0x1212   :  { %3485 = vrot.lane.b32.xlu0 %v5431_v36, %s5466_s26  ;;  %v5433_v13 = vpop.eup %5432 }
0x1213   :  { %v3472_v21 = vadd.f32 1.0, %v5433_v13 }
0x1215   :  { %5434 = vrcp.f32 %v3472_v21 }
0x121f   :  { %v5435_v34 = vpop.eup %5434 }
0x1220   :  { %v3483_v41 = vmul.f32 %v5435_v34, %v3481_v32 }
0x1284   :  { %v3486_v20 = vpop.permute.xlu0 %3485 }
0x1285   :  { %v3488_v3 = vmul.f32 %v5435_v34, %v3486_v20  ;;  %v4156_v20 = vld [vmem:[%s6932_s3 + $0x10] sm:$0xff] }
0x1287   :  { %3490 = vrot.lane.b32.xlu0 %v3488_v3, %s5466_s26 }
0x12f9   :  { %v3491_v58 = vpop.permute.xlu0 %3490 }
0x12fa   :  { %v3493_v9 = vadd.f32 %v3491_v58, %v3483_v41  ;;  %v3652_v58 = vadd.f32 %v6778_v53, %v6781_v55  ;;  %v5469_v53 = vmov 0.0|0.0   ;;  %v3771_v55 = vld [vmem:[%s6933_s18] sm:$0xff] }
0x12fb   :  { %5243 = vmatprep.subr.bf16.mxu0 %v5469_v53  ;;  %5255 = vmatprep.subr.bf16.mxu1 %v5469_v53 }
0x12fc   :  { %5436 = vtanh.f32 %v3493_v9  ;;  %3504 = vrot.lane.b32.xlu0 %v3493_v9, %s5466_s26 }
0x12fd   :  { %5438 = vpow2.f32 %v4151_v37 }
0x1306   :  { %v5437_v14 = vpop.eup %5436 }
0x1307   :  { %3496 = vrot.lane.b32.xlu1 %v5437_v14, %s5466_s26  ;;  %v5439_v38 = vpop.eup %5438 }
0x1308   :  { %v3473_v42 = vadd.f32 1.0, %v5439_v38 }
0x130a   :  { %5440 = vrcp.f32 %v3473_v42 }
0x1314   :  { %v5441_v8 = vpop.eup %5440 }
0x136e   :  { %v3505_v51 = vpop.permute.xlu0 %3504 }
0x136f   :  { %v3507_v33 = vmul.f32 %v6538_v45, %v3505_v51 }
0x1371   :  { %v3509_v56 = vadd.f32 %v3508_v29, %v3507_v33 }
0x1373   :  { %3612 = vrot.lane.b32.xlu0 %v3509_v56, %s5466_s26  ;;  %v3640_v50 = vmul.f32 %v3509_v56, %v6590_v7 }
0x1379   :  { %v3497_v52 = vpop.permute.xlu1 %3496 }
0x137a   :  { %v3499_v22 = vmul.f32 %v5441_v8, %v3497_v52 }
0x137c   :  { %v3500_v19 = vmul.f32 %v6538_v45, %v3499_v22  ;;  %v3521_v45 = vadd.f32 %v6765_v11, %v6786_v4  ;;  %v3774_v22 = vld [vmem:[%s6933_s18 + $0x18] sm:$0xff] }
0x137e   :  { %v3502_v46 = vadd.f32 %v3501_v18, %v3500_v19 }
0x1380   :  { %v3512_v61 = vmul.f32 %v4152_v43, %v3502_v46  ;;  %4153 = vmatmul.mubr.msk.f32.vlgmr.msra.gmra.mrb[58].mxu0 %vm1311_vm1, %v3502_v46  ;;  %v3633_v21 = vmul.f32 %v3502_v46, %v6590_v7 }
0x1381   :  { %4861 = vmatprep.mubr.msk.f32.mxu0 %vm5470_vm5, %v5467_v10 }
0x1382   :  { %v3513_v5 = vadd.f32 %v3512_v61, %v3376_v60  ;;  %v3775_v60 = vld [vmem:[%s6933_s18 + $0x20] sm:$0xff]  ;;  %v3776_v61 = vld [vmem:[%s6933_s18 + $0x28] sm:$0xff] }
0x13e5   :  { %v3613_v30 = vpop.permute.xlu0 %3612 }
0x1453   :  { %v3591_v49 = vpop.f32.mrb[58].mxu0 }
0x1454   :  { %v3596_v1 = vadd.f32 %v3591_v49, %v3520_v54  ;;  %v3593_v2 = vpop.f32.mrb[59].mxu0  ;;  %v3777_v54 = vld [vmem:[%s6933_s18 + $0x30] sm:$0xff]  ;;  %v3778_v49 = vld [vmem:[%s6933_s18 + $0x38] sm:$0xff] }
0x1455   :  { %v3597_v47 = vadd.f32 %v3593_v2, %v3521_v45  ;;  %v5253_v45 = vpack.c.bf16 %v3778_v49, %v3777_v54  ;;  %v3861_v2 = vld [vmem:[%s6934_s20 + $0x8] sm:$0xff] }
0x1456   :  { %v4154_v15 = vmul.f32 -1.442695, %v3596_v1  ;;  %v3860_v1 = vld [vmem:[%s6934_s20] sm:$0xff] }
0x1457   :  { %5442 = vtanh.f32 %v3597_v47  ;;  %v4155_v27 = vmul.f32 -1.442695, %v3597_v47 }
0x1458   :  { %5444 = vpow2.f32 %v4154_v15 }
0x1461   :  { %v5443_v0 = vpop.eup %5442 }
0x1462   :  { %3617 = vrot.lane.b32.xlu1 %v5443_v0, %s5466_s26  ;;  %v5445_v17 = vpop.eup %5444  ;;  %v5256_v0 = vpack.c.bf16 %v3861_v2, %v3860_v1 }
0x1463   :  { %v3604_v23 = vadd.f32 1.0, %v5445_v17 }
0x1465   :  { %5446 = vrcp.f32 %v3604_v23 }
0x146f   :  { %v5447_v24 = vpop.eup %5446 }
0x1470   :  { %v3615_v31 = vmul.f32 %v5447_v24, %v3613_v30 }
0x14d4   :  { %v3618_v25 = vpop.permute.xlu1 %3617 }
0x14d5   :  { %v3620_v28 = vmul.f32 %v5447_v24, %v3618_v25 }
0x14d7   :  { %3622 = vrot.lane.b32.xlu1 %v3620_v28, %s5466_s26 }
0x1549   :  { %v3623_v11 = vpop.permute.xlu1 %3622 }
0x154a   :  { %v3625_v6 = vadd.f32 %v3623_v11, %v3615_v31  ;;  %v4160_v31 = vld [vmem:[%s6932_s3 + $0x18] sm:$0xff] }
0x154c   :  { %5448 = vtanh.f32 %v3625_v6  ;;  %3636 = vrot.lane.b32.xlu1 %v3625_v6, %s5466_s26 }
0x154d   :  { %5450 = vpow2.f32 %v4155_v27  ;;  %v3862_v27 = vld [vmem:[%s6934_s20 + $0x10] sm:$0xff] }
0x1556   :  { %v5449_v26 = vpop.eup %5448 }
0x1557   :  { %3628 = vrot.lane.b32.xlu0 %v5449_v26, %s5466_s26  ;;  %v5451_v63 = vpop.eup %5450 }
0x1558   :  { %v3605_v12 = vadd.f32 1.0, %v5451_v63 }
0x155a   :  { %5452 = vrcp.f32 %v3605_v12 }
0x1564   :  { %v5453_v36 = vpop.eup %5452 }
0x15be   :  { %v3637_v40 = vpop.permute.xlu1 %3636 }
0x15bf   :  { %v3639_v16 = vmul.f32 %v6587_v35, %v3637_v40 }
0x15c1   :  { %v3641_v62 = vadd.f32 %v3640_v50, %v3639_v16 }
0x15c3   :  { %3744 = vrot.lane.b32.xlu1 %v3641_v62, %s5466_s26  ;;  %v4163_v62 = vld [vmem:[%s6936_s21] ss:$0 sm:$0xff] }
0x15c9   :  { %v3629_v39 = vpop.permute.xlu0 %3628 }
0x15ca   :  { %v3631_v13 = vmul.f32 %v5453_v36, %v3629_v39 }
0x15cc   :  { %v3632_v34 = vmul.f32 %v6587_v35, %v3631_v13  ;;  %v3653_v35 = vadd.f32 %v6783_v57, %v6786_v4  ;;  %v3772_v57 = vld [vmem:[%s6933_s18 + $0x8] sm:$0xff]  ;;  %v3773_v4 = vld [vmem:[%s6933_s18 + $0x10] sm:$0xff] }
0x15cd   :  { %v5244_v52 = vpack.c.bf16 %v3772_v57, %v3771_v55  ;;  %v5247_v18 = vpack.c.bf16 %v3774_v22, %v3773_v4 }
0x15ce   :  { %v6844_v3 = vadd.f32 %v3633_v21, %v3632_v34 }
0x15cf   :  { %5245 = vmatpush3.bf16.msra.mxu0 %v5244_v52 }
0x15d0   :  { %v3644_v32 = vmul.f32 %v4156_v20, %v6844_v3  ;;  %4157 = vmatmul.mubr.msk.f32.vlgmr.msra.gmra.mrb[66].mxu1 %vm1311_vm1, %v6844_v3  ;;  %5246 = vmatprep.subr.bf16.mxu0 %v5469_v53  ;;  %v3765_v28 = vmul.f32 %v6844_v3, %v3017_v48  ;;  %v3863_v48 = vld [vmem:[%s6934_s20 + $0x18] sm:$0xff] }
0x15d1   :  { %4872 = vmatprep.mubr.msk.f32.mxu1 %vm5470_vm5, %v5467_v10  ;;  %5257 = vmatpush3.bf16.msra.mxu1 %v5256_v0  ;;  %v5259_v63 = vpack.c.bf16 %v3863_v48, %v3862_v27 }
0x15d2   :  { %v6849_v41 = vadd.f32 %v3644_v32, %v3513_v5  ;;  %v5250_v5 = vpack.c.bf16 %v3776_v61, %v3775_v60  ;;  %5258 = vmatprep.subr.bf16.mxu1 %v5469_v53 }
0x15d3   :  { %5248 = vmatpush3.bf16.msra.mxu0 %v5247_v18 }
0x15d4   :  { %5249 = vmatprep.subr.bf16.mxu0 %v5469_v53 }
0x15d5   :  { %5260 = vmatpush3.bf16.msra.mxu1 %v5259_v63 }
0x15d7   :  { %5251 = vmatpush3.bf16.msra.mxu0 %v5250_v5 }
0x15d8   :  { %5252 = vmatprep.subr.bf16.mxu0 %v5469_v53 }
0x15db   :  { %5254 = vmatpush3.bf16.msra.mxu0 %v5253_v45 }
0x1635   :  { %v3745_v19 = vpop.permute.xlu1 %3744 }
0x16a3   :  { %v3723_v9 = vpop.f32.mrb[66].mxu1 }
0x16a4   :  { %v3728_v7 = vadd.f32 %v3723_v9, %v3652_v58  ;;  %v3725_v14 = vpop.f32.mrb[67].mxu1 }
0x16a5   :  { %v3729_v37 = vadd.f32 %v3725_v14, %v3653_v35 }
0x16a6   :  { %v4158_v42 = vmul.f32 -1.442695, %v3728_v7 }
0x16a7   :  { %5454 = vtanh.f32 %v3729_v37  ;;  %v4159_v15 = vmul.f32 -1.442695, %v3729_v37 }
0x16a8   :  { %5456 = vpow2.f32 %v4158_v42 }
0x16b1   :  { %v5455_v38 = vpop.eup %5454 }
0x16b2   :  { %3749 = vrot.lane.b32.xlu0 %v5455_v38, %s5466_s26  ;;  %v5457_v51 = vpop.eup %5456 }
0x16b3   :  { %v3736_v29 = vadd.f32 1.0, %v5457_v51 }
0x16b5   :  { %5458 = vrcp.f32 %v3736_v29 }
0x16bf   :  { %v5459_v33 = vpop.eup %5458 }
0x16c0   :  { %v3747_v59 = vmul.f32 %v5459_v33, %v3745_v19 }
0x1724   :  { %v3750_v56 = vpop.permute.xlu0 %3749 }
0x1725   :  { %v3752_v8 = vmul.f32 %v5459_v33, %v3750_v56 }
0x1727   :  { %3754 = vrot.lane.b32.xlu0 %v3752_v8, %s5466_s26 }
0x1799   :  { %v3755_v43 = vpop.permute.xlu0 %3754 }
0x179a   :  { %v3757_v46 = vadd.f32 %v3755_v43, %v3747_v59 }
0x179c   :  { %5460 = vtanh.f32 %v3757_v46 }
0x179d   :  { %5462 = vpow2.f32 %v4159_v15 }
0x17a6   :  { %v5461_v47 = vpop.eup %5460 }
0x17a7   :  { %3760 = vrot.lane.b32.xlu1 %v5461_v47, %s5466_s26  ;;  %v5463_v17 = vpop.eup %5462 }
0x17a8   :  { %v3737_v23 = vadd.f32 1.0, %v5463_v17 }
0x17aa   :  { %5464 = vrcp.f32 %v3737_v23 }
0x17b4   :  { %v5465_v10 = vpop.eup %5464 }
0x1819   :  { %v3761_v24 = vpop.permute.xlu1 %3760 }
0x181a   :  { %v3763_v25 = vmul.f32 %v5465_v10, %v3761_v24 }
0x181c   :  { %v3764_v30 = vmul.f32 %v6715_v44, %v3763_v25  ;;  %v4161_v44 = vld [vmem:[%s6935_s19] ss:$0 sm:$0xff] }
0x181e   :  { %v3766_v11 = vadd.f32 %v3765_v28, %v3764_v30 }
0x1820   :  { %v3769_v6 = vmul.f32 %v4160_v31, %v3766_v11 }
0x1822   :  { %v3770_v26 = vadd.f32 %v3769_v6, %v6849_v41 }
0x1824   :  { %4862 = vmatmul.mubr.msk.f32.vlgmr.msra.gmra.mrb[60].mxu0 %vm1311_vm1, %v3770_v26 }
0x18f7   :  { %v3855_v12 = vpop.f32.mrb[60].mxu0 }
0x18f8   :  { %v3856_v40 = vadd.f32 %v4161_v44, %v3855_v12  ;;  %v4863_v50 = vpop.f32.mrb[61].mxu0 }
0x18fa   :  { %v3859_v16 = vmax.f32 %v3856_v40, 0.0 }
0x18fc   :  { %4873 = vmatmul.mubr.msk.f32.vlgmr.msra.gmra.mrb[68].mxu1 %vm3028_vm4, %v3859_v16 }
0x19cf   :  { %v3940_v36 = vpop.f32.mrb[68].mxu1 }
0x19d0   :  { %v3941_v39 = vadd.f32 %v4163_v62, %v3940_v36  ;;  %v4874_v13 = vpop.f32.mrb[69].mxu1 }
0x19d2   :  { %3944 = vst [vmem:[%s6937_s22] sm:$0xff] %v3941_v39 }

</bundles_post_ra>
